<compile_context>
chip_gen: v7x
topology: tpu7x:2x2x1
jax: 0.10.0
libtpu: 0.0.40
codegen_flags: <defaults>
</compile_context>

<pallas_src>
import jax
import jax.numpy as jnp
from jax import lax
from jax.experimental import pallas as pl
from jax.experimental.pallas import tpu as pltpu

VMEM_SPEC = pl.BlockSpec(memory_space=pltpu.MemorySpace.VMEM)


# ------------------------------- fused kernel -------------------------------
def _fused_kernel(x_ref, h0_ref, gamma_ref, beta_ref,
                  wih_ref, bgi_ref, rvm_ref, whh_ref, bhn_ref,
                  wqkv_ref, bqkv_ref, w2_ref, b2_ref, wls_ref, bder_ref,
                  o_ref, hout_ref,
                  att_scr):
    L, B, C = x_ref.shape                          # (16, B, C_in)
    H = bhn_ref.shape[1] // 2
    E = 2 * H
    O = w2_ref.shape[1] // 3
    f32 = jnp.float32
    bf16 = jnp.bfloat16

    # ---------- Stage 1: BatchNorm1d (batch stats, two-pass) + ReLU ----------
    x = x_ref[...]                                 # (L, B, C)
    inv_n = 1.0 / (L * B)
    mean = jnp.sum(x, axis=(0, 1), keepdims=True) * inv_n
    xc = x - mean
    var = jnp.sum(xc * xc, axis=(0, 1), keepdims=True) * inv_n
    scale = gamma_ref[...][None] * lax.rsqrt(var + 1e-5)
    xb = jnp.maximum(xc * scale + beta_ref[...][None], 0.0)        # (L, B, C)

    # ---------- Stage 2: bidirectional GRU, one MXU issue per step ----------
    # Gate columns are gate-major, direction-interleaved: [r_f r_r | z_f z_r | n_f n_r].
    gi = jnp.einsum('lbc,cg->lbg', xb, wih_ref[...],
                    preferred_element_type=f32) + bgi_ref[...]     # (L, B, 6H), biases folded
    rvm = rvm_ref[...]                             # (1, 6H): 1.0 on reverse-direction columns
    fwm = 1.0 - rvm
    whh = whh_ref[...]                             # (2H, 6H) bf16, block-diag per direction
    bhn = bhn_ref[...]                             # (1, 2H) hidden bias of the n gate [f|r]

    h_cat = jnp.concatenate([h0_ref[0], h0_ref[1]], axis=1)        # (B, 2H) = [h_fwd | h_rev]
    for s in range(L):                             # fully unrolled (L static & small)
        # forward columns read time s, reverse columns read time L-1-s (off the serial chain)
        g_x = gi[s] * fwm + gi[L - 1 - s] * rvm                    # (B, 6H)
        hh = jnp.dot(h_cat.astype(bf16), whh,
                     preferred_element_type=f32)                   # ONE bf16 MXU pass
        rz = jax.nn.sigmoid(g_x[:, 0:4 * H] + hh[:, 0:4 * H])      # one EUP call for r|z
        r_cat = rz[:, 0:2 * H]
        z_cat = rz[:, 2 * H:4 * H]
        n_cat = jnp.tanh(g_x[:, 4 * H:] + r_cat * (hh[:, 4 * H:] + bhn))
        h_cat = (1.0 - z_cat) * n_cat + z_cat * h_cat
        att_scr[:, s, 0:H] = h_cat[:, 0:H]          # forward output at time s
        att_scr[:, L - 1 - s, H:E] = h_cat[:, H:E]  # reverse output at original time L-1-s

    hout_ref[...] = jnp.stack([h_cat[:, 0:H], h_cat[:, H:E]], axis=0)   # (2, B, H), one store

    # ---------- Stage 3: single-head self-attention ----------
    att_in = att_scr[...]                          # (B, L, E) -- no concat needed
    qkv = jnp.einsum('ble,ef->blf', att_in, wqkv_ref[...],
                     preferred_element_type=f32) + bqkv_ref[...]   # (B, L, 3E), q pre-scaled
    q = qkv[:, :, 0:E]
    k = qkv[:, :, E:2 * E]
    v = qkv[:, :, 2 * E:3 * E]
    sco = jnp.einsum('ble,bme->blm', q, k, preferred_element_type=f32)
    sco = sco - jnp.max(sco, axis=-1, keepdims=True)
    pr = jnp.exp(sco)
    pr = pr * pl.reciprocal(jnp.sum(pr, axis=-1, keepdims=True), approx=True)
    ctx = jnp.einsum('blm,bme->ble', pr, v, preferred_element_type=f32)

    # ---------- Stage 4: folded out_proj -> fc -> conv taps -> length-Linear ----------
    ztap = jnp.einsum('ble,ek->blk', ctx, w2_ref[...],
                      preferred_element_type=f32) + b2_ref[...]    # (B, L, 3O), col = t*O + o
    wls = wls_ref[...]                             # (Lp, 3L), col = t*L + l (length-Linear folded)
    bder = bder_ref[...]                           # (O, Lp) folded conv/linear biases
    outs = []
    for b in range(B):                             # B=2 tiny 2-D dots
        zcat = jnp.concatenate([ztap[b, :, 0:O], ztap[b, :, O:2 * O], ztap[b, :, 2 * O:3 * O]],
                               axis=0)             # (3L, O), row = t*L + l
        outs.append(jnp.einsum('ko,mk->om', zcat, wls, preferred_element_type=f32) + bder)
    o_ref[...] = jnp.stack(outs, axis=0)           # single (B, O, Lp) store


# --------------------- one-time derived-weight preparation ---------------------
def pack_params(p, L):
    """Hoisted out of the per-call path: run once per parameter set."""
    f32 = jnp.float32
    H = p['gru_f']['whh'].shape[1]
    E = 2 * H
    O = p['wfc'].shape[0]
    Lp = p['wlin'].shape[0]

    # --- GRU weights: gate-major, direction-interleaved columns [r_f r_r z_f z_r n_f n_r] ---
    def col_block(w, g):                           # (3H, K) -> (K, H) for gate g
        return w[g * H:(g + 1) * H, :].T

    zH = jnp.zeros((H, H), f32)
    wih_cols, whh_cols = [], []
    for g in range(3):
        wih_cols += [col_block(p['gru_f']['wih'], g), col_block(p['gru_r']['wih'], g)]
        whh_cols += [jnp.concatenate([col_block(p['gru_f']['whh'], g), zH], axis=0),
                     jnp.concatenate([zH, col_block(p['gru_r']['whh'], g)], axis=0)]
    wih_both = jnp.concatenate(wih_cols, axis=1)                     # (C, 6H)
    whh_comb = jnp.concatenate(whh_cols, axis=1).astype(jnp.bfloat16)  # (2H, 6H) bf16

    bih_f = p['gru_f']['bih'].reshape(3, H); bih_r = p['gru_r']['bih'].reshape(3, H)
    bhh_f = p['gru_f']['bhh'].reshape(3, H); bhh_r = p['gru_r']['bhh'].reshape(3, H)
    bgi_parts = []
    for g in range(3):
        add_h = 1.0 if g < 2 else 0.0              # fold bhh into r,z; keep n's bhh separate
        bgi_parts += [bih_f[g] + add_h * bhh_f[g], bih_r[g] + add_h * bhh_r[g]]
    bgi = jnp.concatenate(bgi_parts)[None, :]                        # (1, 6H)
    bhn = jnp.concatenate([bhh_f[2], bhh_r[2]])[None, :]             # (1, 2H)

    col = jnp.arange(6 * H)
    revmask = (((col // H) % 2) == 1).astype(f32)[None, :]           # (1, 6H)

    # --- attention weights (q-scale folded in) ---
    scale = float(E) ** -0.5
    qscale = jnp.concatenate([jnp.full((E,), scale, f32), jnp.ones((2 * E,), f32)])
    wqkv_t = p['wqkv'].T * qscale[None, :]                           # (E, 3E)
    bqkv = (p['bqkv'] * qscale)[None, :]                             # (1, 3E)

    # --- exact fold of the linear tail: out_proj -> fc -> conv taps ---
    W1 = p['wo'].T @ p['wfc'].T                                      # (E, O)
    b1 = p['bo'] @ p['wfc'].T + p['bfc']                             # (O,)
    W2 = jnp.concatenate([W1 @ p['wconv'][:, :, t].T for t in range(3)], axis=1)   # (E, 3O)
    b2 = jnp.concatenate([b1 @ p['wconv'][:, :, t].T for t in range(3)])[None, :]  # (1, 3O)

    # length-Linear folded with the stride-2 tap selection (col index t*L + l)
    p_idx = jnp.arange(Lp)[:, None]
    l_idx = jnp.arange(L)[None, :]
    scat = jnp.concatenate([(l_idx == (2 * p_idx + t)).astype(f32) for t in range(3)], axis=1)
    wls = p['wlin'] @ scat                                           # (Lp, 3L)
    bder = (p['blin'][:, None] +
            jnp.sum(p['wlin'], axis=1)[:, None] * p['bconv'][None, :]).T   # (O, Lp)

    return dict(gamma=p['bn_gamma'][None, :], beta=p['bn_beta'][None, :],
                wih=wih_both, bgi=bgi, revmask=revmask, whh=whh_comb, bhn=bhn,
                wqkv=wqkv_t, bqkv=bqkv, w2=W2, b2=b2, wls=wls, bder=bder)


# ------------------------------- host wrapper -------------------------------
def unet_block_in_forward(x, h_s, pk):
    B, C, L = x.shape
    H = h_s.shape[2]
    E = 2 * H
    O, Lp = pk['bder'].shape

    x_t = jnp.transpose(x, (2, 0, 1))              # (L, B, C) time-major

    y, h_new = pl.pallas_call(
        _fused_kernel,
        out_shape=(jax.ShapeDtypeStruct((B, O, Lp), jnp.float32),
                   jax.ShapeDtypeStruct((2, B, H), jnp.float32)),
        in_specs=[VMEM_SPEC] * 15,
        out_specs=(VMEM_SPEC, VMEM_SPEC),
        scratch_shapes=[pltpu.VMEM((B, L, E), jnp.float32)],
    )(x_t, h_s, pk['gamma'], pk['beta'],
      pk['wih'], pk['bgi'], pk['revmask'], pk['whh'], pk['bhn'],
      pk['wqkv'], pk['bqkv'], pk['w2'], pk['b2'], pk['wls'], pk['bder'])
    return y, h_new


# ------------------------------- parameters -------------------------------
def init_params(key, C_in, H, O, L):
    E = 2 * H
    Lp = (L - 3) // 2 + 1
    ks = jax.random.split(key, 20)
    u = lambda k, s: jax.random.uniform(k, s, jnp.float32, -0.2, 0.2)
    return {
        'bn_gamma': u(ks[0], (C_in,)) + 1.0,
        'bn_beta': u(ks[1], (C_in,)),
        'gru_f': {'wih': u(ks[2], (3 * H, C_in)), 'whh': u(ks[3], (3 * H, H)),
                  'bih': u(ks[4], (3 * H,)), 'bhh': u(ks[5], (3 * H,))},
        'gru_r': {'wih': u(ks[6], (3 * H, C_in)), 'whh': u(ks[7], (3 * H, H)),
                  'bih': u(ks[8], (3 * H,)), 'bhh': u(ks[9], (3 * H,))},
        'wqkv': u(ks[10], (3 * E, E)), 'bqkv': u(ks[11], (3 * E,)),
        'wo': u(ks[12], (E, E)), 'bo': u(ks[13], (E,)),
        'wfc': u(ks[14], (O, E)), 'bfc': u(ks[15], (O,)),
        'wconv': u(ks[16], (O, O, 3)), 'bconv': u(ks[17], (O,)),
        'wlin': u(ks[18], (Lp, Lp)), 'blin': u(ks[19], (Lp,)),
    }


# ------------------------- pure-JAX reference (same math, f32) -------------------------
def reference_forward(x, h_s, p):
    H = p['gru_f']['whh'].shape[1]
    E = 2 * H
    mean = jnp.mean(x, axis=(0, 2), keepdims=True)
    var = jnp.mean((x - mean) ** 2, axis=(0, 2), keepdims=True)
    xb = (x - mean) / jnp.sqrt(var + 1e-5)
    xb = xb * p['bn_gamma'].reshape(1, -1, 1) + p['bn_beta'].reshape(1, -1, 1)
    xs = jnp.transpose(jnp.maximum(xb, 0.0), (0, 2, 1))             # (B, L, C)

    def gru_dir(xseq, pp, h0):
        def step(h, xt):
            gi = xt @ pp['wih'].T + pp['bih']
            gh = h @ pp['whh'].T + pp['bhh']
            r = jax.nn.sigmoid(gi[:, :H] + gh[:, :H])
            z = jax.nn.sigmoid(gi[:, H:2 * H] + gh[:, H:2 * H])
            n = jnp.tanh(gi[:, 2 * H:] + r * gh[:, 2 * H:])
            hn = (1 - z) * n + z * h
            return hn, hn
        hT, outs = lax.scan(step, h0, jnp.transpose(xseq, (1, 0, 2)))
        return jnp.transpose(outs, (1, 0, 2)), hT

    of, hf = gru_dir(xs, p['gru_f'], h_s[0])
    orr, hr = gru_dir(xs[:, ::-1, :], p['gru_r'], h_s[1])
    orr = orr[:, ::-1, :]
    out = jnp.concatenate([of, orr], axis=-1)                       # (B, L, 2H)
    h_new = jnp.stack([hf, hr], axis=0)
    qkv = out @ p['wqkv'].T + p['bqkv']
    q, k, v = qkv[..., :E], qkv[..., E:2 * E], qkv[..., 2 * E:]
    s = jnp.einsum('ble,bme->blm', q * (E ** -0.5), k)
    pr = jax.nn.softmax(s, axis=-1)
    ctx = jnp.einsum('blm,bme->ble', pr, v)
    y = ctx @ p['wo'].T + p['bo']
    z = y @ p['wfc'].T + p['bfc']                                   # (B, L, O)
    zc = jnp.transpose(z, (0, 2, 1))                                # (B, O, L)
    conv = lax.conv_general_dilated(zc, p['wconv'], window_strides=(2,), padding='VALID',
                                    dimension_numbers=('NCH', 'OIH', 'NCH'))
    conv = conv + p['bconv'].reshape(1, -1, 1)
    final = conv @ p['wlin'].T + p['blin']
    return final, h_new


if __name__ == "__main__":
    B, C_in, L, H, O = 2, 4, 16, 32, 4   # length=16, input_dim=4, hidden_dim=32, output_dim=4
    key = jax.random.PRNGKey(0)
    kx, kh, kp = jax.random.split(key, 3)
    x = jax.random.normal(kx, (B, C_in, L), jnp.float32)
    h_s = jax.random.normal(kh, (2, B, H), jnp.float32)             # (2*num_layers, B, H)
    params = init_params(kp, C_in, H, O, L)

    packed = pack_params(params, L)                 # derived weights prepared once (hoisted)
    fwd = jax.jit(unet_block_in_forward)
    y, h_new = fwd(x, h_s, packed)
    y = jax.block_until_ready(y)
    h_new = jax.block_until_ready(h_new)

    y_ref, h_ref = reference_forward(x, h_s, params)
    d1 = float(jnp.max(jnp.abs(y - y_ref)))
    d2 = float(jnp.max(jnp.abs(h_new - h_ref)))
    # bf16 MXU operands on the serial GRU recurrence (per perf review) => tolerance looser
    # than the pure-f32 version (reference stays f32).
    assert d1 < 5e-2 and d2 < 5e-2, (d1, d2)
    print("KERNEL_OK")
</pallas_src>

<mosaic_0001>
module attributes {stable_mosaic.version = 11 : i64} {
  func.func @_fused_kernel(%arg0: memref<16x2x4xf32, #tpu.memory_space<vmem>>, %arg1: memref<2x2x32xf32, #tpu.memory_space<vmem>>, %arg2: memref<1x4xf32, #tpu.memory_space<vmem>>, %arg3: memref<1x4xf32, #tpu.memory_space<vmem>>, %arg4: memref<4x192xf32, #tpu.memory_space<vmem>>, %arg5: memref<1x192xf32, #tpu.memory_space<vmem>>, %arg6: memref<1x192xf32, #tpu.memory_space<vmem>>, %arg7: memref<64x192xbf16, #tpu.memory_space<vmem>>, %arg8: memref<1x64xf32, #tpu.memory_space<vmem>>, %arg9: memref<64x192xf32, #tpu.memory_space<vmem>>, %arg10: memref<1x192xf32, #tpu.memory_space<vmem>>, %arg11: memref<64x12xf32, #tpu.memory_space<vmem>>, %arg12: memref<1x12xf32, #tpu.memory_space<vmem>>, %arg13: memref<7x48xf32, #tpu.memory_space<vmem>>, %arg14: memref<4x7xf32, #tpu.memory_space<vmem>>, %arg15: memref<2x4x7xf32, #tpu.memory_space<vmem>>, %arg16: memref<2x2x32xf32, #tpu.memory_space<vmem>>, %arg17: memref<2x16x64xf32, #tpu.memory_space<vmem>>) attributes {dimension_semantics = [], scalar_prefetch = 0 : i64, scratch_operands = 1 : i64, tpu.core_type = #tpu.core_type<tc>} {
    %c0 = arith.constant 0 : index
    %c0_0 = arith.constant 0 : index
    %c0_1 = arith.constant 0 : index
    %0 = vector.load %arg0[%c0, %c0_0, %c0_1] : memref<16x2x4xf32, #tpu.memory_space<vmem>>, vector<16x2x4xf32>
    %cst = arith.constant dense<0.000000e+00> : vector<4xf32>
    %1 = vector.multi_reduction <add>, %0, %cst [0, 1] : vector<16x2x4xf32> to vector<4xf32>
    %2 = vector.shape_cast %1 : vector<4xf32> to vector<1x1x4xf32>
    %cst_2 = arith.constant 3.125000e-02 : f32
    %3 = vector.broadcast %cst_2 : f32 to vector<1x1x4xf32>
    %4 = arith.mulf %2, %3 : vector<1x1x4xf32>
    %5 = vector.broadcast %4 : vector<1x1x4xf32> to vector<16x2x4xf32>
    %6 = arith.subf %0, %5 : vector<16x2x4xf32>
    %7 = arith.mulf %6, %6 : vector<16x2x4xf32>
    %cst_3 = arith.constant dense<0.000000e+00> : vector<4xf32>
    %8 = vector.multi_reduction <add>, %7, %cst_3 [0, 1] : vector<16x2x4xf32> to vector<4xf32>
    %9 = vector.shape_cast %8 : vector<4xf32> to vector<1x1x4xf32>
    %cst_4 = arith.constant 3.125000e-02 : f32
    %10 = vector.broadcast %cst_4 : f32 to vector<1x1x4xf32>
    %11 = arith.mulf %9, %10 : vector<1x1x4xf32>
    %c0_5 = arith.constant 0 : index
    %c0_6 = arith.constant 0 : index
    %12 = vector.load %arg2[%c0_5, %c0_6] : memref<1x4xf32, #tpu.memory_space<vmem>>, vector<1x4xf32>
    %13 = vector.shape_cast %12 : vector<1x4xf32> to vector<1x1x4xf32>
    %cst_7 = arith.constant 9.99999974E-6 : f32
    %14 = vector.broadcast %cst_7 : f32 to vector<1x1x4xf32>
    %15 = arith.addf %11, %14 : vector<1x1x4xf32>
    %16 = math.rsqrt %15 : vector<1x1x4xf32>
    %17 = arith.mulf %13, %16 : vector<1x1x4xf32>
    %18 = vector.broadcast %17 : vector<1x1x4xf32> to vector<16x2x4xf32>
    %19 = arith.mulf %6, %18 : vector<16x2x4xf32>
    %c0_8 = arith.constant 0 : index
    %c0_9 = arith.constant 0 : index
    %20 = vector.load %arg3[%c0_8, %c0_9] : memref<1x4xf32, #tpu.memory_space<vmem>>, vector<1x4xf32>
    %21 = vector.shape_cast %20 : vector<1x4xf32> to vector<1x1x4xf32>
    %22 = vector.broadcast %21 : vector<1x1x4xf32> to vector<16x2x4xf32>
    %23 = arith.addf %19, %22 : vector<16x2x4xf32>
    %cst_10 = arith.constant 0.000000e+00 : f32
    %24 = vector.broadcast %cst_10 : f32 to vector<16x2x4xf32>
    %25 = arith.maximumf %23, %24 : vector<16x2x4xf32>
    %c0_11 = arith.constant 0 : index
    %c0_12 = arith.constant 0 : index
    %26 = vector.load %arg4[%c0_11, %c0_12] : memref<4x192xf32, #tpu.memory_space<vmem>>, vector<4x192xf32>
    "tpu.trace_start"() <{level = 10 : i32, message = "lbc,cg->lbg"}> : () -> ()
    %cst_13 = arith.constant dense<0.000000e+00> : vector<16x2x192xf32>
    %27 = tpu.matmul %25, %26, %cst_13 {dimension_numbers = #tpu.dot_dimension_numbers<[2], [0], [0, 1], [1], [0, 0, 0, 1, 1, 1], [], []>} : vector<16x2x4xf32>, vector<4x192xf32>, vector<16x2x192xf32> -> vector<16x2x192xf32>
    "tpu.trace_stop"() : () -> ()
    %c0_14 = arith.constant 0 : index
    %c0_15 = arith.constant 0 : index
    %28 = vector.load %arg5[%c0_14, %c0_15] : memref<1x192xf32, #tpu.memory_space<vmem>>, vector<1x192xf32>
    %29 = vector.shape_cast %28 : vector<1x192xf32> to vector<1x1x192xf32>
    %30 = vector.broadcast %29 : vector<1x1x192xf32> to vector<16x2x192xf32>
    %31 = arith.addf %27, %30 : vector<16x2x192xf32>
    %c0_16 = arith.constant 0 : index
    %c0_17 = arith.constant 0 : index
    %32 = vector.load %arg6[%c0_16, %c0_17] : memref<1x192xf32, #tpu.memory_space<vmem>>, vector<1x192xf32>
    %cst_18 = arith.constant 1.000000e+00 : f32
    %33 = vector.broadcast %cst_18 : f32 to vector<1x192xf32>
    %34 = arith.subf %33, %32 : vector<1x192xf32>
    %c0_19 = arith.constant 0 : index
    %c0_20 = arith.constant 0 : index
    %35 = vector.load %arg7[%c0_19, %c0_20] : memref<64x192xbf16, #tpu.memory_space<vmem>>, vector<64x192xbf16>
    %c0_21 = arith.constant 0 : index
    %c0_22 = arith.constant 0 : index
    %36 = vector.load %arg8[%c0_21, %c0_22] : memref<1x64xf32, #tpu.memory_space<vmem>>, vector<1x64xf32>
    %c0_23 = arith.constant 0 : index
    %c0_24 = arith.constant 0 : index
    %c0_25 = arith.constant 0 : index
    %37 = vector.load %arg1[%c0_23, %c0_24, %c0_25] : memref<2x2x32xf32, #tpu.memory_space<vmem>>, vector<1x2x32xf32>
    %38 = vector.shape_cast %37 : vector<1x2x32xf32> to vector<2x32xf32>
    %c1 = arith.constant 1 : index
    %c0_26 = arith.constant 0 : index
    %c0_27 = arith.constant 0 : index
    %39 = vector.load %arg1[%c1, %c0_26, %c0_27] : memref<2x2x32xf32, #tpu.memory_space<vmem>>, vector<1x2x32xf32>
    %40 = vector.shape_cast %39 : vector<1x2x32xf32> to vector<2x32xf32>
    %41 = tpu.concatenate %38, %40 in 1 : vector<2x32xf32>, vector<2x32xf32> -> vector<2x64xf32>
    %42 = vector.extract_strided_slice %31 {offsets = [0, 0, 0], sizes = [1, 2, 192], strides = [1, 1, 1]} : vector<16x2x192xf32> to vector<1x2x192xf32>
    %43 = vector.shape_cast %42 : vector<1x2x192xf32> to vector<2x192xf32>
    %44 = vector.broadcast %34 : vector<1x192xf32> to vector<2x192xf32>
    %45 = arith.mulf %43, %44 : vector<2x192xf32>
    %46 = vector.extract_strided_slice %31 {offsets = [15, 0, 0], sizes = [1, 2, 192], strides = [1, 1, 1]} : vector<16x2x192xf32> to vector<1x2x192xf32>
    %47 = vector.shape_cast %46 : vector<1x2x192xf32> to vector<2x192xf32>
    %48 = vector.broadcast %32 : vector<1x192xf32> to vector<2x192xf32>
    %49 = arith.mulf %47, %48 : vector<2x192xf32>
    %50 = arith.addf %45, %49 : vector<2x192xf32>
    %51 = arith.truncf %41 : vector<2x64xf32> to vector<2x64xbf16>
    %cst_28 = arith.constant dense<0.000000e+00> : vector<2x192xf32>
    %52 = tpu.matmul %51, %35, %cst_28 {dimension_numbers = #tpu.dot_dimension_numbers<[1], [0], [0], [1], [0, 0, 1, 1], [], []>} : vector<2x64xbf16>, vector<64x192xbf16>, vector<2x192xf32> -> vector<2x192xf32>
    %53 = vector.extract_strided_slice %50 {offsets = [0, 0], sizes = [2, 128], strides = [1, 1]} : vector<2x192xf32> to vector<2x128xf32>
    %54 = vector.extract_strided_slice %52 {offsets = [0, 0], sizes = [2, 128], strides = [1, 1]} : vector<2x192xf32> to vector<2x128xf32>
    %55 = arith.addf %53, %54 : vector<2x128xf32>
    %56 = arith.negf %55 : vector<2x128xf32>
    %57 = math.exp %56 : vector<2x128xf32>
    %cst_29 = arith.constant 1.000000e+00 : f32
    %58 = vector.broadcast %cst_29 : f32 to vector<2x128xf32>
    %59 = arith.addf %58, %57 : vector<2x128xf32>
    %60 = arith.divf %58, %59 : vector<2x128xf32>
    %61 = vector.extract_strided_slice %60 {offsets = [0, 0], sizes = [2, 64], strides = [1, 1]} : vector<2x128xf32> to vector<2x64xf32>
    %62 = vector.extract_strided_slice %60 {offsets = [0, 64], sizes = [2, 64], strides = [1, 1]} : vector<2x128xf32> to vector<2x64xf32>
    %63 = vector.extract_strided_slice %50 {offsets = [0, 128], sizes = [2, 64], strides = [1, 1]} : vector<2x192xf32> to vector<2x64xf32>
    %64 = vector.extract_strided_slice %52 {offsets = [0, 128], sizes = [2, 64], strides = [1, 1]} : vector<2x192xf32> to vector<2x64xf32>
    %65 = vector.broadcast %36 : vector<1x64xf32> to vector<2x64xf32>
    %66 = arith.addf %64, %65 : vector<2x64xf32>
    %67 = arith.mulf %61, %66 : vector<2x64xf32>
    %68 = arith.addf %63, %67 : vector<2x64xf32>
    %69 = math.tanh %68 : vector<2x64xf32>
    %cst_30 = arith.constant 1.000000e+00 : f32
    %70 = vector.broadcast %cst_30 : f32 to vector<2x64xf32>
    %71 = arith.subf %70, %62 : vector<2x64xf32>
    %72 = arith.mulf %71, %69 : vector<2x64xf32>
    %73 = arith.mulf %62, %41 : vector<2x64xf32>
    %74 = arith.addf %72, %73 : vector<2x64xf32>
    %75 = vector.extract_strided_slice %74 {offsets = [0, 0], sizes = [2, 32], strides = [1, 1]} : vector<2x64xf32> to vector<2x32xf32>
    %c0_31 = arith.constant 0 : index
    %c0_32 = arith.constant 0 : index
    %c0_33 = arith.constant 0 : index
    %76 = vector.load %arg17[%c0_31, %c0_32, %c0_33] : memref<2x16x64xf32, #tpu.memory_space<vmem>>, vector<2x1x32xf32>
    %77 = vector.shape_cast %76 : vector<2x1x32xf32> to vector<2x32xf32>
    %78 = vector.shape_cast %75 : vector<2x32xf32> to vector<2x1x32xf32>
    tpu.vector_store %arg17[%c0_31, %c0_32, %c0_33], %78 {strides = array<i32>} : memref<2x16x64xf32, #tpu.memory_space<vmem>>, vector<2x1x32xf32>,
    %79 = vector.extract_strided_slice %74 {offsets = [0, 32], sizes = [2, 32], strides = [1, 1]} : vector<2x64xf32> to vector<2x32xf32>
    %c0_34 = arith.constant 0 : index
    %c15 = arith.constant 15 : index
    %c32 = arith.constant 32 : index
    %80 = vector.load %arg17[%c0_34, %c15, %c32] : memref<2x16x64xf32, #tpu.memory_space<vmem>>, vector<2x1x32xf32>
    %81 = vector.shape_cast %80 : vector<2x1x32xf32> to vector<2x32xf32>
    %82 = vector.shape_cast %79 : vector<2x32xf32> to vector<2x1x32xf32>
    tpu.vector_store %arg17[%c0_34, %c15, %c32], %82 {strides = array<i32>} : memref<2x16x64xf32, #tpu.memory_space<vmem>>, vector<2x1x32xf32>,
    %83 = vector.extract_strided_slice %31 {offsets = [1, 0, 0], sizes = [1, 2, 192], strides = [1, 1, 1]} : vector<16x2x192xf32> to vector<1x2x192xf32>
    %84 = vector.shape_cast %83 : vector<1x2x192xf32> to vector<2x192xf32>
    %85 = vector.broadcast %34 : vector<1x192xf32> to vector<2x192xf32>
    %86 = arith.mulf %84, %85 : vector<2x192xf32>
    %87 = vector.extract_strided_slice %31 {offsets = [14, 0, 0], sizes = [1, 2, 192], strides = [1, 1, 1]} : vector<16x2x192xf32> to vector<1x2x192xf32>
    %88 = vector.shape_cast %87 : vector<1x2x192xf32> to vector<2x192xf32>
    %89 = vector.broadcast %32 : vector<1x192xf32> to vector<2x192xf32>
    %90 = arith.mulf %88, %89 : vector<2x192xf32>
    %91 = arith.addf %86, %90 : vector<2x192xf32>
    %92 = arith.truncf %74 : vector<2x64xf32> to vector<2x64xbf16>
    %cst_35 = arith.constant dense<0.000000e+00> : vector<2x192xf32>
    %93 = tpu.matmul %92, %35, %cst_35 {dimension_numbers = #tpu.dot_dimension_numbers<[1], [0], [0], [1], [0, 0, 1, 1], [], []>} : vector<2x64xbf16>, vector<64x192xbf16>, vector<2x192xf32> -> vector<2x192xf32>
    %94 = vector.extract_strided_slice %91 {offsets = [0, 0], sizes = [2, 128], strides = [1, 1]} : vector<2x192xf32> to vector<2x128xf32>
    %95 = vector.extract_strided_slice %93 {offsets = [0, 0], sizes = [2, 128], strides = [1, 1]} : vector<2x192xf32> to vector<2x128xf32>
    %96 = arith.addf %94, %95 : vector<2x128xf32>
    %97 = arith.negf %96 : vector<2x128xf32>
    %98 = math.exp %97 : vector<2x128xf32>
    %cst_36 = arith.constant 1.000000e+00 : f32
    %99 = vector.broadcast %cst_36 : f32 to vector<2x128xf32>
    %100 = arith.addf %99, %98 : vector<2x128xf32>
    %101 = arith.divf %99, %100 : vector<2x128xf32>
    %102 = vector.extract_strided_slice %101 {offsets = [0, 0], sizes = [2, 64], strides = [1, 1]} : vector<2x128xf32> to vector<2x64xf32>
    %103 = vector.extract_strided_slice %101 {offsets = [0, 64], sizes = [2, 64], strides = [1, 1]} : vector<2x128xf32> to vector<2x64xf32>
    %104 = vector.extract_strided_slice %91 {offsets = [0, 128], sizes = [2, 64], strides = [1, 1]} : vector<2x192xf32> to vector<2x64xf32>
    %105 = vector.extract_strided_slice %93 {offsets = [0, 128], sizes = [2, 64], strides = [1, 1]} : vector<2x192xf32> to vector<2x64xf32>
    %106 = vector.broadcast %36 : vector<1x64xf32> to vector<2x64xf32>
    %107 = arith.addf %105, %106 : vector<2x64xf32>
    %108 = arith.mulf %102, %107 : vector<2x64xf32>
    %109 = arith.addf %104, %108 : vector<2x64xf32>
    %110 = math.tanh %109 : vector<2x64xf32>
    %cst_37 = arith.constant 1.000000e+00 : f32
    %111 = vector.broadcast %cst_37 : f32 to vector<2x64xf32>
    %112 = arith.subf %111, %103 : vector<2x64xf32>
    %113 = arith.mulf %112, %110 : vector<2x64xf32>
    %114 = arith.mulf %103, %74 : vector<2x64xf32>
    %115 = arith.addf %113, %114 : vector<2x64xf32>
    %116 = vector.extract_strided_slice %115 {offsets = [0, 0], sizes = [2, 32], strides = [1, 1]} : vector<2x64xf32> to vector<2x32xf32>
    %c0_38 = arith.constant 0 : index
    %c1_39 = arith.constant 1 : index
    %c0_40 = arith.constant 0 : index
    %117 = vector.load %arg17[%c0_38, %c1_39, %c0_40] : memref<2x16x64xf32, #tpu.memory_space<vmem>>, vector<2x1x32xf32>
    %118 = vector.shape_cast %117 : vector<2x1x32xf32> to vector<2x32xf32>
    %119 = vector.shape_cast %116 : vector<2x32xf32> to vector<2x1x32xf32>
    tpu.vector_store %arg17[%c0_38, %c1_39, %c0_40], %119 {strides = array<i32>} : memref<2x16x64xf32, #tpu.memory_space<vmem>>, vector<2x1x32xf32>,
    %120 = vector.extract_strided_slice %115 {offsets = [0, 32], sizes = [2, 32], strides = [1, 1]} : vector<2x64xf32> to vector<2x32xf32>
    %c0_41 = arith.constant 0 : index
    %c14 = arith.constant 14 : index
    %c32_42 = arith.constant 32 : index
    %121 = vector.load %arg17[%c0_41, %c14, %c32_42] : memref<2x16x64xf32, #tpu.memory_space<vmem>>, vector<2x1x32xf32>
    %122 = vector.shape_cast %121 : vector<2x1x32xf32> to vector<2x32xf32>
    %123 = vector.shape_cast %120 : vector<2x32xf32> to vector<2x1x32xf32>
    tpu.vector_store %arg17[%c0_41, %c14, %c32_42], %123 {strides = array<i32>} : memref<2x16x64xf32, #tpu.memory_space<vmem>>, vector<2x1x32xf32>,
    %124 = vector.extract_strided_slice %31 {offsets = [2, 0, 0], sizes = [1, 2, 192], strides = [1, 1, 1]} : vector<16x2x192xf32> to vector<1x2x192xf32>
    %125 = vector.shape_cast %124 : vector<1x2x192xf32> to vector<2x192xf32>
    %126 = vector.broadcast %34 : vector<1x192xf32> to vector<2x192xf32>
    %127 = arith.mulf %125, %126 : vector<2x192xf32>
    %128 = vector.extract_strided_slice %31 {offsets = [13, 0, 0], sizes = [1, 2, 192], strides = [1, 1, 1]} : vector<16x2x192xf32> to vector<1x2x192xf32>
    %129 = vector.shape_cast %128 : vector<1x2x192xf32> to vector<2x192xf32>
    %130 = vector.broadcast %32 : vector<1x192xf32> to vector<2x192xf32>
    %131 = arith.mulf %129, %130 : vector<2x192xf32>
    %132 = arith.addf %127, %131 : vector<2x192xf32>
    %133 = arith.truncf %115 : vector<2x64xf32> to vector<2x64xbf16>
    %cst_43 = arith.constant dense<0.000000e+00> : vector<2x192xf32>
    %134 = tpu.matmul %133, %35, %cst_43 {dimension_numbers = #tpu.dot_dimension_numbers<[1], [0], [0], [1], [0, 0, 1, 1], [], []>} : vector<2x64xbf16>, vector<64x192xbf16>, vector<2x192xf32> -> vector<2x192xf32>
    %135 = vector.extract_strided_slice %132 {offsets = [0, 0], sizes = [2, 128], strides = [1, 1]} : vector<2x192xf32> to vector<2x128xf32>
    %136 = vector.extract_strided_slice %134 {offsets = [0, 0], sizes = [2, 128], strides = [1, 1]} : vector<2x192xf32> to vector<2x128xf32>
    %137 = arith.addf %135, %136 : vector<2x128xf32>
    %138 = arith.negf %137 : vector<2x128xf32>
    %139 = math.exp %138 : vector<2x128xf32>
    %cst_44 = arith.constant 1.000000e+00 : f32
    %140 = vector.broadcast %cst_44 : f32 to vector<2x128xf32>
    %141 = arith.addf %140, %139 : vector<2x128xf32>
    %142 = arith.divf %140, %141 : vector<2x128xf32>
    %143 = vector.extract_strided_slice %142 {offsets = [0, 0], sizes = [2, 64], strides = [1, 1]} : vector<2x128xf32> to vector<2x64xf32>
    %144 = vector.extract_strided_slice %142 {offsets = [0, 64], sizes = [2, 64], strides = [1, 1]} : vector<2x128xf32> to vector<2x64xf32>
    %145 = vector.extract_strided_slice %132 {offsets = [0, 128], sizes = [2, 64], strides = [1, 1]} : vector<2x192xf32> to vector<2x64xf32>
    %146 = vector.extract_strided_slice %134 {offsets = [0, 128], sizes = [2, 64], strides = [1, 1]} : vector<2x192xf32> to vector<2x64xf32>
    %147 = vector.broadcast %36 : vector<1x64xf32> to vector<2x64xf32>
    %148 = arith.addf %146, %147 : vector<2x64xf32>
    %149 = arith.mulf %143, %148 : vector<2x64xf32>
    %150 = arith.addf %145, %149 : vector<2x64xf32>
    %151 = math.tanh %150 : vector<2x64xf32>
    %cst_45 = arith.constant 1.000000e+00 : f32
    %152 = vector.broadcast %cst_45 : f32 to vector<2x64xf32>
    %153 = arith.subf %152, %144 : vector<2x64xf32>
    %154 = arith.mulf %153, %151 : vector<2x64xf32>
    %155 = arith.mulf %144, %115 : vector<2x64xf32>
    %156 = arith.addf %154, %155 : vector<2x64xf32>
    %157 = vector.extract_strided_slice %156 {offsets = [0, 0], sizes = [2, 32], strides = [1, 1]} : vector<2x64xf32> to vector<2x32xf32>
    %c0_46 = arith.constant 0 : index
    %c2 = arith.constant 2 : index
    %c0_47 = arith.constant 0 : index
    %158 = vector.load %arg17[%c0_46, %c2, %c0_47] : memref<2x16x64xf32, #tpu.memory_space<vmem>>, vector<2x1x32xf32>
    %159 = vector.shape_cast %158 : vector<2x1x32xf32> to vector<2x32xf32>
    %160 = vector.shape_cast %157 : vector<2x32xf32> to vector<2x1x32xf32>
    tpu.vector_store %arg17[%c0_46, %c2, %c0_47], %160 {strides = array<i32>} : memref<2x16x64xf32, #tpu.memory_space<vmem>>, vector<2x1x32xf32>,
    %161 = vector.extract_strided_slice %156 {offsets = [0, 32], sizes = [2, 32], strides = [1, 1]} : vector<2x64xf32> to vector<2x32xf32>
    %c0_48 = arith.constant 0 : index
    %c13 = arith.constant 13 : index
    %c32_49 = arith.constant 32 : index
    %162 = vector.load %arg17[%c0_48, %c13, %c32_49] : memref<2x16x64xf32, #tpu.memory_space<vmem>>, vector<2x1x32xf32>
    %163 = vector.shape_cast %162 : vector<2x1x32xf32> to vector<2x32xf32>
    %164 = vector.shape_cast %161 : vector<2x32xf32> to vector<2x1x32xf32>
    tpu.vector_store %arg17[%c0_48, %c13, %c32_49], %164 {strides = array<i32>} : memref<2x16x64xf32, #tpu.memory_space<vmem>>, vector<2x1x32xf32>,
    %165 = vector.extract_strided_slice %31 {offsets = [3, 0, 0], sizes = [1, 2, 192], strides = [1, 1, 1]} : vector<16x2x192xf32> to vector<1x2x192xf32>
    %166 = vector.shape_cast %165 : vector<1x2x192xf32> to vector<2x192xf32>
    %167 = vector.broadcast %34 : vector<1x192xf32> to vector<2x192xf32>
    %168 = arith.mulf %166, %167 : vector<2x192xf32>
    %169 = vector.extract_strided_slice %31 {offsets = [12, 0, 0], sizes = [1, 2, 192], strides = [1, 1, 1]} : vector<16x2x192xf32> to vector<1x2x192xf32>
    %170 = vector.shape_cast %169 : vector<1x2x192xf32> to vector<2x192xf32>
    %171 = vector.broadcast %32 : vector<1x192xf32> to vector<2x192xf32>
    %172 = arith.mulf %170, %171 : vector<2x192xf32>
    %173 = arith.addf %168, %172 : vector<2x192xf32>
    %174 = arith.truncf %156 : vector<2x64xf32> to vector<2x64xbf16>
    %cst_50 = arith.constant dense<0.000000e+00> : vector<2x192xf32>
    %175 = tpu.matmul %174, %35, %cst_50 {dimension_numbers = #tpu.dot_dimension_numbers<[1], [0], [0], [1], [0, 0, 1, 1], [], []>} : vector<2x64xbf16>, vector<64x192xbf16>, vector<2x192xf32> -> vector<2x192xf32>
    %176 = vector.extract_strided_slice %173 {offsets = [0, 0], sizes = [2, 128], strides = [1, 1]} : vector<2x192xf32> to vector<2x128xf32>
    %177 = vector.extract_strided_slice %175 {offsets = [0, 0], sizes = [2, 128], strides = [1, 1]} : vector<2x192xf32> to vector<2x128xf32>
    %178 = arith.addf %176, %177 : vector<2x128xf32>
    %179 = arith.negf %178 : vector<2x128xf32>
    %180 = math.exp %179 : vector<2x128xf32>
    %cst_51 = arith.constant 1.000000e+00 : f32
    %181 = vector.broadcast %cst_51 : f32 to vector<2x128xf32>
    %182 = arith.addf %181, %180 : vector<2x128xf32>
    %183 = arith.divf %181, %182 : vector<2x128xf32>
    %184 = vector.extract_strided_slice %183 {offsets = [0, 0], sizes = [2, 64], strides = [1, 1]} : vector<2x128xf32> to vector<2x64xf32>
    %185 = vector.extract_strided_slice %183 {offsets = [0, 64], sizes = [2, 64], strides = [1, 1]} : vector<2x128xf32> to vector<2x64xf32>
    %186 = vector.extract_strided_slice %173 {offsets = [0, 128], sizes = [2, 64], strides = [1, 1]} : vector<2x192xf32> to vector<2x64xf32>
    %187 = vector.extract_strided_slice %175 {offsets = [0, 128], sizes = [2, 64], strides = [1, 1]} : vector<2x192xf32> to vector<2x64xf32>
    %188 = vector.broadcast %36 : vector<1x64xf32> to vector<2x64xf32>
    %189 = arith.addf %187, %188 : vector<2x64xf32>
    %190 = arith.mulf %184, %189 : vector<2x64xf32>
    %191 = arith.addf %186, %190 : vector<2x64xf32>
    %192 = math.tanh %191 : vector<2x64xf32>
    %cst_52 = arith.constant 1.000000e+00 : f32
    %193 = vector.broadcast %cst_52 : f32 to vector<2x64xf32>
    %194 = arith.subf %193, %185 : vector<2x64xf32>
    %195 = arith.mulf %194, %192 : vector<2x64xf32>
    %196 = arith.mulf %185, %156 : vector<2x64xf32>
    %197 = arith.addf %195, %196 : vector<2x64xf32>
    %198 = vector.extract_strided_slice %197 {offsets = [0, 0], sizes = [2, 32], strides = [1, 1]} : vector<2x64xf32> to vector<2x32xf32>
    %c0_53 = arith.constant 0 : index
    %c3 = arith.constant 3 : index
    %c0_54 = arith.constant 0 : index
    %199 = vector.load %arg17[%c0_53, %c3, %c0_54] : memref<2x16x64xf32, #tpu.memory_space<vmem>>, vector<2x1x32xf32>
    %200 = vector.shape_cast %199 : vector<2x1x32xf32> to vector<2x32xf32>
    %201 = vector.shape_cast %198 : vector<2x32xf32> to vector<2x1x32xf32>
    tpu.vector_store %arg17[%c0_53, %c3, %c0_54], %201 {strides = array<i32>} : memref<2x16x64xf32, #tpu.memory_space<vmem>>, vector<2x1x32xf32>,
    %202 = vector.extract_strided_slice %197 {offsets = [0, 32], sizes = [2, 32], strides = [1, 1]} : vector<2x64xf32> to vector<2x32xf32>
    %c0_55 = arith.constant 0 : index
    %c12 = arith.constant 12 : index
    %c32_56 = arith.constant 32 : index
    %203 = vector.load %arg17[%c0_55, %c12, %c32_56] : memref<2x16x64xf32, #tpu.memory_space<vmem>>, vector<2x1x32xf32>
    %204 = vector.shape_cast %203 : vector<2x1x32xf32> to vector<2x32xf32>
    %205 = vector.shape_cast %202 : vector<2x32xf32> to vector<2x1x32xf32>
    tpu.vector_store %arg17[%c0_55, %c12, %c32_56], %205 {strides = array<i32>} : memref<2x16x64xf32, #tpu.memory_space<vmem>>, vector<2x1x32xf32>,
    %206 = vector.extract_strided_slice %31 {offsets = [4, 0, 0], sizes = [1, 2, 192], strides = [1, 1, 1]} : vector<16x2x192xf32> to vector<1x2x192xf32>
    %207 = vector.shape_cast %206 : vector<1x2x192xf32> to vector<2x192xf32>
    %208 = vector.broadcast %34 : vector<1x192xf32> to vector<2x192xf32>
    %209 = arith.mulf %207, %208 : vector<2x192xf32>
    %210 = vector.extract_strided_slice %31 {offsets = [11, 0, 0], sizes = [1, 2, 192], strides = [1, 1, 1]} : vector<16x2x192xf32> to vector<1x2x192xf32>
    %211 = vector.shape_cast %210 : vector<1x2x192xf32> to vector<2x192xf32>
    %212 = vector.broadcast %32 : vector<1x192xf32> to vector<2x192xf32>
    %213 = arith.mulf %211, %212 : vector<2x192xf32>
    %214 = arith.addf %209, %213 : vector<2x192xf32>
    %215 = arith.truncf %197 : vector<2x64xf32> to vector<2x64xbf16>
    %cst_57 = arith.constant dense<0.000000e+00> : vector<2x192xf32>
    %216 = tpu.matmul %215, %35, %cst_57 {dimension_numbers = #tpu.dot_dimension_numbers<[1], [0], [0], [1], [0, 0, 1, 1], [], []>} : vector<2x64xbf16>, vector<64x192xbf16>, vector<2x192xf32> -> vector<2x192xf32>
    %217 = vector.extract_strided_slice %214 {offsets = [0, 0], sizes = [2, 128], strides = [1, 1]} : vector<2x192xf32> to vector<2x128xf32>
    %218 = vector.extract_strided_slice %216 {offsets = [0, 0], sizes = [2, 128], strides = [1, 1]} : vector<2x192xf32> to vector<2x128xf32>
    %219 = arith.addf %217, %218 : vector<2x128xf32>
    %220 = arith.negf %219 : vector<2x128xf32>
    %221 = math.exp %220 : vector<2x128xf32>
    %cst_58 = arith.constant 1.000000e+00 : f32
    %222 = vector.broadcast %cst_58 : f32 to vector<2x128xf32>
    %223 = arith.addf %222, %221 : vector<2x128xf32>
    %224 = arith.divf %222, %223 : vector<2x128xf32>
    %225 = vector.extract_strided_slice %224 {offsets = [0, 0], sizes = [2, 64], strides = [1, 1]} : vector<2x128xf32> to vector<2x64xf32>
    %226 = vector.extract_strided_slice %224 {offsets = [0, 64], sizes = [2, 64], strides = [1, 1]} : vector<2x128xf32> to vector<2x64xf32>
    %227 = vector.extract_strided_slice %214 {offsets = [0, 128], sizes = [2, 64], strides = [1, 1]} : vector<2x192xf32> to vector<2x64xf32>
    %228 = vector.extract_strided_slice %216 {offsets = [0, 128], sizes = [2, 64], strides = [1, 1]} : vector<2x192xf32> to vector<2x64xf32>
    %229 = vector.broadcast %36 : vector<1x64xf32> to vector<2x64xf32>
    %230 = arith.addf %228, %229 : vector<2x64xf32>
    %231 = arith.mulf %225, %230 : vector<2x64xf32>
    %232 = arith.addf %227, %231 : vector<2x64xf32>
    %233 = math.tanh %232 : vector<2x64xf32>
    %cst_59 = arith.constant 1.000000e+00 : f32
    %234 = vector.broadcast %cst_59 : f32 to vector<2x64xf32>
    %235 = arith.subf %234, %226 : vector<2x64xf32>
    %236 = arith.mulf %235, %233 : vector<2x64xf32>
    %237 = arith.mulf %226, %197 : vector<2x64xf32>
    %238 = arith.addf %236, %237 : vector<2x64xf32>
    %239 = vector.extract_strided_slice %238 {offsets = [0, 0], sizes = [2, 32], strides = [1, 1]} : vector<2x64xf32> to vector<2x32xf32>
    %c0_60 = arith.constant 0 : index
    %c4 = arith.constant 4 : index
    %c0_61 = arith.constant 0 : index
    %240 = vector.load %arg17[%c0_60, %c4, %c0_61] : memref<2x16x64xf32, #tpu.memory_space<vmem>>, vector<2x1x32xf32>
    %241 = vector.shape_cast %240 : vector<2x1x32xf32> to vector<2x32xf32>
    %242 = vector.shape_cast %239 : vector<2x32xf32> to vector<2x1x32xf32>
    tpu.vector_store %arg17[%c0_60, %c4, %c0_61], %242 {strides = array<i32>} : memref<2x16x64xf32, #tpu.memory_space<vmem>>, vector<2x1x32xf32>,
    %243 = vector.extract_strided_slice %238 {offsets = [0, 32], sizes = [2, 32], strides = [1, 1]} : vector<2x64xf32> to vector<2x32xf32>
    %c0_62 = arith.constant 0 : index
    %c11 = arith.constant 11 : index
    %c32_63 = arith.constant 32 : index
    %244 = vector.load %arg17[%c0_62, %c11, %c32_63] : memref<2x16x64xf32, #tpu.memory_space<vmem>>, vector<2x1x32xf32>
    %245 = vector.shape_cast %244 : vector<2x1x32xf32> to vector<2x32xf32>
    %246 = vector.shape_cast %243 : vector<2x32xf32> to vector<2x1x32xf32>
    tpu.vector_store %arg17[%c0_62, %c11, %c32_63], %246 {strides = array<i32>} : memref<2x16x64xf32, #tpu.memory_space<vmem>>, vector<2x1x32xf32>,
    %247 = vector.extract_strided_slice %31 {offsets = [5, 0, 0], sizes = [1, 2, 192], strides = [1, 1, 1]} : vector<16x2x192xf32> to vector<1x2x192xf32>
    %248 = vector.shape_cast %247 : vector<1x2x192xf32> to vector<2x192xf32>
    %249 = vector.broadcast %34 : vector<1x192xf32> to vector<2x192xf32>
    %250 = arith.mulf %248, %249 : vector<2x192xf32>
    %251 = vector.extract_strided_slice %31 {offsets = [10, 0, 0], sizes = [1, 2, 192], strides = [1, 1, 1]} : vector<16x2x192xf32> to vector<1x2x192xf32>
    %252 = vector.shape_cast %251 : vector<1x2x192xf32> to vector<2x192xf32>
    %253 = vector.broadcast %32 : vector<1x192xf32> to vector<2x192xf32>
    %254 = arith.mulf %252, %253 : vector<2x192xf32>
    %255 = arith.addf %250, %254 : vector<2x192xf32>
    %256 = arith.truncf %238 : vector<2x64xf32> to vector<2x64xbf16>
    %cst_64 = arith.constant dense<0.000000e+00> : vector<2x192xf32>
    %257 = tpu.matmul %256, %35, %cst_64 {dimension_numbers = #tpu.dot_dimension_numbers<[1], [0], [0], [1], [0, 0, 1, 1], [], []>} : vector<2x64xbf16>, vector<64x192xbf16>, vector<2x192xf32> -> vector<2x192xf32>
    %258 = vector.extract_strided_slice %255 {offsets = [0, 0], sizes = [2, 128], strides = [1, 1]} : vector<2x192xf32> to vector<2x128xf32>
    %259 = vector.extract_strided_slice %257 {offsets = [0, 0], sizes = [2, 128], strides = [1, 1]} : vector<2x192xf32> to vector<2x128xf32>
    %260 = arith.addf %258, %259 : vector<2x128xf32>
    %261 = arith.negf %260 : vector<2x128xf32>
    %262 = math.exp %261 : vector<2x128xf32>
    %cst_65 = arith.constant 1.000000e+00 : f32
    %263 = vector.broadcast %cst_65 : f32 to vector<2x128xf32>
    %264 = arith.addf %263, %262 : vector<2x128xf32>
    %265 = arith.divf %263, %264 : vector<2x128xf32>
    %266 = vector.extract_strided_slice %265 {offsets = [0, 0], sizes = [2, 64], strides = [1, 1]} : vector<2x128xf32> to vector<2x64xf32>
    %267 = vector.extract_strided_slice %265 {offsets = [0, 64], sizes = [2, 64], strides = [1, 1]} : vector<2x128xf32> to vector<2x64xf32>
    %268 = vector.extract_strided_slice %255 {offsets = [0, 128], sizes = [2, 64], strides = [1, 1]} : vector<2x192xf32> to vector<2x64xf32>
    %269 = vector.extract_strided_slice %257 {offsets = [0, 128], sizes = [2, 64], strides = [1, 1]} : vector<2x192xf32> to vector<2x64xf32>
    %270 = vector.broadcast %36 : vector<1x64xf32> to vector<2x64xf32>
    %271 = arith.addf %269, %270 : vector<2x64xf32>
    %272 = arith.mulf %266, %271 : vector<2x64xf32>
    %273 = arith.addf %268, %272 : vector<2x64xf32>
    %274 = math.tanh %273 : vector<2x64xf32>
    %cst_66 = arith.constant 1.000000e+00 : f32
    %275 = vector.broadcast %cst_66 : f32 to vector<2x64xf32>
    %276 = arith.subf %275, %267 : vector<2x64xf32>
    %277 = arith.mulf %276, %274 : vector<2x64xf32>
    %278 = arith.mulf %267, %238 : vector<2x64xf32>
    %279 = arith.addf %277, %278 : vector<2x64xf32>
    %280 = vector.extract_strided_slice %279 {offsets = [0, 0], sizes = [2, 32], strides = [1, 1]} : vector<2x64xf32> to vector<2x32xf32>
    %c0_67 = arith.constant 0 : index
    %c5 = arith.constant 5 : index
    %c0_68 = arith.constant 0 : index
    %281 = vector.load %arg17[%c0_67, %c5, %c0_68] : memref<2x16x64xf32, #tpu.memory_space<vmem>>, vector<2x1x32xf32>
    %282 = vector.shape_cast %281 : vector<2x1x32xf32> to vector<2x32xf32>
    %283 = vector.shape_cast %280 : vector<2x32xf32> to vector<2x1x32xf32>
    tpu.vector_store %arg17[%c0_67, %c5, %c0_68], %283 {strides = array<i32>} : memref<2x16x64xf32, #tpu.memory_space<vmem>>, vector<2x1x32xf32>,
    %284 = vector.extract_strided_slice %279 {offsets = [0, 32], sizes = [2, 32], strides = [1, 1]} : vector<2x64xf32> to vector<2x32xf32>
    %c0_69 = arith.constant 0 : index
    %c10 = arith.constant 10 : index
    %c32_70 = arith.constant 32 : index
    %285 = vector.load %arg17[%c0_69, %c10, %c32_70] : memref<2x16x64xf32, #tpu.memory_space<vmem>>, vector<2x1x32xf32>
    %286 = vector.shape_cast %285 : vector<2x1x32xf32> to vector<2x32xf32>
    %287 = vector.shape_cast %284 : vector<2x32xf32> to vector<2x1x32xf32>
    tpu.vector_store %arg17[%c0_69, %c10, %c32_70], %287 {strides = array<i32>} : memref<2x16x64xf32, #tpu.memory_space<vmem>>, vector<2x1x32xf32>,
    %288 = vector.extract_strided_slice %31 {offsets = [6, 0, 0], sizes = [1, 2, 192], strides = [1, 1, 1]} : vector<16x2x192xf32> to vector<1x2x192xf32>
    %289 = vector.shape_cast %288 : vector<1x2x192xf32> to vector<2x192xf32>
    %290 = vector.broadcast %34 : vector<1x192xf32> to vector<2x192xf32>
    %291 = arith.mulf %289, %290 : vector<2x192xf32>
    %292 = vector.extract_strided_slice %31 {offsets = [9, 0, 0], sizes = [1, 2, 192], strides = [1, 1, 1]} : vector<16x2x192xf32> to vector<1x2x192xf32>
    %293 = vector.shape_cast %292 : vector<1x2x192xf32> to vector<2x192xf32>
    %294 = vector.broadcast %32 : vector<1x192xf32> to vector<2x192xf32>
    %295 = arith.mulf %293, %294 : vector<2x192xf32>
    %296 = arith.addf %291, %295 : vector<2x192xf32>
    %297 = arith.truncf %279 : vector<2x64xf32> to vector<2x64xbf16>
    %cst_71 = arith.constant dense<0.000000e+00> : vector<2x192xf32>
    %298 = tpu.matmul %297, %35, %cst_71 {dimension_numbers = #tpu.dot_dimension_numbers<[1], [0], [0], [1], [0, 0, 1, 1], [], []>} : vector<2x64xbf16>, vector<64x192xbf16>, vector<2x192xf32> -> vector<2x192xf32>
    %299 = vector.extract_strided_slice %296 {offsets = [0, 0], sizes = [2, 128], strides = [1, 1]} : vector<2x192xf32> to vector<2x128xf32>
    %300 = vector.extract_strided_slice %298 {offsets = [0, 0], sizes = [2, 128], strides = [1, 1]} : vector<2x192xf32> to vector<2x128xf32>
    %301 = arith.addf %299, %300 : vector<2x128xf32>
    %302 = arith.negf %301 : vector<2x128xf32>
    %303 = math.exp %302 : vector<2x128xf32>
    %cst_72 = arith.constant 1.000000e+00 : f32
    %304 = vector.broadcast %cst_72 : f32 to vector<2x128xf32>
    %305 = arith.addf %304, %303 : vector<2x128xf32>
    %306 = arith.divf %304, %305 : vector<2x128xf32>
    %307 = vector.extract_strided_slice %306 {offsets = [0, 0], sizes = [2, 64], strides = [1, 1]} : vector<2x128xf32> to vector<2x64xf32>
    %308 = vector.extract_strided_slice %306 {offsets = [0, 64], sizes = [2, 64], strides = [1, 1]} : vector<2x128xf32> to vector<2x64xf32>
    %309 = vector.extract_strided_slice %296 {offsets = [0, 128], sizes = [2, 64], strides = [1, 1]} : vector<2x192xf32> to vector<2x64xf32>
    %310 = vector.extract_strided_slice %298 {offsets = [0, 128], sizes = [2, 64], strides = [1, 1]} : vector<2x192xf32> to vector<2x64xf32>
    %311 = vector.broadcast %36 : vector<1x64xf32> to vector<2x64xf32>
    %312 = arith.addf %310, %311 : vector<2x64xf32>
    %313 = arith.mulf %307, %312 : vector<2x64xf32>
    %314 = arith.addf %309, %313 : vector<2x64xf32>
    %315 = math.tanh %314 : vector<2x64xf32>
    %cst_73 = arith.constant 1.000000e+00 : f32
    %316 = vector.broadcast %cst_73 : f32 to vector<2x64xf32>
    %317 = arith.subf %316, %308 : vector<2x64xf32>
    %318 = arith.mulf %317, %315 : vector<2x64xf32>
    %319 = arith.mulf %308, %279 : vector<2x64xf32>
    %320 = arith.addf %318, %319 : vector<2x64xf32>
    %321 = vector.extract_strided_slice %320 {offsets = [0, 0], sizes = [2, 32], strides = [1, 1]} : vector<2x64xf32> to vector<2x32xf32>
    %c0_74 = arith.constant 0 : index
    %c6 = arith.constant 6 : index
    %c0_75 = arith.constant 0 : index
    %322 = vector.load %arg17[%c0_74, %c6, %c0_75] : memref<2x16x64xf32, #tpu.memory_space<vmem>>, vector<2x1x32xf32>
    %323 = vector.shape_cast %322 : vector<2x1x32xf32> to vector<2x32xf32>
    %324 = vector.shape_cast %321 : vector<2x32xf32> to vector<2x1x32xf32>
    tpu.vector_store %arg17[%c0_74, %c6, %c0_75], %324 {strides = array<i32>} : memref<2x16x64xf32, #tpu.memory_space<vmem>>, vector<2x1x32xf32>,
    %325 = vector.extract_strided_slice %320 {offsets = [0, 32], sizes = [2, 32], strides = [1, 1]} : vector<2x64xf32> to vector<2x32xf32>
    %c0_76 = arith.constant 0 : index
    %c9 = arith.constant 9 : index
    %c32_77 = arith.constant 32 : index
    %326 = vector.load %arg17[%c0_76, %c9, %c32_77] : memref<2x16x64xf32, #tpu.memory_space<vmem>>, vector<2x1x32xf32>
    %327 = vector.shape_cast %326 : vector<2x1x32xf32> to vector<2x32xf32>
    %328 = vector.shape_cast %325 : vector<2x32xf32> to vector<2x1x32xf32>
    tpu.vector_store %arg17[%c0_76, %c9, %c32_77], %328 {strides = array<i32>} : memref<2x16x64xf32, #tpu.memory_space<vmem>>, vector<2x1x32xf32>,
    %329 = vector.extract_strided_slice %31 {offsets = [7, 0, 0], sizes = [1, 2, 192], strides = [1, 1, 1]} : vector<16x2x192xf32> to vector<1x2x192xf32>
    %330 = vector.shape_cast %329 : vector<1x2x192xf32> to vector<2x192xf32>
    %331 = vector.broadcast %34 : vector<1x192xf32> to vector<2x192xf32>
    %332 = arith.mulf %330, %331 : vector<2x192xf32>
    %333 = vector.extract_strided_slice %31 {offsets = [8, 0, 0], sizes = [1, 2, 192], strides = [1, 1, 1]} : vector<16x2x192xf32> to vector<1x2x192xf32>
    %334 = vector.shape_cast %333 : vector<1x2x192xf32> to vector<2x192xf32>
    %335 = vector.broadcast %32 : vector<1x192xf32> to vector<2x192xf32>
    %336 = arith.mulf %334, %335 : vector<2x192xf32>
    %337 = arith.addf %332, %336 : vector<2x192xf32>
    %338 = arith.truncf %320 : vector<2x64xf32> to vector<2x64xbf16>
    %cst_78 = arith.constant dense<0.000000e+00> : vector<2x192xf32>
    %339 = tpu.matmul %338, %35, %cst_78 {dimension_numbers = #tpu.dot_dimension_numbers<[1], [0], [0], [1], [0, 0, 1, 1], [], []>} : vector<2x64xbf16>, vector<64x192xbf16>, vector<2x192xf32> -> vector<2x192xf32>
    %340 = vector.extract_strided_slice %337 {offsets = [0, 0], sizes = [2, 128], strides = [1, 1]} : vector<2x192xf32> to vector<2x128xf32>
    %341 = vector.extract_strided_slice %339 {offsets = [0, 0], sizes = [2, 128], strides = [1, 1]} : vector<2x192xf32> to vector<2x128xf32>
    %342 = arith.addf %340, %341 : vector<2x128xf32>
    %343 = arith.negf %342 : vector<2x128xf32>
    %344 = math.exp %343 : vector<2x128xf32>
    %cst_79 = arith.constant 1.000000e+00 : f32
    %345 = vector.broadcast %cst_79 : f32 to vector<2x128xf32>
    %346 = arith.addf %345, %344 : vector<2x128xf32>
    %347 = arith.divf %345, %346 : vector<2x128xf32>
    %348 = vector.extract_strided_slice %347 {offsets = [0, 0], sizes = [2, 64], strides = [1, 1]} : vector<2x128xf32> to vector<2x64xf32>
    %349 = vector.extract_strided_slice %347 {offsets = [0, 64], sizes = [2, 64], strides = [1, 1]} : vector<2x128xf32> to vector<2x64xf32>
    %350 = vector.extract_strided_slice %337 {offsets = [0, 128], sizes = [2, 64], strides = [1, 1]} : vector<2x192xf32> to vector<2x64xf32>
    %351 = vector.extract_strided_slice %339 {offsets = [0, 128], sizes = [2, 64], strides = [1, 1]} : vector<2x192xf32> to vector<2x64xf32>
    %352 = vector.broadcast %36 : vector<1x64xf32> to vector<2x64xf32>
    %353 = arith.addf %351, %352 : vector<2x64xf32>
    %354 = arith.mulf %348, %353 : vector<2x64xf32>
    %355 = arith.addf %350, %354 : vector<2x64xf32>
    %356 = math.tanh %355 : vector<2x64xf32>
    %cst_80 = arith.constant 1.000000e+00 : f32
    %357 = vector.broadcast %cst_80 : f32 to vector<2x64xf32>
    %358 = arith.subf %357, %349 : vector<2x64xf32>
    %359 = arith.mulf %358, %356 : vector<2x64xf32>
    %360 = arith.mulf %349, %320 : vector<2x64xf32>
    %361 = arith.addf %359, %360 : vector<2x64xf32>
    %362 = vector.extract_strided_slice %361 {offsets = [0, 0], sizes = [2, 32], strides = [1, 1]} : vector<2x64xf32> to vector<2x32xf32>
    %c0_81 = arith.constant 0 : index
    %c7 = arith.constant 7 : index
    %c0_82 = arith.constant 0 : index
    %363 = vector.load %arg17[%c0_81, %c7, %c0_82] : memref<2x16x64xf32, #tpu.memory_space<vmem>>, vector<2x1x32xf32>
    %364 = vector.shape_cast %363 : vector<2x1x32xf32> to vector<2x32xf32>
    %365 = vector.shape_cast %362 : vector<2x32xf32> to vector<2x1x32xf32>
    tpu.vector_store %arg17[%c0_81, %c7, %c0_82], %365 {strides = array<i32>} : memref<2x16x64xf32, #tpu.memory_space<vmem>>, vector<2x1x32xf32>,
    %366 = vector.extract_strided_slice %361 {offsets = [0, 32], sizes = [2, 32], strides = [1, 1]} : vector<2x64xf32> to vector<2x32xf32>
    %c0_83 = arith.constant 0 : index
    %c8 = arith.constant 8 : index
    %c32_84 = arith.constant 32 : index
    %367 = vector.load %arg17[%c0_83, %c8, %c32_84] : memref<2x16x64xf32, #tpu.memory_space<vmem>>, vector<2x1x32xf32>
    %368 = vector.shape_cast %367 : vector<2x1x32xf32> to vector<2x32xf32>
    %369 = vector.shape_cast %366 : vector<2x32xf32> to vector<2x1x32xf32>
    tpu.vector_store %arg17[%c0_83, %c8, %c32_84], %369 {strides = array<i32>} : memref<2x16x64xf32, #tpu.memory_space<vmem>>, vector<2x1x32xf32>,
    %370 = vector.extract_strided_slice %31 {offsets = [8, 0, 0], sizes = [1, 2, 192], strides = [1, 1, 1]} : vector<16x2x192xf32> to vector<1x2x192xf32>
    %371 = vector.shape_cast %370 : vector<1x2x192xf32> to vector<2x192xf32>
    %372 = vector.broadcast %34 : vector<1x192xf32> to vector<2x192xf32>
    %373 = arith.mulf %371, %372 : vector<2x192xf32>
    %374 = vector.extract_strided_slice %31 {offsets = [7, 0, 0], sizes = [1, 2, 192], strides = [1, 1, 1]} : vector<16x2x192xf32> to vector<1x2x192xf32>
    %375 = vector.shape_cast %374 : vector<1x2x192xf32> to vector<2x192xf32>
    %376 = vector.broadcast %32 : vector<1x192xf32> to vector<2x192xf32>
    %377 = arith.mulf %375, %376 : vector<2x192xf32>
    %378 = arith.addf %373, %377 : vector<2x192xf32>
    %379 = arith.truncf %361 : vector<2x64xf32> to vector<2x64xbf16>
    %cst_85 = arith.constant dense<0.000000e+00> : vector<2x192xf32>
    %380 = tpu.matmul %379, %35, %cst_85 {dimension_numbers = #tpu.dot_dimension_numbers<[1], [0], [0], [1], [0, 0, 1, 1], [], []>} : vector<2x64xbf16>, vector<64x192xbf16>, vector<2x192xf32> -> vector<2x192xf32>
    %381 = vector.extract_strided_slice %378 {offsets = [0, 0], sizes = [2, 128], strides = [1, 1]} : vector<2x192xf32> to vector<2x128xf32>
    %382 = vector.extract_strided_slice %380 {offsets = [0, 0], sizes = [2, 128], strides = [1, 1]} : vector<2x192xf32> to vector<2x128xf32>
    %383 = arith.addf %381, %382 : vector<2x128xf32>
    %384 = arith.negf %383 : vector<2x128xf32>
    %385 = math.exp %384 : vector<2x128xf32>
    %cst_86 = arith.constant 1.000000e+00 : f32
    %386 = vector.broadcast %cst_86 : f32 to vector<2x128xf32>
    %387 = arith.addf %386, %385 : vector<2x128xf32>
    %388 = arith.divf %386, %387 : vector<2x128xf32>
    %389 = vector.extract_strided_slice %388 {offsets = [0, 0], sizes = [2, 64], strides = [1, 1]} : vector<2x128xf32> to vector<2x64xf32>
    %390 = vector.extract_strided_slice %388 {offsets = [0, 64], sizes = [2, 64], strides = [1, 1]} : vector<2x128xf32> to vector<2x64xf32>
    %391 = vector.extract_strided_slice %378 {offsets = [0, 128], sizes = [2, 64], strides = [1, 1]} : vector<2x192xf32> to vector<2x64xf32>
    %392 = vector.extract_strided_slice %380 {offsets = [0, 128], sizes = [2, 64], strides = [1, 1]} : vector<2x192xf32> to vector<2x64xf32>
    %393 = vector.broadcast %36 : vector<1x64xf32> to vector<2x64xf32>
    %394 = arith.addf %392, %393 : vector<2x64xf32>
    %395 = arith.mulf %389, %394 : vector<2x64xf32>
    %396 = arith.addf %391, %395 : vector<2x64xf32>
    %397 = math.tanh %396 : vector<2x64xf32>
    %cst_87 = arith.constant 1.000000e+00 : f32
    %398 = vector.broadcast %cst_87 : f32 to vector<2x64xf32>
    %399 = arith.subf %398, %390 : vector<2x64xf32>
    %400 = arith.mulf %399, %397 : vector<2x64xf32>
    %401 = arith.mulf %390, %361 : vector<2x64xf32>
    %402 = arith.addf %400, %401 : vector<2x64xf32>
    %403 = vector.extract_strided_slice %402 {offsets = [0, 0], sizes = [2, 32], strides = [1, 1]} : vector<2x64xf32> to vector<2x32xf32>
    %c0_88 = arith.constant 0 : index
    %c8_89 = arith.constant 8 : index
    %c0_90 = arith.constant 0 : index
    %404 = vector.load %arg17[%c0_88, %c8_89, %c0_90] : memref<2x16x64xf32, #tpu.memory_space<vmem>>, vector<2x1x32xf32>
    %405 = vector.shape_cast %404 : vector<2x1x32xf32> to vector<2x32xf32>
    %406 = vector.shape_cast %403 : vector<2x32xf32> to vector<2x1x32xf32>
    tpu.vector_store %arg17[%c0_88, %c8_89, %c0_90], %406 {strides = array<i32>} : memref<2x16x64xf32, #tpu.memory_space<vmem>>, vector<2x1x32xf32>,
    %407 = vector.extract_strided_slice %402 {offsets = [0, 32], sizes = [2, 32], strides = [1, 1]} : vector<2x64xf32> to vector<2x32xf32>
    %c0_91 = arith.constant 0 : index
    %c7_92 = arith.constant 7 : index
    %c32_93 = arith.constant 32 : index
    %408 = vector.load %arg17[%c0_91, %c7_92, %c32_93] : memref<2x16x64xf32, #tpu.memory_space<vmem>>, vector<2x1x32xf32>
    %409 = vector.shape_cast %408 : vector<2x1x32xf32> to vector<2x32xf32>
    %410 = vector.shape_cast %407 : vector<2x32xf32> to vector<2x1x32xf32>
    tpu.vector_store %arg17[%c0_91, %c7_92, %c32_93], %410 {strides = array<i32>} : memref<2x16x64xf32, #tpu.memory_space<vmem>>, vector<2x1x32xf32>,
    %411 = vector.extract_strided_slice %31 {offsets = [9, 0, 0], sizes = [1, 2, 192], strides = [1, 1, 1]} : vector<16x2x192xf32> to vector<1x2x192xf32>
    %412 = vector.shape_cast %411 : vector<1x2x192xf32> to vector<2x192xf32>
    %413 = vector.broadcast %34 : vector<1x192xf32> to vector<2x192xf32>
    %414 = arith.mulf %412, %413 : vector<2x192xf32>
    %415 = vector.extract_strided_slice %31 {offsets = [6, 0, 0], sizes = [1, 2, 192], strides = [1, 1, 1]} : vector<16x2x192xf32> to vector<1x2x192xf32>
    %416 = vector.shape_cast %415 : vector<1x2x192xf32> to vector<2x192xf32>
    %417 = vector.broadcast %32 : vector<1x192xf32> to vector<2x192xf32>
    %418 = arith.mulf %416, %417 : vector<2x192xf32>
    %419 = arith.addf %414, %418 : vector<2x192xf32>
    %420 = arith.truncf %402 : vector<2x64xf32> to vector<2x64xbf16>
    %cst_94 = arith.constant dense<0.000000e+00> : vector<2x192xf32>
    %421 = tpu.matmul %420, %35, %cst_94 {dimension_numbers = #tpu.dot_dimension_numbers<[1], [0], [0], [1], [0, 0, 1, 1], [], []>} : vector<2x64xbf16>, vector<64x192xbf16>, vector<2x192xf32> -> vector<2x192xf32>
    %422 = vector.extract_strided_slice %419 {offsets = [0, 0], sizes = [2, 128], strides = [1, 1]} : vector<2x192xf32> to vector<2x128xf32>
    %423 = vector.extract_strided_slice %421 {offsets = [0, 0], sizes = [2, 128], strides = [1, 1]} : vector<2x192xf32> to vector<2x128xf32>
    %424 = arith.addf %422, %423 : vector<2x128xf32>
    %425 = arith.negf %424 : vector<2x128xf32>
    %426 = math.exp %425 : vector<2x128xf32>
    %cst_95 = arith.constant 1.000000e+00 : f32
    %427 = vector.broadcast %cst_95 : f32 to vector<2x128xf32>
    %428 = arith.addf %427, %426 : vector<2x128xf32>
    %429 = arith.divf %427, %428 : vector<2x128xf32>
    %430 = vector.extract_strided_slice %429 {offsets = [0, 0], sizes = [2, 64], strides = [1, 1]} : vector<2x128xf32> to vector<2x64xf32>
    %431 = vector.extract_strided_slice %429 {offsets = [0, 64], sizes = [2, 64], strides = [1, 1]} : vector<2x128xf32> to vector<2x64xf32>
    %432 = vector.extract_strided_slice %419 {offsets = [0, 128], sizes = [2, 64], strides = [1, 1]} : vector<2x192xf32> to vector<2x64xf32>
    %433 = vector.extract_strided_slice %421 {offsets = [0, 128], sizes = [2, 64], strides = [1, 1]} : vector<2x192xf32> to vector<2x64xf32>
    %434 = vector.broadcast %36 : vector<1x64xf32> to vector<2x64xf32>
    %435 = arith.addf %433, %434 : vector<2x64xf32>
    %436 = arith.mulf %430, %435 : vector<2x64xf32>
    %437 = arith.addf %432, %436 : vector<2x64xf32>
    %438 = math.tanh %437 : vector<2x64xf32>
    %cst_96 = arith.constant 1.000000e+00 : f32
    %439 = vector.broadcast %cst_96 : f32 to vector<2x64xf32>
    %440 = arith.subf %439, %431 : vector<2x64xf32>
    %441 = arith.mulf %440, %438 : vector<2x64xf32>
    %442 = arith.mulf %431, %402 : vector<2x64xf32>
    %443 = arith.addf %441, %442 : vector<2x64xf32>
    %444 = vector.extract_strided_slice %443 {offsets = [0, 0], sizes = [2, 32], strides = [1, 1]} : vector<2x64xf32> to vector<2x32xf32>
    %c0_97 = arith.constant 0 : index
    %c9_98 = arith.constant 9 : index
    %c0_99 = arith.constant 0 : index
    %445 = vector.load %arg17[%c0_97, %c9_98, %c0_99] : memref<2x16x64xf32, #tpu.memory_space<vmem>>, vector<2x1x32xf32>
    %446 = vector.shape_cast %445 : vector<2x1x32xf32> to vector<2x32xf32>
    %447 = vector.shape_cast %444 : vector<2x32xf32> to vector<2x1x32xf32>
    tpu.vector_store %arg17[%c0_97, %c9_98, %c0_99], %447 {strides = array<i32>} : memref<2x16x64xf32, #tpu.memory_space<vmem>>, vector<2x1x32xf32>,
    %448 = vector.extract_strided_slice %443 {offsets = [0, 32], sizes = [2, 32], strides = [1, 1]} : vector<2x64xf32> to vector<2x32xf32>
    %c0_100 = arith.constant 0 : index
    %c6_101 = arith.constant 6 : index
    %c32_102 = arith.constant 32 : index
    %449 = vector.load %arg17[%c0_100, %c6_101, %c32_102] : memref<2x16x64xf32, #tpu.memory_space<vmem>>, vector<2x1x32xf32>
    %450 = vector.shape_cast %449 : vector<2x1x32xf32> to vector<2x32xf32>
    %451 = vector.shape_cast %448 : vector<2x32xf32> to vector<2x1x32xf32>
    tpu.vector_store %arg17[%c0_100, %c6_101, %c32_102], %451 {strides = array<i32>} : memref<2x16x64xf32, #tpu.memory_space<vmem>>, vector<2x1x32xf32>,
    %452 = vector.extract_strided_slice %31 {offsets = [10, 0, 0], sizes = [1, 2, 192], strides = [1, 1, 1]} : vector<16x2x192xf32> to vector<1x2x192xf32>
    %453 = vector.shape_cast %452 : vector<1x2x192xf32> to vector<2x192xf32>
    %454 = vector.broadcast %34 : vector<1x192xf32> to vector<2x192xf32>
    %455 = arith.mulf %453, %454 : vector<2x192xf32>
    %456 = vector.extract_strided_slice %31 {offsets = [5, 0, 0], sizes = [1, 2, 192], strides = [1, 1, 1]} : vector<16x2x192xf32> to vector<1x2x192xf32>
    %457 = vector.shape_cast %456 : vector<1x2x192xf32> to vector<2x192xf32>
    %458 = vector.broadcast %32 : vector<1x192xf32> to vector<2x192xf32>
    %459 = arith.mulf %457, %458 : vector<2x192xf32>
    %460 = arith.addf %455, %459 : vector<2x192xf32>
    %461 = arith.truncf %443 : vector<2x64xf32> to vector<2x64xbf16>
    %cst_103 = arith.constant dense<0.000000e+00> : vector<2x192xf32>
    %462 = tpu.matmul %461, %35, %cst_103 {dimension_numbers = #tpu.dot_dimension_numbers<[1], [0], [0], [1], [0, 0, 1, 1], [], []>} : vector<2x64xbf16>, vector<64x192xbf16>, vector<2x192xf32> -> vector<2x192xf32>
    %463 = vector.extract_strided_slice %460 {offsets = [0, 0], sizes = [2, 128], strides = [1, 1]} : vector<2x192xf32> to vector<2x128xf32>
    %464 = vector.extract_strided_slice %462 {offsets = [0, 0], sizes = [2, 128], strides = [1, 1]} : vector<2x192xf32> to vector<2x128xf32>
    %465 = arith.addf %463, %464 : vector<2x128xf32>
    %466 = arith.negf %465 : vector<2x128xf32>
    %467 = math.exp %466 : vector<2x128xf32>
    %cst_104 = arith.constant 1.000000e+00 : f32
    %468 = vector.broadcast %cst_104 : f32 to vector<2x128xf32>
    %469 = arith.addf %468, %467 : vector<2x128xf32>
    %470 = arith.divf %468, %469 : vector<2x128xf32>
    %471 = vector.extract_strided_slice %470 {offsets = [0, 0], sizes = [2, 64], strides = [1, 1]} : vector<2x128xf32> to vector<2x64xf32>
    %472 = vector.extract_strided_slice %470 {offsets = [0, 64], sizes = [2, 64], strides = [1, 1]} : vector<2x128xf32> to vector<2x64xf32>
    %473 = vector.extract_strided_slice %460 {offsets = [0, 128], sizes = [2, 64], strides = [1, 1]} : vector<2x192xf32> to vector<2x64xf32>
    %474 = vector.extract_strided_slice %462 {offsets = [0, 128], sizes = [2, 64], strides = [1, 1]} : vector<2x192xf32> to vector<2x64xf32>
    %475 = vector.broadcast %36 : vector<1x64xf32> to vector<2x64xf32>
    %476 = arith.addf %474, %475 : vector<2x64xf32>
    %477 = arith.mulf %471, %476 : vector<2x64xf32>
    %478 = arith.addf %473, %477 : vector<2x64xf32>
    %479 = math.tanh %478 : vector<2x64xf32>
    %cst_105 = arith.constant 1.000000e+00 : f32
    %480 = vector.broadcast %cst_105 : f32 to vector<2x64xf32>
    %481 = arith.subf %480, %472 : vector<2x64xf32>
    %482 = arith.mulf %481, %479 : vector<2x64xf32>
    %483 = arith.mulf %472, %443 : vector<2x64xf32>
    %484 = arith.addf %482, %483 : vector<2x64xf32>
    %485 = vector.extract_strided_slice %484 {offsets = [0, 0], sizes = [2, 32], strides = [1, 1]} : vector<2x64xf32> to vector<2x32xf32>
    %c0_106 = arith.constant 0 : index
    %c10_107 = arith.constant 10 : index
    %c0_108 = arith.constant 0 : index
    %486 = vector.load %arg17[%c0_106, %c10_107, %c0_108] : memref<2x16x64xf32, #tpu.memory_space<vmem>>, vector<2x1x32xf32>
    %487 = vector.shape_cast %486 : vector<2x1x32xf32> to vector<2x32xf32>
    %488 = vector.shape_cast %485 : vector<2x32xf32> to vector<2x1x32xf32>
    tpu.vector_store %arg17[%c0_106, %c10_107, %c0_108], %488 {strides = array<i32>} : memref<2x16x64xf32, #tpu.memory_space<vmem>>, vector<2x1x32xf32>,
    %489 = vector.extract_strided_slice %484 {offsets = [0, 32], sizes = [2, 32], strides = [1, 1]} : vector<2x64xf32> to vector<2x32xf32>
    %c0_109 = arith.constant 0 : index
    %c5_110 = arith.constant 5 : index
    %c32_111 = arith.constant 32 : index
    %490 = vector.load %arg17[%c0_109, %c5_110, %c32_111] : memref<2x16x64xf32, #tpu.memory_space<vmem>>, vector<2x1x32xf32>
    %491 = vector.shape_cast %490 : vector<2x1x32xf32> to vector<2x32xf32>
    %492 = vector.shape_cast %489 : vector<2x32xf32> to vector<2x1x32xf32>
    tpu.vector_store %arg17[%c0_109, %c5_110, %c32_111], %492 {strides = array<i32>} : memref<2x16x64xf32, #tpu.memory_space<vmem>>, vector<2x1x32xf32>,
    %493 = vector.extract_strided_slice %31 {offsets = [11, 0, 0], sizes = [1, 2, 192], strides = [1, 1, 1]} : vector<16x2x192xf32> to vector<1x2x192xf32>
    %494 = vector.shape_cast %493 : vector<1x2x192xf32> to vector<2x192xf32>
    %495 = vector.broadcast %34 : vector<1x192xf32> to vector<2x192xf32>
    %496 = arith.mulf %494, %495 : vector<2x192xf32>
    %497 = vector.extract_strided_slice %31 {offsets = [4, 0, 0], sizes = [1, 2, 192], strides = [1, 1, 1]} : vector<16x2x192xf32> to vector<1x2x192xf32>
    %498 = vector.shape_cast %497 : vector<1x2x192xf32> to vector<2x192xf32>
    %499 = vector.broadcast %32 : vector<1x192xf32> to vector<2x192xf32>
    %500 = arith.mulf %498, %499 : vector<2x192xf32>
    %501 = arith.addf %496, %500 : vector<2x192xf32>
    %502 = arith.truncf %484 : vector<2x64xf32> to vector<2x64xbf16>
    %cst_112 = arith.constant dense<0.000000e+00> : vector<2x192xf32>
    %503 = tpu.matmul %502, %35, %cst_112 {dimension_numbers = #tpu.dot_dimension_numbers<[1], [0], [0], [1], [0, 0, 1, 1], [], []>} : vector<2x64xbf16>, vector<64x192xbf16>, vector<2x192xf32> -> vector<2x192xf32>
    %504 = vector.extract_strided_slice %501 {offsets = [0, 0], sizes = [2, 128], strides = [1, 1]} : vector<2x192xf32> to vector<2x128xf32>
    %505 = vector.extract_strided_slice %503 {offsets = [0, 0], sizes = [2, 128], strides = [1, 1]} : vector<2x192xf32> to vector<2x128xf32>
    %506 = arith.addf %504, %505 : vector<2x128xf32>
    %507 = arith.negf %506 : vector<2x128xf32>
    %508 = math.exp %507 : vector<2x128xf32>
    %cst_113 = arith.constant 1.000000e+00 : f32
    %509 = vector.broadcast %cst_113 : f32 to vector<2x128xf32>
    %510 = arith.addf %509, %508 : vector<2x128xf32>
    %511 = arith.divf %509, %510 : vector<2x128xf32>
    %512 = vector.extract_strided_slice %511 {offsets = [0, 0], sizes = [2, 64], strides = [1, 1]} : vector<2x128xf32> to vector<2x64xf32>
    %513 = vector.extract_strided_slice %511 {offsets = [0, 64], sizes = [2, 64], strides = [1, 1]} : vector<2x128xf32> to vector<2x64xf32>
    %514 = vector.extract_strided_slice %501 {offsets = [0, 128], sizes = [2, 64], strides = [1, 1]} : vector<2x192xf32> to vector<2x64xf32>
    %515 = vector.extract_strided_slice %503 {offsets = [0, 128], sizes = [2, 64], strides = [1, 1]} : vector<2x192xf32> to vector<2x64xf32>
    %516 = vector.broadcast %36 : vector<1x64xf32> to vector<2x64xf32>
    %517 = arith.addf %515, %516 : vector<2x64xf32>
    %518 = arith.mulf %512, %517 : vector<2x64xf32>
    %519 = arith.addf %514, %518 : vector<2x64xf32>
    %520 = math.tanh %519 : vector<2x64xf32>
    %cst_114 = arith.constant 1.000000e+00 : f32
    %521 = vector.broadcast %cst_114 : f32 to vector<2x64xf32>
    %522 = arith.subf %521, %513 : vector<2x64xf32>
    %523 = arith.mulf %522, %520 : vector<2x64xf32>
    %524 = arith.mulf %513, %484 : vector<2x64xf32>
    %525 = arith.addf %523, %524 : vector<2x64xf32>
    %526 = vector.extract_strided_slice %525 {offsets = [0, 0], sizes = [2, 32], strides = [1, 1]} : vector<2x64xf32> to vector<2x32xf32>
    %c0_115 = arith.constant 0 : index
    %c11_116 = arith.constant 11 : index
    %c0_117 = arith.constant 0 : index
    %527 = vector.load %arg17[%c0_115, %c11_116, %c0_117] : memref<2x16x64xf32, #tpu.memory_space<vmem>>, vector<2x1x32xf32>
    %528 = vector.shape_cast %527 : vector<2x1x32xf32> to vector<2x32xf32>
    %529 = vector.shape_cast %526 : vector<2x32xf32> to vector<2x1x32xf32>
    tpu.vector_store %arg17[%c0_115, %c11_116, %c0_117], %529 {strides = array<i32>} : memref<2x16x64xf32, #tpu.memory_space<vmem>>, vector<2x1x32xf32>,
    %530 = vector.extract_strided_slice %525 {offsets = [0, 32], sizes = [2, 32], strides = [1, 1]} : vector<2x64xf32> to vector<2x32xf32>
    %c0_118 = arith.constant 0 : index
    %c4_119 = arith.constant 4 : index
    %c32_120 = arith.constant 32 : index
    %531 = vector.load %arg17[%c0_118, %c4_119, %c32_120] : memref<2x16x64xf32, #tpu.memory_space<vmem>>, vector<2x1x32xf32>
    %532 = vector.shape_cast %531 : vector<2x1x32xf32> to vector<2x32xf32>
    %533 = vector.shape_cast %530 : vector<2x32xf32> to vector<2x1x32xf32>
    tpu.vector_store %arg17[%c0_118, %c4_119, %c32_120], %533 {strides = array<i32>} : memref<2x16x64xf32, #tpu.memory_space<vmem>>, vector<2x1x32xf32>,
    %534 = vector.extract_strided_slice %31 {offsets = [12, 0, 0], sizes = [1, 2, 192], strides = [1, 1, 1]} : vector<16x2x192xf32> to vector<1x2x192xf32>
    %535 = vector.shape_cast %534 : vector<1x2x192xf32> to vector<2x192xf32>
    %536 = vector.broadcast %34 : vector<1x192xf32> to vector<2x192xf32>
    %537 = arith.mulf %535, %536 : vector<2x192xf32>
    %538 = vector.extract_strided_slice %31 {offsets = [3, 0, 0], sizes = [1, 2, 192], strides = [1, 1, 1]} : vector<16x2x192xf32> to vector<1x2x192xf32>
    %539 = vector.shape_cast %538 : vector<1x2x192xf32> to vector<2x192xf32>
    %540 = vector.broadcast %32 : vector<1x192xf32> to vector<2x192xf32>
    %541 = arith.mulf %539, %540 : vector<2x192xf32>
    %542 = arith.addf %537, %541 : vector<2x192xf32>
    %543 = arith.truncf %525 : vector<2x64xf32> to vector<2x64xbf16>
    %cst_121 = arith.constant dense<0.000000e+00> : vector<2x192xf32>
    %544 = tpu.matmul %543, %35, %cst_121 {dimension_numbers = #tpu.dot_dimension_numbers<[1], [0], [0], [1], [0, 0, 1, 1], [], []>} : vector<2x64xbf16>, vector<64x192xbf16>, vector<2x192xf32> -> vector<2x192xf32>
    %545 = vector.extract_strided_slice %542 {offsets = [0, 0], sizes = [2, 128], strides = [1, 1]} : vector<2x192xf32> to vector<2x128xf32>
    %546 = vector.extract_strided_slice %544 {offsets = [0, 0], sizes = [2, 128], strides = [1, 1]} : vector<2x192xf32> to vector<2x128xf32>
    %547 = arith.addf %545, %546 : vector<2x128xf32>
    %548 = arith.negf %547 : vector<2x128xf32>
    %549 = math.exp %548 : vector<2x128xf32>
    %cst_122 = arith.constant 1.000000e+00 : f32
    %550 = vector.broadcast %cst_122 : f32 to vector<2x128xf32>
    %551 = arith.addf %550, %549 : vector<2x128xf32>
    %552 = arith.divf %550, %551 : vector<2x128xf32>
    %553 = vector.extract_strided_slice %552 {offsets = [0, 0], sizes = [2, 64], strides = [1, 1]} : vector<2x128xf32> to vector<2x64xf32>
    %554 = vector.extract_strided_slice %552 {offsets = [0, 64], sizes = [2, 64], strides = [1, 1]} : vector<2x128xf32> to vector<2x64xf32>
    %555 = vector.extract_strided_slice %542 {offsets = [0, 128], sizes = [2, 64], strides = [1, 1]} : vector<2x192xf32> to vector<2x64xf32>
    %556 = vector.extract_strided_slice %544 {offsets = [0, 128], sizes = [2, 64], strides = [1, 1]} : vector<2x192xf32> to vector<2x64xf32>
    %557 = vector.broadcast %36 : vector<1x64xf32> to vector<2x64xf32>
    %558 = arith.addf %556, %557 : vector<2x64xf32>
    %559 = arith.mulf %553, %558 : vector<2x64xf32>
    %560 = arith.addf %555, %559 : vector<2x64xf32>
    %561 = math.tanh %560 : vector<2x64xf32>
    %cst_123 = arith.constant 1.000000e+00 : f32
    %562 = vector.broadcast %cst_123 : f32 to vector<2x64xf32>
    %563 = arith.subf %562, %554 : vector<2x64xf32>
    %564 = arith.mulf %563, %561 : vector<2x64xf32>
    %565 = arith.mulf %554, %525 : vector<2x64xf32>
    %566 = arith.addf %564, %565 : vector<2x64xf32>
    %567 = vector.extract_strided_slice %566 {offsets = [0, 0], sizes = [2, 32], strides = [1, 1]} : vector<2x64xf32> to vector<2x32xf32>
    %c0_124 = arith.constant 0 : index
    %c12_125 = arith.constant 12 : index
    %c0_126 = arith.constant 0 : index
    %568 = vector.load %arg17[%c0_124, %c12_125, %c0_126] : memref<2x16x64xf32, #tpu.memory_space<vmem>>, vector<2x1x32xf32>
    %569 = vector.shape_cast %568 : vector<2x1x32xf32> to vector<2x32xf32>
    %570 = vector.shape_cast %567 : vector<2x32xf32> to vector<2x1x32xf32>
    tpu.vector_store %arg17[%c0_124, %c12_125, %c0_126], %570 {strides = array<i32>} : memref<2x16x64xf32, #tpu.memory_space<vmem>>, vector<2x1x32xf32>,
    %571 = vector.extract_strided_slice %566 {offsets = [0, 32], sizes = [2, 32], strides = [1, 1]} : vector<2x64xf32> to vector<2x32xf32>
    %c0_127 = arith.constant 0 : index
    %c3_128 = arith.constant 3 : index
    %c32_129 = arith.constant 32 : index
    %572 = vector.load %arg17[%c0_127, %c3_128, %c32_129] : memref<2x16x64xf32, #tpu.memory_space<vmem>>, vector<2x1x32xf32>
    %573 = vector.shape_cast %572 : vector<2x1x32xf32> to vector<2x32xf32>
    %574 = vector.shape_cast %571 : vector<2x32xf32> to vector<2x1x32xf32>
    tpu.vector_store %arg17[%c0_127, %c3_128, %c32_129], %574 {strides = array<i32>} : memref<2x16x64xf32, #tpu.memory_space<vmem>>, vector<2x1x32xf32>,
    %575 = vector.extract_strided_slice %31 {offsets = [13, 0, 0], sizes = [1, 2, 192], strides = [1, 1, 1]} : vector<16x2x192xf32> to vector<1x2x192xf32>
    %576 = vector.shape_cast %575 : vector<1x2x192xf32> to vector<2x192xf32>
    %577 = vector.broadcast %34 : vector<1x192xf32> to vector<2x192xf32>
    %578 = arith.mulf %576, %577 : vector<2x192xf32>
    %579 = vector.extract_strided_slice %31 {offsets = [2, 0, 0], sizes = [1, 2, 192], strides = [1, 1, 1]} : vector<16x2x192xf32> to vector<1x2x192xf32>
    %580 = vector.shape_cast %579 : vector<1x2x192xf32> to vector<2x192xf32>
    %581 = vector.broadcast %32 : vector<1x192xf32> to vector<2x192xf32>
    %582 = arith.mulf %580, %581 : vector<2x192xf32>
    %583 = arith.addf %578, %582 : vector<2x192xf32>
    %584 = arith.truncf %566 : vector<2x64xf32> to vector<2x64xbf16>
    %cst_130 = arith.constant dense<0.000000e+00> : vector<2x192xf32>
    %585 = tpu.matmul %584, %35, %cst_130 {dimension_numbers = #tpu.dot_dimension_numbers<[1], [0], [0], [1], [0, 0, 1, 1], [], []>} : vector<2x64xbf16>, vector<64x192xbf16>, vector<2x192xf32> -> vector<2x192xf32>
    %586 = vector.extract_strided_slice %583 {offsets = [0, 0], sizes = [2, 128], strides = [1, 1]} : vector<2x192xf32> to vector<2x128xf32>
    %587 = vector.extract_strided_slice %585 {offsets = [0, 0], sizes = [2, 128], strides = [1, 1]} : vector<2x192xf32> to vector<2x128xf32>
    %588 = arith.addf %586, %587 : vector<2x128xf32>
    %589 = arith.negf %588 : vector<2x128xf32>
    %590 = math.exp %589 : vector<2x128xf32>
    %cst_131 = arith.constant 1.000000e+00 : f32
    %591 = vector.broadcast %cst_131 : f32 to vector<2x128xf32>
    %592 = arith.addf %591, %590 : vector<2x128xf32>
    %593 = arith.divf %591, %592 : vector<2x128xf32>
    %594 = vector.extract_strided_slice %593 {offsets = [0, 0], sizes = [2, 64], strides = [1, 1]} : vector<2x128xf32> to vector<2x64xf32>
    %595 = vector.extract_strided_slice %593 {offsets = [0, 64], sizes = [2, 64], strides = [1, 1]} : vector<2x128xf32> to vector<2x64xf32>
    %596 = vector.extract_strided_slice %583 {offsets = [0, 128], sizes = [2, 64], strides = [1, 1]} : vector<2x192xf32> to vector<2x64xf32>
    %597 = vector.extract_strided_slice %585 {offsets = [0, 128], sizes = [2, 64], strides = [1, 1]} : vector<2x192xf32> to vector<2x64xf32>
    %598 = vector.broadcast %36 : vector<1x64xf32> to vector<2x64xf32>
    %599 = arith.addf %597, %598 : vector<2x64xf32>
    %600 = arith.mulf %594, %599 : vector<2x64xf32>
    %601 = arith.addf %596, %600 : vector<2x64xf32>
    %602 = math.tanh %601 : vector<2x64xf32>
    %cst_132 = arith.constant 1.000000e+00 : f32
    %603 = vector.broadcast %cst_132 : f32 to vector<2x64xf32>
    %604 = arith.subf %603, %595 : vector<2x64xf32>
    %605 = arith.mulf %604, %602 : vector<2x64xf32>
    %606 = arith.mulf %595, %566 : vector<2x64xf32>
    %607 = arith.addf %605, %606 : vector<2x64xf32>
    %608 = vector.extract_strided_slice %607 {offsets = [0, 0], sizes = [2, 32], strides = [1, 1]} : vector<2x64xf32> to vector<2x32xf32>
    %c0_133 = arith.constant 0 : index
    %c13_134 = arith.constant 13 : index
    %c0_135 = arith.constant 0 : index
    %609 = vector.load %arg17[%c0_133, %c13_134, %c0_135] : memref<2x16x64xf32, #tpu.memory_space<vmem>>, vector<2x1x32xf32>
    %610 = vector.shape_cast %609 : vector<2x1x32xf32> to vector<2x32xf32>
    %611 = vector.shape_cast %608 : vector<2x32xf32> to vector<2x1x32xf32>
    tpu.vector_store %arg17[%c0_133, %c13_134, %c0_135], %611 {strides = array<i32>} : memref<2x16x64xf32, #tpu.memory_space<vmem>>, vector<2x1x32xf32>,
    %612 = vector.extract_strided_slice %607 {offsets = [0, 32], sizes = [2, 32], strides = [1, 1]} : vector<2x64xf32> to vector<2x32xf32>
    %c0_136 = arith.constant 0 : index
    %c2_137 = arith.constant 2 : index
    %c32_138 = arith.constant 32 : index
    %613 = vector.load %arg17[%c0_136, %c2_137, %c32_138] : memref<2x16x64xf32, #tpu.memory_space<vmem>>, vector<2x1x32xf32>
    %614 = vector.shape_cast %613 : vector<2x1x32xf32> to vector<2x32xf32>
    %615 = vector.shape_cast %612 : vector<2x32xf32> to vector<2x1x32xf32>
    tpu.vector_store %arg17[%c0_136, %c2_137, %c32_138], %615 {strides = array<i32>} : memref<2x16x64xf32, #tpu.memory_space<vmem>>, vector<2x1x32xf32>,
    %616 = vector.extract_strided_slice %31 {offsets = [14, 0, 0], sizes = [1, 2, 192], strides = [1, 1, 1]} : vector<16x2x192xf32> to vector<1x2x192xf32>
    %617 = vector.shape_cast %616 : vector<1x2x192xf32> to vector<2x192xf32>
    %618 = vector.broadcast %34 : vector<1x192xf32> to vector<2x192xf32>
    %619 = arith.mulf %617, %618 : vector<2x192xf32>
    %620 = vector.extract_strided_slice %31 {offsets = [1, 0, 0], sizes = [1, 2, 192], strides = [1, 1, 1]} : vector<16x2x192xf32> to vector<1x2x192xf32>
    %621 = vector.shape_cast %620 : vector<1x2x192xf32> to vector<2x192xf32>
    %622 = vector.broadcast %32 : vector<1x192xf32> to vector<2x192xf32>
    %623 = arith.mulf %621, %622 : vector<2x192xf32>
    %624 = arith.addf %619, %623 : vector<2x192xf32>
    %625 = arith.truncf %607 : vector<2x64xf32> to vector<2x64xbf16>
    %cst_139 = arith.constant dense<0.000000e+00> : vector<2x192xf32>
    %626 = tpu.matmul %625, %35, %cst_139 {dimension_numbers = #tpu.dot_dimension_numbers<[1], [0], [0], [1], [0, 0, 1, 1], [], []>} : vector<2x64xbf16>, vector<64x192xbf16>, vector<2x192xf32> -> vector<2x192xf32>
    %627 = vector.extract_strided_slice %624 {offsets = [0, 0], sizes = [2, 128], strides = [1, 1]} : vector<2x192xf32> to vector<2x128xf32>
    %628 = vector.extract_strided_slice %626 {offsets = [0, 0], sizes = [2, 128], strides = [1, 1]} : vector<2x192xf32> to vector<2x128xf32>
    %629 = arith.addf %627, %628 : vector<2x128xf32>
    %630 = arith.negf %629 : vector<2x128xf32>
    %631 = math.exp %630 : vector<2x128xf32>
    %cst_140 = arith.constant 1.000000e+00 : f32
    %632 = vector.broadcast %cst_140 : f32 to vector<2x128xf32>
    %633 = arith.addf %632, %631 : vector<2x128xf32>
    %634 = arith.divf %632, %633 : vector<2x128xf32>
    %635 = vector.extract_strided_slice %634 {offsets = [0, 0], sizes = [2, 64], strides = [1, 1]} : vector<2x128xf32> to vector<2x64xf32>
    %636 = vector.extract_strided_slice %634 {offsets = [0, 64], sizes = [2, 64], strides = [1, 1]} : vector<2x128xf32> to vector<2x64xf32>
    %637 = vector.extract_strided_slice %624 {offsets = [0, 128], sizes = [2, 64], strides = [1, 1]} : vector<2x192xf32> to vector<2x64xf32>
    %638 = vector.extract_strided_slice %626 {offsets = [0, 128], sizes = [2, 64], strides = [1, 1]} : vector<2x192xf32> to vector<2x64xf32>
    %639 = vector.broadcast %36 : vector<1x64xf32> to vector<2x64xf32>
    %640 = arith.addf %638, %639 : vector<2x64xf32>
    %641 = arith.mulf %635, %640 : vector<2x64xf32>
    %642 = arith.addf %637, %641 : vector<2x64xf32>
    %643 = math.tanh %642 : vector<2x64xf32>
    %cst_141 = arith.constant 1.000000e+00 : f32
    %644 = vector.broadcast %cst_141 : f32 to vector<2x64xf32>
    %645 = arith.subf %644, %636 : vector<2x64xf32>
    %646 = arith.mulf %645, %643 : vector<2x64xf32>
    %647 = arith.mulf %636, %607 : vector<2x64xf32>
    %648 = arith.addf %646, %647 : vector<2x64xf32>
    %649 = vector.extract_strided_slice %648 {offsets = [0, 0], sizes = [2, 32], strides = [1, 1]} : vector<2x64xf32> to vector<2x32xf32>
    %c0_142 = arith.constant 0 : index
    %c14_143 = arith.constant 14 : index
    %c0_144 = arith.constant 0 : index
    %650 = vector.load %arg17[%c0_142, %c14_143, %c0_144] : memref<2x16x64xf32, #tpu.memory_space<vmem>>, vector<2x1x32xf32>
    %651 = vector.shape_cast %650 : vector<2x1x32xf32> to vector<2x32xf32>
    %652 = vector.shape_cast %649 : vector<2x32xf32> to vector<2x1x32xf32>
    tpu.vector_store %arg17[%c0_142, %c14_143, %c0_144], %652 {strides = array<i32>} : memref<2x16x64xf32, #tpu.memory_space<vmem>>, vector<2x1x32xf32>,
    %653 = vector.extract_strided_slice %648 {offsets = [0, 32], sizes = [2, 32], strides = [1, 1]} : vector<2x64xf32> to vector<2x32xf32>
    %c0_145 = arith.constant 0 : index
    %c1_146 = arith.constant 1 : index
    %c32_147 = arith.constant 32 : index
    %654 = vector.load %arg17[%c0_145, %c1_146, %c32_147] : memref<2x16x64xf32, #tpu.memory_space<vmem>>, vector<2x1x32xf32>
    %655 = vector.shape_cast %654 : vector<2x1x32xf32> to vector<2x32xf32>
    %656 = vector.shape_cast %653 : vector<2x32xf32> to vector<2x1x32xf32>
    tpu.vector_store %arg17[%c0_145, %c1_146, %c32_147], %656 {strides = array<i32>} : memref<2x16x64xf32, #tpu.memory_space<vmem>>, vector<2x1x32xf32>,
    %657 = vector.extract_strided_slice %31 {offsets = [15, 0, 0], sizes = [1, 2, 192], strides = [1, 1, 1]} : vector<16x2x192xf32> to vector<1x2x192xf32>
    %658 = vector.shape_cast %657 : vector<1x2x192xf32> to vector<2x192xf32>
    %659 = vector.broadcast %34 : vector<1x192xf32> to vector<2x192xf32>
    %660 = arith.mulf %658, %659 : vector<2x192xf32>
    %661 = vector.extract_strided_slice %31 {offsets = [0, 0, 0], sizes = [1, 2, 192], strides = [1, 1, 1]} : vector<16x2x192xf32> to vector<1x2x192xf32>
    %662 = vector.shape_cast %661 : vector<1x2x192xf32> to vector<2x192xf32>
    %663 = vector.broadcast %32 : vector<1x192xf32> to vector<2x192xf32>
    %664 = arith.mulf %662, %663 : vector<2x192xf32>
    %665 = arith.addf %660, %664 : vector<2x192xf32>
    %666 = arith.truncf %648 : vector<2x64xf32> to vector<2x64xbf16>
    %cst_148 = arith.constant dense<0.000000e+00> : vector<2x192xf32>
    %667 = tpu.matmul %666, %35, %cst_148 {dimension_numbers = #tpu.dot_dimension_numbers<[1], [0], [0], [1], [0, 0, 1, 1], [], []>} : vector<2x64xbf16>, vector<64x192xbf16>, vector<2x192xf32> -> vector<2x192xf32>
    %668 = vector.extract_strided_slice %665 {offsets = [0, 0], sizes = [2, 128], strides = [1, 1]} : vector<2x192xf32> to vector<2x128xf32>
    %669 = vector.extract_strided_slice %667 {offsets = [0, 0], sizes = [2, 128], strides = [1, 1]} : vector<2x192xf32> to vector<2x128xf32>
    %670 = arith.addf %668, %669 : vector<2x128xf32>
    %671 = arith.negf %670 : vector<2x128xf32>
    %672 = math.exp %671 : vector<2x128xf32>
    %cst_149 = arith.constant 1.000000e+00 : f32
    %673 = vector.broadcast %cst_149 : f32 to vector<2x128xf32>
    %674 = arith.addf %673, %672 : vector<2x128xf32>
    %675 = arith.divf %673, %674 : vector<2x128xf32>
    %676 = vector.extract_strided_slice %675 {offsets = [0, 0], sizes = [2, 64], strides = [1, 1]} : vector<2x128xf32> to vector<2x64xf32>
    %677 = vector.extract_strided_slice %675 {offsets = [0, 64], sizes = [2, 64], strides = [1, 1]} : vector<2x128xf32> to vector<2x64xf32>
    %678 = vector.extract_strided_slice %665 {offsets = [0, 128], sizes = [2, 64], strides = [1, 1]} : vector<2x192xf32> to vector<2x64xf32>
    %679 = vector.extract_strided_slice %667 {offsets = [0, 128], sizes = [2, 64], strides = [1, 1]} : vector<2x192xf32> to vector<2x64xf32>
    %680 = vector.broadcast %36 : vector<1x64xf32> to vector<2x64xf32>
    %681 = arith.addf %679, %680 : vector<2x64xf32>
    %682 = arith.mulf %676, %681 : vector<2x64xf32>
    %683 = arith.addf %678, %682 : vector<2x64xf32>
    %684 = math.tanh %683 : vector<2x64xf32>
    %cst_150 = arith.constant 1.000000e+00 : f32
    %685 = vector.broadcast %cst_150 : f32 to vector<2x64xf32>
    %686 = arith.subf %685, %677 : vector<2x64xf32>
    %687 = arith.mulf %686, %684 : vector<2x64xf32>
    %688 = arith.mulf %677, %648 : vector<2x64xf32>
    %689 = arith.addf %687, %688 : vector<2x64xf32>
    %690 = vector.extract_strided_slice %689 {offsets = [0, 0], sizes = [2, 32], strides = [1, 1]} : vector<2x64xf32> to vector<2x32xf32>
    %c0_151 = arith.constant 0 : index
    %c15_152 = arith.constant 15 : index
    %c0_153 = arith.constant 0 : index
    %691 = vector.load %arg17[%c0_151, %c15_152, %c0_153] : memref<2x16x64xf32, #tpu.memory_space<vmem>>, vector<2x1x32xf32>
    %692 = vector.shape_cast %691 : vector<2x1x32xf32> to vector<2x32xf32>
    %693 = vector.shape_cast %690 : vector<2x32xf32> to vector<2x1x32xf32>
    tpu.vector_store %arg17[%c0_151, %c15_152, %c0_153], %693 {strides = array<i32>} : memref<2x16x64xf32, #tpu.memory_space<vmem>>, vector<2x1x32xf32>,
    %694 = vector.extract_strided_slice %689 {offsets = [0, 32], sizes = [2, 32], strides = [1, 1]} : vector<2x64xf32> to vector<2x32xf32>
    %c0_154 = arith.constant 0 : index
    %c0_155 = arith.constant 0 : index
    %c32_156 = arith.constant 32 : index
    %695 = vector.load %arg17[%c0_154, %c0_155, %c32_156] : memref<2x16x64xf32, #tpu.memory_space<vmem>>, vector<2x1x32xf32>
    %696 = vector.shape_cast %695 : vector<2x1x32xf32> to vector<2x32xf32>
    %697 = vector.shape_cast %694 : vector<2x32xf32> to vector<2x1x32xf32>
    tpu.vector_store %arg17[%c0_154, %c0_155, %c32_156], %697 {strides = array<i32>} : memref<2x16x64xf32, #tpu.memory_space<vmem>>, vector<2x1x32xf32>,
    %698 = vector.extract_strided_slice %689 {offsets = [0, 0], sizes = [2, 32], strides = [1, 1]} : vector<2x64xf32> to vector<2x32xf32>
    %699 = vector.extract_strided_slice %689 {offsets = [0, 32], sizes = [2, 32], strides = [1, 1]} : vector<2x64xf32> to vector<2x32xf32>
    %700 = vector.shape_cast %698 : vector<2x32xf32> to vector<1x2x32xf32>
    %701 = vector.shape_cast %699 : vector<2x32xf32> to vector<1x2x32xf32>
    %702 = tpu.concatenate %700, %701 in 0 : vector<1x2x32xf32>, vector<1x2x32xf32> -> vector<2x2x32xf32>
    %c0_157 = arith.constant 0 : index
    %c0_158 = arith.constant 0 : index
    %c0_159 = arith.constant 0 : index
    %703 = vector.load %arg16[%c0_157, %c0_158, %c0_159] : memref<2x2x32xf32, #tpu.memory_space<vmem>>, vector<2x2x32xf32>
    tpu.vector_store %arg16[%c0_157, %c0_158, %c0_159], %702 {strides = array<i32>} : memref<2x2x32xf32, #tpu.memory_space<vmem>>, vector<2x2x32xf32>,
    %c0_160 = arith.constant 0 : index
    %c0_161 = arith.constant 0 : index
    %c0_162 = arith.constant 0 : index
    %704 = vector.load %arg17[%c0_160, %c0_161, %c0_162] : memref<2x16x64xf32, #tpu.memory_space<vmem>>, vector<2x16x64xf32>
    %c0_163 = arith.constant 0 : index
    %c0_164 = arith.constant 0 : index
    %705 = vector.load %arg9[%c0_163, %c0_164] : memref<64x192xf32, #tpu.memory_space<vmem>>, vector<64x192xf32>
    "tpu.trace_start"() <{level = 10 : i32, message = "ble,ef->blf"}> : () -> ()
    %cst_165 = arith.constant dense<0.000000e+00> : vector<2x16x192xf32>
    %706 = tpu.matmul %704, %705, %cst_165 {dimension_numbers = #tpu.dot_dimension_numbers<[2], [0], [0, 1], [1], [0, 0, 0, 1, 1, 1], [], []>} : vector<2x16x64xf32>, vector<64x192xf32>, vector<2x16x192xf32> -> vector<2x16x192xf32>
    "tpu.trace_stop"() : () -> ()
    %c0_166 = arith.constant 0 : index
    %c0_167 = arith.constant 0 : index
    %707 = vector.load %arg10[%c0_166, %c0_167] : memref<1x192xf32, #tpu.memory_space<vmem>>, vector<1x192xf32>
    %708 = vector.shape_cast %707 : vector<1x192xf32> to vector<1x1x192xf32>
    %709 = vector.broadcast %708 : vector<1x1x192xf32> to vector<2x16x192xf32>
    %710 = arith.addf %706, %709 : vector<2x16x192xf32>
    %711 = vector.extract_strided_slice %710 {offsets = [0, 0, 0], sizes = [2, 16, 64], strides = [1, 1, 1]} : vector<2x16x192xf32> to vector<2x16x64xf32>
    %712 = vector.extract_strided_slice %710 {offsets = [0, 0, 64], sizes = [2, 16, 64], strides = [1, 1, 1]} : vector<2x16x192xf32> to vector<2x16x64xf32>
    %713 = vector.extract_strided_slice %710 {offsets = [0, 0, 128], sizes = [2, 16, 64], strides = [1, 1, 1]} : vector<2x16x192xf32> to vector<2x16x64xf32>
    "tpu.trace_start"() <{level = 10 : i32, message = "ble,bme->blm"}> : () -> ()
    %cst_168 = arith.constant dense<0.000000e+00> : vector<2x16x16xf32>
    %714 = tpu.matmul %711, %712, %cst_168 {dimension_numbers = #tpu.dot_dimension_numbers<[2], [2], [1], [1], [0, 0, 0, 1, 1, 1], [0], [0]>} : vector<2x16x64xf32>, vector<2x16x64xf32>, vector<2x16x16xf32> -> vector<2x16x16xf32>
    "tpu.trace_stop"() : () -> ()
    %cst_169 = arith.constant dense<0xFF800000> : vector<2x16xf32>
    %715 = vector.multi_reduction <maximumf>, %714, %cst_169 [2] : vector<2x16x16xf32> to vector<2x16xf32>
    %716 = vector.shape_cast %715 : vector<2x16xf32> to vector<2x16x1xf32>
    %717 = vector.broadcast %716 : vector<2x16x1xf32> to vector<2x16x16xf32>
    %718 = arith.subf %714, %717 : vector<2x16x16xf32>
    %719 = math.exp %718 : vector<2x16x16xf32>
    %cst_170 = arith.constant dense<0.000000e+00> : vector<2x16xf32>
    %720 = vector.multi_reduction <add>, %719, %cst_170 [2] : vector<2x16x16xf32> to vector<2x16xf32>
    %721 = vector.shape_cast %720 : vector<2x16xf32> to vector<2x16x1xf32>
    %722 = tpu.reciprocal %721 {approx = true} : vector<2x16x1xf32> -> vector<2x16x1xf32>
    %723 = vector.broadcast %722 : vector<2x16x1xf32> to vector<2x16x16xf32>
    %724 = arith.mulf %719, %723 : vector<2x16x16xf32>
    "tpu.trace_start"() <{level = 10 : i32, message = "blm,bme->ble"}> : () -> ()
    %cst_171 = arith.constant dense<0.000000e+00> : vector<2x16x64xf32>
    %725 = tpu.matmul %724, %713, %cst_171 {dimension_numbers = #tpu.dot_dimension_numbers<[2], [1], [1], [2], [0, 0, 0, 1, 1, 2], [0], [0]>} : vector<2x16x16xf32>, vector<2x16x64xf32>, vector<2x16x64xf32> -> vector<2x16x64xf32>
    "tpu.trace_stop"() : () -> ()
    %c0_172 = arith.constant 0 : index
    %c0_173 = arith.constant 0 : index
    %726 = vector.load %arg11[%c0_172, %c0_173] : memref<64x12xf32, #tpu.memory_space<vmem>>, vector<64x12xf32>
    "tpu.trace_start"() <{level = 10 : i32, message = "ble,ek->blk"}> : () -> ()
    %cst_174 = arith.constant dense<0.000000e+00> : vector<2x16x12xf32>
    %727 = tpu.matmul %725, %726, %cst_174 {dimension_numbers = #tpu.dot_dimension_numbers<[2], [0], [0, 1], [1], [0, 0, 0, 1, 1, 1], [], []>} : vector<2x16x64xf32>, vector<64x12xf32>, vector<2x16x12xf32> -> vector<2x16x12xf32>
    "tpu.trace_stop"() : () -> ()
    %c0_175 = arith.constant 0 : index
    %c0_176 = arith.constant 0 : index
    %728 = vector.load %arg12[%c0_175, %c0_176] : memref<1x12xf32, #tpu.memory_space<vmem>>, vector<1x12xf32>
    %729 = vector.shape_cast %728 : vector<1x12xf32> to vector<1x1x12xf32>
    %730 = vector.broadcast %729 : vector<1x1x12xf32> to vector<2x16x12xf32>
    %731 = arith.addf %727, %730 : vector<2x16x12xf32>
    %c0_177 = arith.constant 0 : index
    %c0_178 = arith.constant 0 : index
    %732 = vector.load %arg13[%c0_177, %c0_178] : memref<7x48xf32, #tpu.memory_space<vmem>>, vector<7x48xf32>
    %c0_179 = arith.constant 0 : index
    %c0_180 = arith.constant 0 : index
    %733 = vector.load %arg14[%c0_179, %c0_180] : memref<4x7xf32, #tpu.memory_space<vmem>>, vector<4x7xf32>
    %734 = vector.extract_strided_slice %731 {offsets = [0, 0, 0], sizes = [1, 16, 4], strides = [1, 1, 1]} : vector<2x16x12xf32> to vector<1x16x4xf32>
    %735 = vector.shape_cast %734 : vector<1x16x4xf32> to vector<16x4xf32>
    %736 = vector.extract_strided_slice %731 {offsets = [0, 0, 4], sizes = [1, 16, 4], strides = [1, 1, 1]} : vector<2x16x12xf32> to vector<1x16x4xf32>
    %737 = vector.shape_cast %736 : vector<1x16x4xf32> to vector<16x4xf32>
    %738 = vector.extract_strided_slice %731 {offsets = [0, 0, 8], sizes = [1, 16, 4], strides = [1, 1, 1]} : vector<2x16x12xf32> to vector<1x16x4xf32>
    %739 = vector.shape_cast %738 : vector<1x16x4xf32> to vector<16x4xf32>
    %740 = tpu.concatenate %735, %737, %739 in 0 : vector<16x4xf32>, vector<16x4xf32>, vector<16x4xf32> -> vector<48x4xf32>
    "tpu.trace_start"() <{level = 10 : i32, message = "ko,mk->om"}> : () -> ()
    %cst_181 = arith.constant dense<0.000000e+00> : vector<4x7xf32>
    %741 = tpu.matmul %740, %732, %cst_181 {dimension_numbers = #tpu.dot_dimension_numbers<[0], [1], [1], [0], [0, 1, 1, 0], [], []>} : vector<48x4xf32>, vector<7x48xf32>, vector<4x7xf32> -> vector<4x7xf32>
    "tpu.trace_stop"() : () -> ()
    %742 = arith.addf %741, %733 : vector<4x7xf32>
    %743 = vector.extract_strided_slice %731 {offsets = [1, 0, 0], sizes = [1, 16, 4], strides = [1, 1, 1]} : vector<2x16x12xf32> to vector<1x16x4xf32>
    %744 = vector.shape_cast %743 : vector<1x16x4xf32> to vector<16x4xf32>
    %745 = vector.extract_strided_slice %731 {offsets = [1, 0, 4], sizes = [1, 16, 4], strides = [1, 1, 1]} : vector<2x16x12xf32> to vector<1x16x4xf32>
    %746 = vector.shape_cast %745 : vector<1x16x4xf32> to vector<16x4xf32>
    %747 = vector.extract_strided_slice %731 {offsets = [1, 0, 8], sizes = [1, 16, 4], strides = [1, 1, 1]} : vector<2x16x12xf32> to vector<1x16x4xf32>
    %748 = vector.shape_cast %747 : vector<1x16x4xf32> to vector<16x4xf32>
    %749 = tpu.concatenate %744, %746, %748 in 0 : vector<16x4xf32>, vector<16x4xf32>, vector<16x4xf32> -> vector<48x4xf32>
    "tpu.trace_start"() <{level = 10 : i32, message = "ko,mk->om"}> : () -> ()
    %cst_182 = arith.constant dense<0.000000e+00> : vector<4x7xf32>
    %750 = tpu.matmul %749, %732, %cst_182 {dimension_numbers = #tpu.dot_dimension_numbers<[0], [1], [1], [0], [0, 1, 1, 0], [], []>} : vector<48x4xf32>, vector<7x48xf32>, vector<4x7xf32> -> vector<4x7xf32>
    "tpu.trace_stop"() : () -> ()
    %751 = arith.addf %750, %733 : vector<4x7xf32>
    %752 = vector.shape_cast %742 : vector<4x7xf32> to vector<1x4x7xf32>
    %753 = vector.shape_cast %751 : vector<4x7xf32> to vector<1x4x7xf32>
    %754 = tpu.concatenate %752, %753 in 0 : vector<1x4x7xf32>, vector<1x4x7xf32> -> vector<2x4x7xf32>
    %c0_183 = arith.constant 0 : index
    %c0_184 = arith.constant 0 : index
    %c0_185 = arith.constant 0 : index
    %755 = vector.load %arg15[%c0_183, %c0_184, %c0_185] : memref<2x4x7xf32, #tpu.memory_space<vmem>>, vector<2x4x7xf32>
    tpu.vector_store %arg15[%c0_183, %c0_184, %c0_185], %754 {strides = array<i32>} : memref<2x4x7xf32, #tpu.memory_space<vmem>>, vector<2x4x7xf32>,
    return
  }
}

</mosaic_0001>

<bundles_post_ra>
// kernel: unet_block_in_forward.1
= control target key start
LH: loop header
LB: loop body
LE: loop exit
PB: predicated region body
PF: predicated region fallthrough
CT: control target
= control target key end

     0   :  { %s4883_s0 = inlined_call_operand.vmem [shape: f32[16,2,4], index: 0, kind: input, shape index: {}]   ;;  %s4884_s1 = inlined_call_operand.vmem [shape: f32[2,2,32], index: 1, kind: input, shape index: {}]   ;;  %s4885_s2 = inlined_call_operand.vmem [shape: f32[1,4], index: 2, kind: input, shape index: {}]   ;;  %s4886_s3 = inlined_call_operand.vmem [shape: f32[1,4], index: 3, kind: input, shape index: {}]   ;;  %s4887_s4 = inlined_call_operand.vmem [shape: f32[4,192], index: 4, kind: input, shape index: {}]   ;;  %s4888_s5 = inlined_call_operand.vmem [shape: f32[1,192], index: 5, kind: input, shape index: {}]   ;;  %s4889_s6 = inlined_call_operand.vmem [shape: f32[1,192], index: 6, kind: input, shape index: {}]   ;;  %s4890_s7 = inlined_call_operand.hbm [shape: bf16[64,192], index: 7, kind: input, shape index: {}]   ;;  %s4891_s8 = inlined_call_operand.vmem [shape: f32[1,64], index: 8, kind: input, shape index: {}]   ;;  %s4892_s9 = inlined_call_operand.vmem [shape: f32[64,192], index: 9, kind: input, shape index: {}]   ;;  %s4893_s10 = inlined_call_operand.vmem [shape: f32[1,192], index: 10, kind: input, shape index: {}]   ;;  %s4894_s11 = inlined_call_operand.vmem [shape: f32[64,12], index: 11, kind: input, shape index: {}]   ;;  %s4895_s12 = inlined_call_operand.vmem [shape: f32[1,12], index: 12, kind: input, shape index: {}]   ;;  %s4896_s13 = inlined_call_operand.vmem [shape: f32[7,48], index: 13, kind: input, shape index: {}]   ;;  %s4897_s14 = inlined_call_operand.vmem [shape: f32[4,7], index: 14, kind: input, shape index: {}]   ;;  %s4898_s15 = inlined_call_operand.hbm [shape: f32[2,4,7], index: 15, kind: output, shape index: {0}]   ;;  %s4899_s16 = inlined_call_operand.hbm [shape: f32[2,2,32], index: 16, kind: output, shape index: {1}]  }
   0x1   :  { %4901 = sst [smem:[#allocation12_spill]] %s4883_s0 }
   0x2   :  { %22 = vsyncpa [#allocation4], 0 }
   0x3   :  { %23 = vsyncpa [#allocation5], 0 }
   0x4   :  { %24 = vsyncpa [#allocation8], 0  ;;  %s3676_s21 = smov [#allocation3]   ;;  %s3604_s25 = scalar_lea.hbm %s4890_s7, 1024 }
   0x5   :  { %s44_s22 = sshll.u32 %s3676_s21, 4  ;;  %p3605_p0 = scmp.ne.s32.totalorder %s4890_s7, %s3604_s25  ;;  %s45_s22 = int_to_ptr.vmem [resolvable:$true] %s44_s22 }
   0x6   :  { %p3608_p1 = scmp.lt.u32.totalorder %s3604_s25, %s4890_s7 }
   0x8   :  { %p3610_p2 = pnand %p3608_p1, %p3605_p0 }
   0xa   :  { %3613 = shalt.err (!%p3610_p2)
}
   0xb   :  { %s3614_s30 = scalar_lea.vmem %s45_s22, 1024  ;;  %p3619_p4 = scmp.lt.s32.totalorder %s45_s22, %s45_s22 }
   0xc   :  { %p3615_p3 = scmp.ne.s32.totalorder %s45_s22, %s3614_s30  ;;  %p3620_p5 = scmp.lt.s32.totalorder %s3614_s30, %s3614_s30 }
   0xe   :  { %p3621_p6 = por %p3620_p5, %p3619_p4 }
  0x10   :  { %p3622_p7 = pnand %p3621_p6, %p3615_p3 }
  0x12   :  { %3625 = shalt.err (!%p3622_p7)
}
  0x13   :  { %s3677_s0 = smov 128   ;;  %s3678_s17 = smov 8  }
  0x14   :  { %50 = dma.hbm_to_vmem [thread:$0]  %s4890_s7, 1024, %s45_s22, [#allocation4], %s3677_s0, %s3677_s0, %s3678_s17  }
  0x15   :  { %3670 = dma.done.wait [#allocation4], 1024  }
  0x16   :  { %3671 = vsyncadd [#allocation4], 4294966272  ;;  %v3679_v0 = vmov 0.0   ;;  %v3230_v1 = vld [vmem:[%s4884_s1 + $0x2] sm:$0x3]  ;;  %vm385_vm0 = vcmask 1043456  }
  0x17   :  { %454 = vmatprep.mubr.f32.mxu0 %v3679_v0  ;;  %v259_v2 = vld [vmem:[%s4887_s4] sm:$0xff]  ;;  %s3680_s25 = smov 32   ;;  %vm85_vm1 = vcmask 25600   ;;  %s4902_s26 = sld [smem:[#allocation12_spill]]  ;;  %v3857_v24 = vld [vmem:[#allocation3 + $0x14] ss:$8 sps:$4 sm:$0xff]  }
  0x18   :  { %590 = vrot.lane.b32.xlu0 %v3230_v1, %s3680_s25  ;;  %v363_v3 = vcombine.high %v259_v2, %v259_v2  ;;  %v3836_v16 = vld [vmem:[#allocation3 + $0x4] ss:$8 sps:$4 sm:$0xff]   ;;  %v3845_v19 = vld [vmem:[#allocation3] ss:$8 sps:$4 sm:$0xff]   ;;  %v3861_v26 = vld [vmem:[#allocation3 + $0x10] ss:$8 sps:$4 sm:$0xff]  }
  0x19   :  { %679 = vmatprep.subr.bf16.mxu1 %v3836_v16  ;;  %v3877_v32 = vld [vmem:[#allocation3 + $0x24] ss:$8 sps:$4 sm:$0xff]   ;;  %v3879_v33 = vld [vmem:[#allocation3 + $0x20] ss:$8 sps:$4 sm:$0xff]   ;;  %v3883_v35 = vld [vmem:[#allocation3 + $0x34] ss:$8 sps:$4 sm:$0xff]  }
  0x1a   :  { %3224 = vmatprep.subr.msk.mxu0 %vm385_vm0, %v363_v3  ;;  %680 = vmatpush1.bf16.msra.mxu1 %v3845_v19  ;;  %v3681_v36 = vmov 0   ;;  %v3895_v40 = vld [vmem:[#allocation3 + $0x30] ss:$8 sps:$4 sm:$0xff]   ;;  %vm593_vm2 = vcmask 261120   ;;  %vm675_vm3 = vcmask 523264   ;;  %vm376_vm4 = vcmask 31744  }
  0x1b   :  { %3225 = vmatpush1.msk.msra.mxu0 %vm385_vm0, %v259_v2  ;;  %681 = vmatprep.subr.bf16.mxu1 %v3857_v24  ;;  %vm782_vm5 = vcmask 253952   ;;  %vm785_vm6 = vcmask 516352   ;;  %vm3406_vm7 = vmpackc.low %vm675_vm3, %vm675_vm3  ;;  %vm2624_vm8 = vcmask 130048   ;;  %s3686_s27 = smov 120   ;;  %vm2991_vm9 = vcmask 392192   ;;  %s3689_s29 = smov [#allocation7]  }
  0x1c   :  { %798 = vmatprep.subr.bf16.mxu0 %v3836_v16  ;;  %711 = vmatprep.mubr.bf16.mxu1 %v3681_v36  ;;  %vm3687_vm10 = vmmov 0   ;;  %vm2310_vm11 = vcmask 254976  }
  0x1d   :  { %v3801_v4 = vld [vmem:[%s4902_s26] sm:$0x3]  ;;  %v3806_v5 = vld [vmem:[%s4902_s26 + $0x2] sm:$0x3]  ;;  %v3811_v6 = vld [vmem:[%s4902_s26 + $0x4] sm:$0x3] }
  0x1e   :  { %v3816_v7 = vld [vmem:[%s4902_s26 + $0x6] sm:$0x3]  ;;  %v86_v8 = vsel %vm85_vm1, %v3801_v4, 0.0  ;;  %v87_v9 = vsel %vm85_vm1, %v3806_v5, 0.0  ;;  %v89_v10 = vsel %vm85_vm1, %v3811_v6, 0.0  ;;  %682 = vmatpush1.bf16.msra.mxu1 %v3861_v26 }
  0x1f   :  { %v3827_v11 = vld [vmem:[%s4902_s26 + $0x8] sm:$0x3]  ;;  %v88_v12 = vadd.f32 %v87_v9, %v86_v8  ;;  %v91_v13 = vsel %vm85_vm1, %v3816_v7, 0.0  ;;  %v3834_v14 = vld [vmem:[%s4902_s26 + $0xa] sm:$0x3]  ;;  %683 = vmatprep.subr.bf16.mxu1 %v3877_v32 }
  0x20   :  { %v3841_v17 = vld [vmem:[%s4902_s26 + $0xc] sm:$0x3]  ;;  %v93_v18 = vsel %vm85_vm1, %v3827_v11, 0.0  ;;  %v95_v21 = vsel %vm85_vm1, %v3834_v14, 0.0  ;;  %v3855_v22 = vld [vmem:[%s4902_s26 + $0xe] sm:$0x3] }
  0x21   :  { %v90_v15 = vadd.f32 %v89_v10, %v88_v12  ;;  %v97_v25 = vsel %vm85_vm1, %v3841_v17, 0.0  ;;  %v3866_v27 = vld [vmem:[%s4902_s26 + $0x10] sm:$0x3]  ;;  %v3872_v29 = vld [vmem:[%s4902_s26 + $0x12] sm:$0x3]  ;;  %v99_v30 = vsel %vm85_vm1, %v3855_v22, 0.0 }
  0x22   :  { %v101_v34 = vsel %vm85_vm1, %v3866_v27, 0.0  ;;  %v3889_v37 = vld [vmem:[%s4902_s26 + $0x14] sm:$0x3]  ;;  %v103_v39 = vsel %vm85_vm1, %v3872_v29, 0.0  ;;  %684 = vmatpush1.bf16.msra.mxu1 %v3879_v33  ;;  %v80_v41 = vld [vmem:[%s4902_s26 + $0x16] sm:$0x3] }
  0x23   :  { %v92_v20 = vadd.f32 %v91_v13, %v90_v15  ;;  %685 = vmatprep.subr.bf16.mxu1 %v3883_v35  ;;  %v105_v43 = vsel %vm85_vm1, %v3889_v37, 0.0  ;;  %v81_v44 = vld [vmem:[%s4902_s26 + $0x18] sm:$0x3]  ;;  %v107_v46 = vsel %vm85_vm1, %v80_v41, 0.0  ;;  %v82_v47 = vld [vmem:[%s4902_s26 + $0x1a] sm:$0x3] }
  0x24   :  { %v109_v49 = vsel %vm85_vm1, %v81_v44, 0.0  ;;  %v83_v50 = vld [vmem:[%s4902_s26 + $0x1c] sm:$0x3]  ;;  %v111_v52 = vsel %vm85_vm1, %v82_v47, 0.0  ;;  %v84_v53 = vld [vmem:[%s4902_s26 + $0x1e] sm:$0x3] }
  0x25   :  { %v94_v23 = vadd.f32 %v93_v18, %v92_v20  ;;  %v113_v55 = vsel %vm85_vm1, %v83_v50, 0.0  ;;  %v115_v57 = vsel %vm85_vm1, %v84_v53, 0.0  ;;  %s3685_s26 = smov 124  }
  0x26   :  { %686 = vmatpush1.bf16.msra.mxu1 %v3895_v40 }
  0x27   :  { %v96_v28 = vadd.f32 %v95_v21, %v94_v23  ;;  %898 = vmatprep.subr.bf16.mxu1 %v3836_v16 }
  0x29   :  { %v98_v31 = vadd.f32 %v97_v25, %v96_v28 }
  0x2b   :  { %v100_v38 = vadd.f32 %v99_v30, %v98_v31 }
  0x2d   :  { %v102_v42 = vadd.f32 %v101_v34, %v100_v38 }
  0x2f   :  { %v104_v45 = vadd.f32 %v103_v39, %v102_v42 }
  0x31   :  { %v106_v48 = vadd.f32 %v105_v43, %v104_v45 }
  0x33   :  { %v108_v51 = vadd.f32 %v107_v46, %v106_v48 }
  0x35   :  { %v110_v54 = vadd.f32 %v109_v49, %v108_v51 }
  0x37   :  { %v112_v56 = vadd.f32 %v111_v52, %v110_v54 }
  0x39   :  { %v114_v58 = vadd.f32 %v113_v55, %v112_v56 }
  0x3b   :  { %v116_v59 = vadd.f32 %v115_v57, %v114_v58 }
  0x3d   :  { %v117_v60 = vrot.slane %v116_v59, 4 }
  0x3f   :  { %v118_v61 = vadd.f32 %v117_v60, %v116_v59 }
  0x41   :  { %v119_v62 = vrot.slane %v118_v61, 2 }
  0x43   :  { %v120_v63 = vadd.f32 %v119_v62, %v118_v61 }
  0x45   :  { %v121_v1 = vrot.slane %v120_v63, 1 }
  0x47   :  { %v122_v2 = vadd.f32 %v121_v1, %v120_v63 }
  0x49   :  { %v123_v3 = vmul.f32 0.03125, %v122_v2 }
  0x4b   :  { %v3923_v8 = vsub.f32 %v3801_v4, %v123_v3  ;;  %v3926_v9 = vsub.f32 %v3806_v5, %v123_v3  ;;  %v3929_v10 = vsub.f32 %v3811_v6, %v123_v3  ;;  %v3932_v12 = vsub.f32 %v3816_v7, %v123_v3 }
  0x4c   :  { %v3935_v13 = vsub.f32 %v3827_v11, %v123_v3  ;;  %v3944_v5 = vsub.f32 %v3834_v14, %v123_v3  ;;  %v3949_v7 = vsub.f32 %v3841_v17, %v123_v3  ;;  %v3957_v28 = vsub.f32 %v3855_v22, %v123_v3 }
  0x4d   :  { %v140_v15 = vmul.f32 %v3923_v8, %v3923_v8  ;;  %v141_v18 = vmul.f32 %v3926_v9, %v3926_v9  ;;  %v142_v4 = vmul.f32 %v3929_v10, %v3929_v10  ;;  %v143_v6 = vmul.f32 %v3932_v12, %v3932_v12 }
  0x4e   :  { %v144_v11 = vmul.f32 %v3935_v13, %v3935_v13  ;;  %v145_v14 = vmul.f32 %v3944_v5, %v3944_v5  ;;  %v3963_v31 = vsub.f32 %v3866_v27, %v123_v3  ;;  %v146_v34 = vmul.f32 %v3949_v7, %v3949_v7 }
  0x4f   :  { %v156_v20 = vsel %vm85_vm1, %v140_v15, 0.0  ;;  %v157_v21 = vsel %vm85_vm1, %v141_v18, 0.0  ;;  %v159_v23 = vsel %vm85_vm1, %v142_v4, 0.0  ;;  %v161_v30 = vsel %vm85_vm1, %v143_v6, 0.0 }
  0x50   :  { %v158_v25 = vadd.f32 %v157_v21, %v156_v20  ;;  %v163_v38 = vsel %vm85_vm1, %v144_v11, 0.0  ;;  %v3969_v42 = vsub.f32 %v3872_v29, %v123_v3  ;;  %v147_v22 = vmul.f32 %v3957_v28, %v3957_v28 }
  0x51   :  { %v165_v43 = vsel %vm85_vm1, %v145_v14, 0.0  ;;  %v3975_v46 = vsub.f32 %v3889_v37, %v123_v3  ;;  %v148_v27 = vmul.f32 %v3963_v31, %v3963_v31  ;;  %v167_v48 = vsel %vm85_vm1, %v146_v34, 0.0 }
  0x52   :  { %v160_v17 = vadd.f32 %v159_v23, %v158_v25  ;;  %v3980_v51 = vsub.f32 %v80_v41, %v123_v3  ;;  %v149_v29 = vmul.f32 %v3969_v42, %v3969_v42  ;;  %v169_v52 = vsel %vm85_vm1, %v147_v22, 0.0 }
  0x53   :  { %v3985_v55 = vsub.f32 %v81_v44, %v123_v3  ;;  %v150_v37 = vmul.f32 %v3975_v46, %v3975_v46  ;;  %v171_v56 = vsel %vm85_vm1, %v148_v27, 0.0  ;;  %v3990_v58 = vsub.f32 %v82_v47, %v123_v3 }
  0x54   :  { %v162_v39 = vadd.f32 %v161_v30, %v160_v17  ;;  %v151_v41 = vmul.f32 %v3980_v51, %v3980_v51  ;;  %v173_v59 = vsel %vm85_vm1, %v149_v29, 0.0  ;;  %v3995_v61 = vsub.f32 %v83_v50, %v123_v3 }
  0x55   :  { %v152_v44 = vmul.f32 %v3985_v55, %v3985_v55  ;;  %v175_v62 = vsel %vm85_vm1, %v150_v37, 0.0  ;;  %v4000_v1 = vsub.f32 %v84_v53, %v123_v3  ;;  %v153_v47 = vmul.f32 %v3990_v58, %v3990_v58 }
  0x56   :  { %v164_v45 = vadd.f32 %v163_v38, %v162_v39  ;;  %v177_v2 = vsel %vm85_vm1, %v151_v41, 0.0  ;;  %v154_v18 = vmul.f32 %v3995_v61, %v3995_v61  ;;  %v3682_v27 = vmov 1983009808  }
  0x57   :  { %v179_v50 = vsel %vm85_vm1, %v152_v44, 0.0  ;;  %v155_v6 = vmul.f32 %v4000_v1, %v4000_v1  ;;  %v181_v11 = vsel %vm85_vm1, %v153_v47, 0.0  ;;  %v4036_v47 = vld [vmem:[%s4886_s3] ss:$0 sm:$0xff] }
  0x58   :  { %v166_v49 = vadd.f32 %v165_v43, %v164_v45  ;;  %v183_v53 = vsel %vm85_vm1, %v154_v18, 0.0  ;;  %v199_v45 = vlaneseq }
  0x59   :  { %v185_v21 = vsel %vm85_vm1, %v155_v6, 0.0 }
  0x5a   :  { %v168_v54 = vadd.f32 %v167_v48, %v166_v49  ;;  %v272_v48 = vunpack.c.l.s4 %v3682_v27  ;;  %v4013_v49 = vshrl.u32 %v199_v45, 7 }
  0x5c   :  { %v170_v57 = vadd.f32 %v169_v52, %v168_v54  ;;  %v273_v29 = vunpack.c.0.s8 %v272_v48  ;;  %v586_v52 = vld [vmem:[%s4884_s1] sm:$0x3]  ;;  %v4022_v37 = vsub.s32 0, %v4013_v49  ;;  %s3683_s1 = smov 64  }
  0x5d   :  { %v194_v54 = vld [vmem:[%s4885_s2] sm:$0x1] }
  0x5e   :  { %v172_v60 = vadd.f32 %v171_v56, %v170_v57  ;;  %v4025_v56 = vsub.s32 %v273_v29, %v4013_v49 }
  0x60   :  { %v174_v63 = vadd.f32 %v173_v59, %v172_v60 }
  0x62   :  { %v176_v15 = vadd.f32 %v175_v62, %v174_v63 }
  0x64   :  { %v178_v4 = vadd.f32 %v177_v2, %v176_v15 }
  0x66   :  { %v180_v20 = vadd.f32 %v179_v50, %v178_v4 }
  0x68   :  { %v182_v3 = vadd.f32 %v181_v11, %v180_v20 }
  0x6a   :  { %v184_v23 = vadd.f32 %v183_v53, %v182_v3 }
  0x6c   :  { %v186_v25 = vadd.f32 %v185_v21, %v184_v23 }
  0x6e   :  { %v187_v14 = vrot.slane %v186_v25, 4 }
  0x70   :  { %v188_v30 = vadd.f32 %v187_v14, %v186_v25 }
  0x72   :  { %v189_v17 = vrot.slane %v188_v30, 2 }
  0x74   :  { %v190_v34 = vadd.f32 %v189_v17, %v188_v30 }
  0x76   :  { %v191_v38 = vrot.slane %v190_v34, 1 }
  0x78   :  { %v192_v39 = vadd.f32 %v191_v38, %v190_v34 }
  0x7a   :  { %v193_v22 = vmul.f32 0.03125, %v192_v39 }
  0x7c   :  { %v195_v43 = vadd.f32 1e-05, %v193_v22 }
  0x7e   :  { %3481 = vrsqrt.f32 %v195_v43 }
  0x88   :  { %v3482_v41 = vpop.eup %3481 }
  0x89   :  { %v197_v60 = vmul.f32 %v3482_v41, %v194_v54 }
  0x8a   :  { %v591_v57 = vpop.permute.xlu0 %590 }
  0x8b   :  { %v594_v59 = vsel %vm593_vm2, %v586_v52, %v591_v57  ;;  %v4029_v63 = vrot.slane %v197_v60, %v4022_v37 }
  0x8c   :  { %v634_v44 = vpack.c.bf16 %v594_v59, %v594_v59  ;;  %v753_v62 = vrot.slane %v594_v59, %v4025_v56 }
  0x8d   :  { %v204_v2 = vmul.f32 %v4029_v63, %v3923_v8  ;;  %v205_v15 = vmul.f32 %v4029_v63, %v3926_v9  ;;  %v206_v18 = vmul.f32 %v4029_v63, %v3929_v10  ;;  %v207_v50 = vmul.f32 %v4029_v63, %v3932_v12 }
  0x8e   :  { %3239 = vmatmul.mubr.msk.bf16.vlgmr.msra.gmra.mrb[0].mxu1 %vm675_vm3, %v634_v44  ;;  %754 = vrot.lane.b32.xlu1 %v753_v62, %s3683_s1  ;;  %v208_v4 = vmul.f32 %v4029_v63, %v3935_v13  ;;  %v209_v6 = vmul.f32 %v4029_v63, %v3944_v5  ;;  %v210_v8 = vmul.f32 %v4029_v63, %v3949_v7 }
  0x8f   :  { %899 = vmatpush1.bf16.msra.mxu1 %v3845_v19  ;;  %930 = vmatprep.mubr.bf16.mxu1 %v3681_v36  ;;  %v211_v9 = vmul.f32 %v4029_v63, %v3957_v28  ;;  %v227_v10 = vadd.f32 %v4036_v47, %v204_v2  ;;  %v228_v11 = vadd.f32 %v4036_v47, %v205_v15 }
  0x90   :  { %900 = vmatprep.subr.bf16.mxu1 %v3857_v24  ;;  %v229_v12 = vadd.f32 %v4036_v47, %v206_v18  ;;  %v230_v20 = vadd.f32 %v4036_v47, %v207_v50  ;;  %v231_v53 = vadd.f32 %v4036_v47, %v208_v4  ;;  %v232_v13 = vadd.f32 %v4036_v47, %v209_v6 }
  0x91   :  { %v233_v5 = vadd.f32 %v4036_v47, %v210_v8  ;;  %v234_v3 = vadd.f32 %v4036_v47, %v211_v9  ;;  %v243_v7 = vmax.f32 %v227_v10, 0.0  ;;  %v244_v28 = vmax.f32 %v228_v11, 0.0 }
  0x92   :  { %v245_v21 = vmax.f32 %v229_v12, 0.0  ;;  %v246_v23 = vmax.f32 %v230_v20, 0.0  ;;  %v247_v25 = vmax.f32 %v231_v53, 0.0  ;;  %v248_v14 = vmax.f32 %v232_v13, 0.0 }
  0x93   :  { %901 = vmatpush1.bf16.msra.mxu1 %v3861_v26  ;;  %v249_v30 = vmax.f32 %v233_v5, 0.0  ;;  %v250_v17 = vmax.f32 %v234_v3, 0.0  ;;  %v294_v34 = vcombine.low %v243_v7, %v244_v28  ;;  %v212_v39 = vmul.f32 %v4029_v63, %v3963_v31 }
  0x94   :  { %902 = vmatprep.subr.bf16.mxu1 %v3877_v32  ;;  %v295_v38 = vcombine.low %v245_v21, %v246_v23  ;;  %v213_v22 = vmul.f32 %v4029_v63, %v3969_v42  ;;  %v311_v43 = vcombine.low %v247_v25, %v248_v14  ;;  %v214_v27 = vmul.f32 %v4029_v63, %v3975_v46  ;;  %v260_v21 = vld [vmem:[%s4888_s5] sm:$0x3] }
  0x95   :  { %v312_v45 = vcombine.low %v249_v30, %v250_v17  ;;  %v215_v48 = vmul.f32 %v4029_v63, %v3980_v51  ;;  %v302_v29 = vrot.slane %v294_v34, %v4025_v56  ;;  %v235_v54 = vadd.f32 %v4036_v47, %v212_v39 }
  0x96   :  { %v309_v52 = vrot.slane %v295_v38, %v4025_v56  ;;  %v236_v31 = vadd.f32 %v4036_v47, %v213_v22  ;;  %v319_v42 = vrot.slane %v311_v43, %v4025_v56  ;;  %v237_v46 = vadd.f32 %v4036_v47, %v214_v27  ;;  %v575_v43 = vld [vmem:[%s4889_s6] sm:$0x3] }
  0x97   :  { %903 = vmatpush1.bf16.msra.mxu1 %v3879_v33  ;;  %v326_v57 = vrot.slane %v312_v45, %v4025_v56  ;;  %v238_v51 = vadd.f32 %v4036_v47, %v215_v48  ;;  %v251_v59 = vmax.f32 %v235_v54, 0.0  ;;  %v216_v44 = vmul.f32 %v4029_v63, %v3985_v55 }
  0x98   :  { %904 = vmatprep.subr.bf16.mxu1 %v3883_v35  ;;  %v310_v41 = vcombine.low %v302_v29, %v309_v52  ;;  %v252_v60 = vmax.f32 %v236_v31, 0.0  ;;  %v253_v2 = vmax.f32 %v237_v46, 0.0  ;;  %v217_v18 = vmul.f32 %v4029_v63, %v3990_v58 }
  0x99   :  { %v327_v62 = vcombine.low %v319_v42, %v326_v57  ;;  %v254_v15 = vmax.f32 %v238_v51, 0.0  ;;  %v218_v4 = vmul.f32 %v4029_v63, %v3995_v61  ;;  %v219_v6 = vmul.f32 %v4029_v63, %v4000_v1 }
  0x9a   :  { %3226 = vmatmul.mubr.msk.f32.vlgmr.msra.gmra.mrb[0].mxu0 %vm376_vm4, %v310_v41  ;;  %v328_v50 = vcombine.low %v251_v59, %v252_v60  ;;  %v239_v8 = vadd.f32 %v4036_v47, %v216_v44  ;;  %v240_v9 = vadd.f32 %v4036_v47, %v217_v18  ;;  %v4120_v28 = vsub.s32 1, %v4013_v49 }
  0x9b   :  { %905 = vmatpush1.bf16.msra.mxu1 %v3895_v40  ;;  %460 = vmatprep.mubr.f32.mxu0 %v3679_v0  ;;  %v329_v55 = vcombine.low %v253_v2, %v254_v15  ;;  %v241_v10 = vadd.f32 %v4036_v47, %v218_v4  ;;  %v242_v11 = vadd.f32 %v4036_v47, %v219_v6  ;;  %v576_v27 = vsub.f32 1.0, %v575_v43 }
  0x9c   :  { %799 = vmatpush1.bf16.msra.mxu0 %v3845_v19  ;;  %v336_v58 = vrot.slane %v328_v50, %v4025_v56  ;;  %v255_v12 = vmax.f32 %v239_v8, 0.0  ;;  %1098 = vmatprep.subr.bf16.mxu1 %v3836_v16  ;;  %v256_v1 = vmax.f32 %v240_v9, 0.0  ;;  %v265_v23 = vrot.slane %v260_v21, %v4022_v37 }
  0x9d   :  { %800 = vmatprep.subr.bf16.mxu0 %v3857_v24  ;;  %v343_v61 = vrot.slane %v329_v55, %v4025_v56  ;;  %v257_v63 = vmax.f32 %v241_v10, 0.0  ;;  %v258_v20 = vmax.f32 %v242_v11, 0.0  ;;  %v269_v25 = vrot.slane %v260_v21, %v4120_v28 }
  0x9e   :  { %3227 = vmatmul.mubr.msk.f32.gmra.mrb[2].mxu0 %vm376_vm4, %v327_v62  ;;  %v345_v13 = vcombine.low %v255_v12, %v256_v1  ;;  %v599_v29 = vrot.slane %v576_v27, %v4022_v37  ;;  %v603_v52 = vrot.slane %v576_v27, %v4120_v28  ;;  %v618_v54 = vrot.slane %v575_v43, %v4022_v37 }
  0x9f   :  { %466 = vmatprep.mubr.f32.mxu0 %v3679_v0  ;;  %v344_v53 = vcombine.low %v336_v58, %v343_v61  ;;  %v346_v5 = vcombine.low %v257_v63, %v258_v20  ;;  %v270_v14 = vcombine.low %v265_v23, %v269_v25  ;;  %v622_v31 = vrot.slane %v575_v43, %v4120_v28 }
  0xa0   :  { %801 = vmatpush1.bf16.msra.mxu0 %v3861_v26  ;;  %v353_v47 = vrot.slane %v345_v13, %v4025_v56  ;;  %v604_v51 = vcombine.low %v599_v29, %v603_v52 }
  0xa1   :  { %802 = vmatprep.subr.bf16.mxu0 %v3877_v32  ;;  %v360_v3 = vrot.slane %v346_v5, %v4025_v56  ;;  %v277_v30 = vrot.slane %v270_v14, %v4025_v56  ;;  %v623_v41 = vcombine.low %v618_v54, %v622_v31 }
  0xa2   :  { %3228 = vmatmul.mubr.msk.f32.gmra.mrb[4].mxu0 %vm376_vm4, %v344_v53  ;;  %v4141_v15 = vrot.slane %v604_v51, %v4025_v56 }
  0xa3   :  { %472 = vmatprep.mubr.f32.mxu0 %v3679_v0  ;;  %v361_v7 = vcombine.low %v353_v47, %v360_v3  ;;  %v364_v38 = vcombine.low %v277_v30, %v277_v30  ;;  %v4144_v18 = vrot.slane %v623_v41, %v4025_v56 }
  0xa4   :  { %803 = vmatpush1.bf16.msra.mxu0 %v3879_v33 }
  0xa5   :  { %804 = vmatprep.subr.bf16.mxu0 %v3883_v35  ;;  %v371_v45 = vrot.slane %v364_v38, %v4025_v56 }
  0xa6   :  { %3229 = vmatmul.mubr.msk.f32.gmra.mrb[6].mxu0 %vm376_vm4, %v361_v7 }
  0xa7   :  { %830 = vmatprep.mubr.bf16.mxu0 %v3681_v36  ;;  %v372_v48 = vcombine.low %v371_v45, %v371_v45  ;;  %v373_v42 = vcombine.high %v371_v45, %v371_v45 }
  0xa8   :  { %805 = vmatpush1.bf16.msra.mxu0 %v3895_v40 }
  0xa9   :  { %998 = vmatprep.subr.bf16.mxu0 %v3836_v16 }
 0x161   :  { %v4128_v17 = vpop.f32.mrb[0].mxu1 }
 0x162   :  { %v4130_v34 = vpop.f32.mrb[1].mxu1 }
 0x163   :  { %v717_v39 = vpop.f32.mrb[2].mxu1 }
 0x164   :  { %v718_v22 = vpop.f32.mrb[3].mxu1 }
 0x16d   :  { %v456_v57 = vpop.f32.mrb[0].mxu0 }
 0x16e   :  { %v457_v46 = vadd.f32 %v456_v57, %v372_v48  ;;  %v458_v59 = vpop.f32.mrb[1].mxu0 }
 0x16f   :  { %v459_v60 = vadd.f32 %v458_v59, %v373_v42 }
 0x171   :  { %v487_v44 = vcombine.low %v457_v46, %v459_v60  ;;  %v488_v62 = vcombine.high %v457_v46, %v459_v60  ;;  %v462_v2 = vpop.f32.mrb[2].mxu0 }
 0x172   :  { %v463_v50 = vadd.f32 %v462_v2, %v372_v48  ;;  %v464_v4 = vpop.f32.mrb[3].mxu0 }
 0x173   :  { %v495_v6 = vrot.slane %v487_v44, %v4025_v56  ;;  %v502_v8 = vrot.slane %v488_v62, %v4025_v56  ;;  %v465_v55 = vadd.f32 %v464_v4, %v373_v42 }
 0x175   :  { %v505_v9 = vcombine.low %v463_v50, %v465_v55  ;;  %v506_v58 = vcombine.high %v463_v50, %v465_v55  ;;  %v468_v10 = vpop.f32.mrb[4].mxu0  ;;  %v503_v11 = vcombine.high %v495_v6, %v495_v6  ;;  %v888_v1 = vmul.f32 %v4141_v15, %v502_v8 }
 0x176   :  { %v469_v12 = vadd.f32 %v468_v10, %v372_v48  ;;  %v470_v61 = vpop.f32.mrb[5].mxu0  ;;  %v504_v63 = vcombine.high %v502_v8, %v502_v8  ;;  %v4150_v20 = vmul.f32 %v4144_v18, %v502_v8  ;;  %v2189_v23 = vmul.f32 %v4144_v18, %v495_v6 }
 0x177   :  { %v513_v53 = vrot.slane %v505_v9, %v4025_v56  ;;  %v520_v13 = vrot.slane %v506_v58, %v4025_v56  ;;  %v471_v5 = vadd.f32 %v470_v61, %v373_v42  ;;  %v788_v47 = vmul.f32 %v4141_v15, %v503_v11 }
 0x178   :  { %v988_v3 = vmul.f32 %v4141_v15, %v504_v63  ;;  %v1889_v7 = vmul.f32 %v4144_v18, %v504_v63  ;;  %v2089_v21 = vmul.f32 %v4144_v18, %v503_v11 }
 0x179   :  { %v523_v25 = vcombine.low %v469_v12, %v471_v5  ;;  %v524_v14 = vcombine.high %v469_v12, %v471_v5  ;;  %v474_v30 = vpop.f32.mrb[6].mxu0  ;;  %v1088_v38 = vmul.f32 %v4141_v15, %v513_v53  ;;  %v521_v39 = vcombine.high %v513_v53, %v513_v53 }
 0x17a   :  { %v475_v22 = vadd.f32 %v474_v30, %v372_v48  ;;  %v476_v43 = vpop.f32.mrb[7].mxu0  ;;  %v1288_v45 = vmul.f32 %v4141_v15, %v520_v13  ;;  %v522_v27 = vcombine.high %v520_v13, %v520_v13  ;;  %v1589_v29 = vmul.f32 %v4144_v18, %v520_v13 }
 0x17b   :  { %v531_v52 = vrot.slane %v523_v25, %v4025_v56  ;;  %v538_v54 = vrot.slane %v524_v14, %v4025_v56  ;;  %v477_v31 = vadd.f32 %v476_v43, %v373_v42  ;;  %v1188_v57 = vmul.f32 %v4141_v15, %v521_v39 }
 0x17c   :  { %v1388_v46 = vmul.f32 %v4141_v15, %v522_v27  ;;  %v1489_v51 = vmul.f32 %v4144_v18, %v522_v27  ;;  %v1689_v41 = vmul.f32 %v4144_v18, %v521_v39  ;;  %v1789_v48 = vmul.f32 %v4144_v18, %v513_v53 }
 0x17d   :  { %v541_v59 = vcombine.low %v475_v22, %v477_v31  ;;  %v542_v60 = vcombine.high %v475_v22, %v477_v31  ;;  %v540_v44 = vcombine.high %v538_v54, %v538_v54  ;;  %v1189_v62 = vmul.f32 %v4144_v18, %v538_v54 }
 0x17e   :  { %v539_v2 = vcombine.high %v531_v52, %v531_v52  ;;  %v1389_v50 = vmul.f32 %v4144_v18, %v531_v52  ;;  %v1488_v42 = vmul.f32 %v4141_v15, %v531_v52  ;;  %v1688_v4 = vmul.f32 %v4141_v15, %v538_v54 }
 0x17f   :  { %v549_v8 = vrot.slane %v541_v59, %v4025_v56  ;;  %v556_v55 = vrot.slane %v542_v60, %v4025_v56  ;;  %v1089_v9 = vmul.f32 %v4144_v18, %v540_v44  ;;  %v4176_v58 = vadd.f32 %v1189_v62, %v1188_v57 }
 0x180   :  { %v1289_v10 = vmul.f32 %v4144_v18, %v539_v2  ;;  %v4179_v11 = vadd.f32 %v1389_v50, %v1388_v46  ;;  %v4181_v12 = vadd.f32 %v1489_v51, %v1488_v42  ;;  %v1588_v61 = vmul.f32 %v4141_v15, %v539_v2  ;;  %v755_v2 = vpop.permute.xlu1 %754 }
 0x181   :  { %v558_v63 = vcombine.high %v556_v55, %v556_v55  ;;  %v789_v53 = vmul.f32 %v4144_v18, %v556_v55  ;;  %v557_v13 = vcombine.high %v549_v8, %v549_v8  ;;  %v989_v5 = vmul.f32 %v4144_v18, %v549_v8 }
 0x182   :  { %v613_v25 = vmul.f32 %v4141_v15, %v495_v6  ;;  %v4187_v14 = vadd.f32 %v1089_v9, %v1088_v38  ;;  %v4189_v30 = vadd.f32 %v1289_v10, %v1288_v45  ;;  %v4197_v52 = vadd.f32 %v1589_v29, %v1588_v61 }
 0x183   :  { %v632_v39 = vmul.f32 %v4144_v18, %v558_v63  ;;  %v4192_v22 = vadd.f32 %v789_v53, %v788_v47  ;;  %v889_v43 = vmul.f32 %v4144_v18, %v557_v13  ;;  %v4195_v27 = vadd.f32 %v989_v5, %v988_v3 }
 0x184   :  { %v4201_v57 = vadd.f32 %v1689_v41, %v1688_v4  ;;  %v1788_v6 = vmul.f32 %v4141_v15, %v540_v44  ;;  %v1888_v38 = vmul.f32 %v4141_v15, %v549_v8  ;;  %v1988_v47 = vmul.f32 %v4141_v15, %v557_v13 }
 0x185   :  { %v633_v54 = vadd.f32 %v632_v39, %v613_v25  ;;  %v4199_v31 = vadd.f32 %v889_v43, %v888_v1  ;;  %v2088_v3 = vmul.f32 %v4141_v15, %v556_v55  ;;  %v2188_v51 = vmul.f32 %v4141_v15, %v558_v63 }
 0x186   :  { %v4207_v46 = vadd.f32 %v1789_v48, %v1788_v6  ;;  %v4209_v18 = vadd.f32 %v1889_v7, %v1888_v38  ;;  %v4213_v1 = vadd.f32 %v4150_v20, %v1988_v47  ;;  %v4223_v7 = vld [vmem:[%s4891_s8] ss:$0 sm:$0xff] }
 0x187   :  { %v720_v45 = vadd.f32 %v4128_v17, %v633_v54  ;;  %v4216_v41 = vadd.f32 %v2089_v21, %v2088_v3  ;;  %v4218_v59 = vadd.f32 %v2189_v23, %v2188_v51  ;;  %v733_v48 = vadd.f32 %v4223_v7, %v4130_v34 }
 0x188   :  { %v736_v44 = vrot.slane %v633_v54, 2  ;;  %v849_v54 = vrot.slane %v4192_v22, 2 }
 0x189   :  { %v3240_v29 = vmul.f32 -1.442695, %v720_v45 }
 0x18b   :  { %3483 = vpow2.f32 %v3240_v29 }
 0x195   :  { %v3484_v17 = vpop.eup %3483 }
 0x196   :  { %v724_v60 = vadd.f32 1.0, %v3484_v17 }
 0x198   :  { %3485 = vrcp.f32 %v724_v60 }
 0x1a2   :  { %v3486_v20 = vpop.eup %3485 }
 0x1a3   :  { %v734_v62 = vmul.f32 %v3486_v20, %v733_v48  ;;  %v740_v23 = vsub.f32 1.0, %v3486_v20  ;;  %v757_v42 = vmul.f32 %v3486_v20, %v755_v2 }
 0x1a5   :  { %v738_v15 = vadd.f32 %v736_v44, %v734_v62 }
 0x1a7   :  { %3487 = vtanh.f32 %v738_v15 }
 0x1b1   :  { %v3488_v21 = vpop.eup %3487 }
 0x1b2   :  { %742 = vrot.lane.b32.xlu0 %v3488_v21, %s3683_s1 }
 0x224   :  { %v743_v50 = vpop.permute.xlu0 %742 }
 0x225   :  { %v745_v4 = vmul.f32 %v743_v50, %v740_v23 }
 0x227   :  { %v4228_v8 = vadd.f32 %v757_v42, %v745_v4  ;;  %v949_v4 = vrot.slane %v4199_v31, 2 }
 0x229   :  { %v791_v55 = vpack.c.bf16 %v4228_v8, %v4228_v8 }
 0x22b   :  { %793 = vrot.lane.b32.xlu1 %v791_v55, %s3683_s1 }
 0x29d   :  { %v794_v34 = vpop.permute.xlu1 %793 }
 0x29e   :  { %3242 = vmatmul.mubr.msk.bf16.vlgmr.msra.gmra.mrb[8].mxu0 %vm675_vm3, %v794_v34 }
 0x29f   :  { %999 = vmatpush1.bf16.msra.mxu0 %v3845_v19  ;;  %1030 = vmatprep.mubr.bf16.mxu0 %v3681_v36 }
 0x2a0   :  { %1000 = vmatprep.subr.bf16.mxu0 %v3857_v24 }
 0x2a3   :  { %1001 = vmatpush1.bf16.msra.mxu0 %v3861_v26 }
 0x2a4   :  { %1002 = vmatprep.subr.bf16.mxu0 %v3877_v32 }
 0x2a7   :  { %1003 = vmatpush1.bf16.msra.mxu0 %v3879_v33 }
 0x2a8   :  { %1004 = vmatprep.subr.bf16.mxu0 %v3883_v35 }
 0x2ab   :  { %1005 = vmatpush1.bf16.msra.mxu0 %v3895_v40 }
 0x2ac   :  { %1198 = vmatprep.subr.bf16.mxu0 %v3836_v16 }
 0x371   :  { %v832_v9 = vpop.f32.mrb[8].mxu0 }
 0x372   :  { %v839_v10 = vadd.f32 %v832_v9, %v4192_v22  ;;  %v834_v61 = vpop.f32.mrb[9].mxu0 }
 0x373   :  { %v836_v63 = vpop.f32.mrb[10].mxu0  ;;  %v846_v39 = vadd.f32 %v4223_v7, %v834_v61 }
 0x374   :  { %v3243_v53 = vmul.f32 -1.442695, %v839_v10  ;;  %v837_v13 = vpop.f32.mrb[11].mxu0 }
 0x376   :  { %3489 = vpow2.f32 %v3243_v53 }
 0x380   :  { %v3490_v5 = vpop.eup %3489 }
 0x381   :  { %v843_v25 = vadd.f32 1.0, %v3490_v5 }
 0x383   :  { %3491 = vrcp.f32 %v843_v25 }
 0x38d   :  { %v3492_v43 = vpop.eup %3491 }
 0x38e   :  { %v847_v6 = vmul.f32 %v3492_v43, %v846_v39  ;;  %v853_v47 = vsub.f32 1.0, %v3492_v43  ;;  %v859_v29 = vmul.f32 %v3492_v43, %v4228_v8 }
 0x390   :  { %v851_v38 = vadd.f32 %v849_v54, %v847_v6 }
 0x392   :  { %3493 = vtanh.f32 %v851_v38 }
 0x39c   :  { %v3494_v45 = vpop.eup %3493 }
 0x39d   :  { %855 = vrot.lane.b32.xlu0 %v3494_v45, %s3683_s1 }
 0x40f   :  { %v856_v3 = vpop.permute.xlu0 %855 }
 0x410   :  { %v858_v51 = vmul.f32 %v856_v3, %v853_v47 }
 0x412   :  { %v4248_v17 = vadd.f32 %v859_v29, %v858_v51  ;;  %v1049_v51 = vrot.slane %v4195_v27, 2 }
 0x414   :  { %v891_v60 = vpack.c.bf16 %v4248_v17, %v4248_v17 }
 0x416   :  { %893 = vrot.lane.b32.xlu1 %v891_v60, %s3683_s1 }
 0x488   :  { %v894_v48 = vpop.permute.xlu1 %893 }
 0x489   :  { %3244 = vmatmul.mubr.msk.bf16.vlgmr.msra.gmra.mrb[4].mxu1 %vm675_vm3, %v894_v48 }
 0x48a   :  { %1099 = vmatpush1.bf16.msra.mxu1 %v3845_v19  ;;  %1130 = vmatprep.mubr.bf16.mxu1 %v3681_v36 }
 0x48b   :  { %1100 = vmatprep.subr.bf16.mxu1 %v3857_v24 }
 0x48e   :  { %1101 = vmatpush1.bf16.msra.mxu1 %v3861_v26 }
 0x48f   :  { %1102 = vmatprep.subr.bf16.mxu1 %v3877_v32 }
 0x492   :  { %1103 = vmatpush1.bf16.msra.mxu1 %v3879_v33 }
 0x493   :  { %1104 = vmatprep.subr.bf16.mxu1 %v3883_v35 }
 0x496   :  { %1105 = vmatpush1.bf16.msra.mxu1 %v3895_v40 }
 0x497   :  { %1298 = vmatprep.subr.bf16.mxu1 %v3836_v16 }
 0x55c   :  { %v932_v22 = vpop.f32.mrb[4].mxu1 }
 0x55d   :  { %v939_v20 = vadd.f32 %v932_v22, %v4199_v31  ;;  %v934_v44 = vpop.f32.mrb[5].mxu1 }
 0x55e   :  { %v936_v62 = vpop.f32.mrb[6].mxu1  ;;  %v946_v50 = vadd.f32 %v4223_v7, %v934_v44 }
 0x55f   :  { %v3245_v15 = vmul.f32 -1.442695, %v939_v20  ;;  %v937_v21 = vpop.f32.mrb[7].mxu1 }
 0x561   :  { %3495 = vpow2.f32 %v3245_v15 }
 0x56b   :  { %v3496_v23 = vpop.eup %3495 }
 0x56c   :  { %v943_v2 = vadd.f32 1.0, %v3496_v23 }
 0x56e   :  { %3497 = vrcp.f32 %v943_v2 }
 0x578   :  { %v3498_v42 = vpop.eup %3497 }
 0x579   :  { %v947_v55 = vmul.f32 %v3498_v42, %v946_v50  ;;  %v953_v10 = vsub.f32 1.0, %v3498_v42  ;;  %v959_v63 = vmul.f32 %v3498_v42, %v4248_v17 }
 0x57b   :  { %v951_v34 = vadd.f32 %v949_v4, %v947_v55 }
 0x57d   :  { %3499 = vtanh.f32 %v951_v34 }
 0x587   :  { %v3500_v9 = vpop.eup %3499 }
 0x588   :  { %955 = vrot.lane.b32.xlu0 %v3500_v9, %s3683_s1 }
 0x5fa   :  { %v956_v61 = vpop.permute.xlu0 %955 }
 0x5fb   :  { %v958_v53 = vmul.f32 %v956_v61, %v953_v10 }
 0x5fd   :  { %v4268_v13 = vadd.f32 %v959_v63, %v958_v53 }
 0x5ff   :  { %v991_v5 = vpack.c.bf16 %v4268_v13, %v4268_v13 }
 0x601   :  { %993 = vrot.lane.b32.xlu1 %v991_v5, %s3683_s1 }
 0x673   :  { %v994_v25 = vpop.permute.xlu1 %993 }
 0x674   :  { %3246 = vmatmul.mubr.msk.bf16.vlgmr.msra.gmra.mrb[12].mxu0 %vm675_vm3, %v994_v25 }
 0x675   :  { %1199 = vmatpush1.bf16.msra.mxu0 %v3845_v19  ;;  %1230 = vmatprep.mubr.bf16.mxu0 %v3681_v36 }
 0x676   :  { %1200 = vmatprep.subr.bf16.mxu0 %v3857_v24 }
 0x679   :  { %1201 = vmatpush1.bf16.msra.mxu0 %v3861_v26 }
 0x67a   :  { %1202 = vmatprep.subr.bf16.mxu0 %v3877_v32 }
 0x67d   :  { %1203 = vmatpush1.bf16.msra.mxu0 %v3879_v33 }
 0x67e   :  { %1204 = vmatprep.subr.bf16.mxu0 %v3883_v35 }
 0x681   :  { %1205 = vmatpush1.bf16.msra.mxu0 %v3895_v40 }
 0x682   :  { %1398 = vmatprep.subr.bf16.mxu0 %v3836_v16 }
 0x747   :  { %v1032_v31 = vpop.f32.mrb[12].mxu0 }
 0x748   :  { %v1039_v39 = vadd.f32 %v1032_v31, %v4195_v27  ;;  %v1034_v43 = vpop.f32.mrb[13].mxu0 }
 0x749   :  { %v1036_v54 = vpop.f32.mrb[14].mxu0  ;;  %v1046_v3 = vadd.f32 %v4223_v7, %v1034_v43  ;;  %v4321_v43 = vld [vmem:[#allocation3 + $0x10] ss:$8 sps:$4 sm:$0xff]  }
 0x74a   :  { %v3247_v6 = vmul.f32 -1.442695, %v1039_v39  ;;  %v1037_v38 = vpop.f32.mrb[15].mxu0  ;;  %v4318_v39 = vld [vmem:[#allocation3 + $0x14] ss:$8 sps:$4 sm:$0xff]  }
 0x74b   :  { %v4324_v54 = vld [vmem:[#allocation3 + $0x24] ss:$8 sps:$4 sm:$0xff]   ;;  %v4330_v38 = vld [vmem:[#allocation3 + $0x34] ss:$8 sps:$4 sm:$0xff]  }
 0x74c   :  { %3501 = vpow2.f32 %v3247_v6  ;;  %v4327_v6 = vld [vmem:[#allocation3 + $0x20] ss:$8 sps:$4 sm:$0xff]  }
 0x756   :  { %v3502_v45 = vpop.eup %3501 }
 0x757   :  { %v1043_v47 = vadd.f32 1.0, %v3502_v45  ;;  %v4334_v45 = vld [vmem:[#allocation3 + $0x4] ss:$8 sps:$4 sm:$0xff]  }
 0x759   :  { %3503 = vrcp.f32 %v1043_v47 }
 0x763   :  { %v3504_v29 = vpop.eup %3503 }
 0x764   :  { %v1047_v60 = vmul.f32 %v3504_v29, %v1046_v3  ;;  %v1053_v20 = vsub.f32 1.0, %v3504_v29  ;;  %v1059_v62 = vmul.f32 %v3504_v29, %v4268_v13 }
 0x766   :  { %v1051_v48 = vadd.f32 %v1049_v51, %v1047_v60 }
 0x768   :  { %3505 = vtanh.f32 %v1051_v48 }
 0x772   :  { %v3506_v22 = vpop.eup %3505 }
 0x773   :  { %1055 = vrot.lane.b32.xlu0 %v3506_v22, %s3683_s1 }
 0x7e5   :  { %v1056_v44 = vpop.permute.xlu0 %1055 }
 0x7e6   :  { %v1058_v15 = vmul.f32 %v1056_v44, %v1053_v20 }
 0x7e8   :  { %v4288_v21 = vadd.f32 %v1059_v62, %v1058_v15 }
 0x7ea   :  { %v1091_v23 = vpack.c.bf16 %v4288_v21, %v4288_v21 }
 0x7ec   :  { %1093 = vrot.lane.b32.xlu1 %v1091_v23, %s3683_s1 }
 0x85e   :  { %v1094_v2 = vpop.permute.xlu1 %1093 }
 0x85f   :  { %3248 = vmatmul.mubr.msk.bf16.vlgmr.msra.gmra.mrb[8].mxu1 %vm675_vm3, %v1094_v2 }
 0x860   :  { %1299 = vmatpush1.bf16.msra.mxu1 %v3845_v19  ;;  %1330 = vmatprep.mubr.bf16.mxu1 %v3681_v36 }
 0x861   :  { %1300 = vmatprep.subr.bf16.mxu1 %v3857_v24 }
 0x864   :  { %1301 = vmatpush1.bf16.msra.mxu1 %v3861_v26 }
 0x865   :  { %1302 = vmatprep.subr.bf16.mxu1 %v3877_v32 }
 0x868   :  { %1303 = vmatpush1.bf16.msra.mxu1 %v3879_v33 }
 0x869   :  { %1304 = vmatprep.subr.bf16.mxu1 %v3883_v35  ;;  %v1149_v35 = vrot.slane %v4187_v14, 2 }
 0x86c   :  { %1305 = vmatpush1.bf16.msra.mxu1 %v3895_v40 }
 0x86d   :  { %1498 = vmatprep.subr.bf16.mxu1 %v3836_v16 }
 0x932   :  { %v1132_v27 = vpop.f32.mrb[8].mxu1 }
 0x933   :  { %v1139_v50 = vadd.f32 %v1132_v27, %v4187_v14  ;;  %v1134_v19 = vpop.f32.mrb[9].mxu1  ;;  %v4314_v14 = vld [vmem:[#allocation3] ss:$8 sps:$4 sm:$0xff]  }
 0x934   :  { %v1136_v42 = vpop.f32.mrb[10].mxu1  ;;  %v1146_v32 = vadd.f32 %v4223_v7, %v1134_v19 }
 0x935   :  { %v3249_v4 = vmul.f32 -1.442695, %v1139_v50  ;;  %v1137_v55 = vpop.f32.mrb[11].mxu1 }
 0x937   :  { %3507 = vpow2.f32 %v3249_v4 }
 0x941   :  { %v3508_v24 = vpop.eup %3507 }
 0x942   :  { %v1143_v26 = vadd.f32 1.0, %v3508_v24 }
 0x944   :  { %3509 = vrcp.f32 %v1143_v26 }
 0x94e   :  { %v3510_v33 = vpop.eup %3509 }
 0x94f   :  { %v1147_v34 = vmul.f32 %v3510_v33, %v1146_v32  ;;  %v1153_v10 = vsub.f32 1.0, %v3510_v33  ;;  %v1159_v63 = vmul.f32 %v3510_v33, %v4288_v21 }
 0x951   :  { %v1151_v9 = vadd.f32 %v1149_v35, %v1147_v34 }
 0x953   :  { %3511 = vtanh.f32 %v1151_v9 }
 0x95d   :  { %v3512_v16 = vpop.eup %3511 }
 0x95e   :  { %1155 = vrot.lane.b32.xlu0 %v3512_v16, %s3683_s1 }
 0x9d0   :  { %v1156_v61 = vpop.permute.xlu0 %1155 }
 0x9d1   :  { %v1158_v53 = vmul.f32 %v1156_v61, %v1153_v10 }
 0x9d3   :  { %v4308_v5 = vadd.f32 %v1159_v63, %v1158_v53  ;;  %v1349_v53 = vrot.slane %v4189_v30, 2 }
 0x9d5   :  { %v1191_v25 = vpack.c.bf16 %v4308_v5, %v4308_v5 }
 0x9d7   :  { %1193 = vrot.lane.b32.xlu1 %v1191_v25, %s3683_s1 }
 0xa49   :  { %v1194_v31 = vpop.permute.xlu1 %1193 }
 0xa4a   :  { %3250 = vmatmul.mubr.msk.bf16.vlgmr.msra.gmra.mrb[16].mxu0 %vm675_vm3, %v1194_v31 }
 0xa4b   :  { %1399 = vmatpush1.bf16.msra.mxu0 %v4314_v14  ;;  %1430 = vmatprep.mubr.bf16.mxu0 %v3681_v36 }
 0xa4c   :  { %1400 = vmatprep.subr.bf16.mxu0 %v4318_v39 }
 0xa4f   :  { %1401 = vmatpush1.bf16.msra.mxu0 %v4321_v43 }
 0xa50   :  { %1402 = vmatprep.subr.bf16.mxu0 %v4324_v54 }
 0xa53   :  { %1403 = vmatpush1.bf16.msra.mxu0 %v4327_v6 }
 0xa54   :  { %1404 = vmatprep.subr.bf16.mxu0 %v4330_v38 }
 0xa57   :  { %1405 = vmatpush1.bf16.msra.mxu0 %v3895_v40  ;;  %v1249_v40 = vrot.slane %v4176_v58, 2 }
 0xa58   :  { %1598 = vmatprep.subr.bf16.mxu0 %v4334_v45 }
 0xb1d   :  { %v1232_v47 = vpop.f32.mrb[16].mxu0 }
 0xb1e   :  { %v1239_v3 = vadd.f32 %v1232_v47, %v4176_v58  ;;  %v1234_v29 = vpop.f32.mrb[17].mxu0  ;;  %v4355_v58 = vld [vmem:[#allocation3 + $0x30] ss:$8 sps:$4 sm:$0xff]  }
 0xb1f   :  { %v1236_v51 = vpop.f32.mrb[18].mxu0  ;;  %v1246_v44 = vadd.f32 %v4223_v7, %v1234_v29 }
 0xb20   :  { %v3251_v60 = vmul.f32 -1.442695, %v1239_v3  ;;  %v1237_v48 = vpop.f32.mrb[19].mxu0 }
 0xb22   :  { %3513 = vpow2.f32 %v3251_v60 }
 0xb2c   :  { %v3514_v22 = vpop.eup %3513 }
 0xb2d   :  { %v1243_v20 = vadd.f32 1.0, %v3514_v22 }
 0xb2f   :  { %3515 = vrcp.f32 %v1243_v20 }
 0xb39   :  { %v3516_v62 = vpop.eup %3515 }
 0xb3a   :  { %v1247_v15 = vmul.f32 %v3516_v62, %v1246_v44  ;;  %v1253_v27 = vsub.f32 1.0, %v3516_v62  ;;  %v1259_v19 = vmul.f32 %v3516_v62, %v4308_v5 }
 0xb3c   :  { %v1251_v23 = vadd.f32 %v1249_v40, %v1247_v15 }
 0xb3e   :  { %3517 = vtanh.f32 %v1251_v23 }
 0xb48   :  { %v3518_v2 = vpop.eup %3517 }
 0xb49   :  { %1255 = vrot.lane.b32.xlu0 %v3518_v2, %s3683_s1 }
 0xbbb   :  { %v1256_v50 = vpop.permute.xlu0 %1255 }
 0xbbc   :  { %v1258_v42 = vmul.f32 %v1256_v50, %v1253_v27 }
 0xbbe   :  { %v4342_v4 = vadd.f32 %v1259_v19, %v1258_v42  ;;  %v1449_v42 = vrot.slane %v4179_v11, 2 }
 0xbc0   :  { %v1291_v55 = vpack.c.bf16 %v4342_v4, %v4342_v4 }
 0xbc2   :  { %1293 = vrot.lane.b32.xlu1 %v1291_v55, %s3683_s1 }
 0xc34   :  { %v1294_v24 = vpop.permute.xlu1 %1293 }
 0xc35   :  { %3252 = vmatmul.mubr.msk.bf16.vlgmr.msra.gmra.mrb[12].mxu1 %vm675_vm3, %v1294_v24 }
 0xc36   :  { %1499 = vmatpush1.bf16.msra.mxu1 %v4314_v14  ;;  %1530 = vmatprep.mubr.bf16.mxu1 %v3681_v36 }
 0xc37   :  { %1500 = vmatprep.subr.bf16.mxu1 %v4318_v39 }
 0xc3a   :  { %1501 = vmatpush1.bf16.msra.mxu1 %v4321_v43 }
 0xc3b   :  { %1502 = vmatprep.subr.bf16.mxu1 %v4324_v54 }
 0xc3e   :  { %1503 = vmatpush1.bf16.msra.mxu1 %v4327_v6 }
 0xc3f   :  { %1504 = vmatprep.subr.bf16.mxu1 %v4330_v38 }
 0xc42   :  { %1505 = vmatpush1.bf16.msra.mxu1 %v4355_v58 }
 0xc43   :  { %1698 = vmatprep.subr.bf16.mxu1 %v4334_v45 }
 0xd08   :  { %v1332_v26 = vpop.f32.mrb[12].mxu1 }
 0xd09   :  { %v1339_v32 = vadd.f32 %v1332_v26, %v4189_v30  ;;  %v1334_v33 = vpop.f32.mrb[13].mxu1 }
 0xd0a   :  { %v1336_v35 = vpop.f32.mrb[14].mxu1  ;;  %v1346_v61 = vadd.f32 %v4223_v7, %v1334_v33 }
 0xd0b   :  { %v3253_v34 = vmul.f32 -1.442695, %v1339_v32  ;;  %v1337_v9 = vpop.f32.mrb[15].mxu1 }
 0xd0d   :  { %3519 = vpow2.f32 %v3253_v34 }
 0xd17   :  { %v3520_v16 = vpop.eup %3519 }
 0xd18   :  { %v1343_v10 = vadd.f32 1.0, %v3520_v16 }
 0xd1a   :  { %3521 = vrcp.f32 %v1343_v10 }
 0xd24   :  { %v3522_v63 = vpop.eup %3521 }
 0xd25   :  { %v1347_v25 = vmul.f32 %v3522_v63, %v1346_v61  ;;  %v1353_v3 = vsub.f32 1.0, %v3522_v63  ;;  %v1359_v51 = vmul.f32 %v3522_v63, %v4342_v4 }
 0xd27   :  { %v1351_v31 = vadd.f32 %v1349_v53, %v1347_v25 }
 0xd29   :  { %3523 = vtanh.f32 %v1351_v31 }
 0xd33   :  { %v3524_v47 = vpop.eup %3523 }
 0xd34   :  { %1355 = vrot.lane.b32.xlu0 %v3524_v47, %s3683_s1 }
 0xda6   :  { %v1356_v29 = vpop.permute.xlu0 %1355 }
 0xda7   :  { %v1358_v60 = vmul.f32 %v1356_v29, %v1353_v3 }
 0xda9   :  { %v4364_v48 = vadd.f32 %v1359_v51, %v1358_v60  ;;  %v1549_v60 = vrot.slane %v4181_v12, 2 }
 0xdab   :  { %v1391_v22 = vpack.c.bf16 %v4364_v48, %v4364_v48 }
 0xdad   :  { %1393 = vrot.lane.b32.xlu1 %v1391_v22, %s3683_s1 }
 0xe1f   :  { %v1394_v20 = vpop.permute.xlu1 %1393 }
 0xe20   :  { %3254 = vmatmul.mubr.msk.bf16.vlgmr.msra.gmra.mrb[20].mxu0 %vm675_vm3, %v1394_v20 }
 0xe21   :  { %1599 = vmatpush1.bf16.msra.mxu0 %v4314_v14  ;;  %1630 = vmatprep.mubr.bf16.mxu0 %v3681_v36 }
 0xe22   :  { %1600 = vmatprep.subr.bf16.mxu0 %v4318_v39 }
 0xe25   :  { %1601 = vmatpush1.bf16.msra.mxu0 %v4321_v43 }
 0xe26   :  { %1602 = vmatprep.subr.bf16.mxu0 %v4324_v54 }
 0xe29   :  { %1603 = vmatpush1.bf16.msra.mxu0 %v4327_v6 }
 0xe2a   :  { %1604 = vmatprep.subr.bf16.mxu0 %v4330_v38 }
 0xe2d   :  { %1605 = vmatpush1.bf16.msra.mxu0 %v4355_v58 }
 0xe2e   :  { %1798 = vmatprep.subr.bf16.mxu0 %v4334_v45 }
 0xef3   :  { %v1432_v30 = vpop.f32.mrb[20].mxu0 }
 0xef4   :  { %v1439_v44 = vadd.f32 %v1432_v30, %v4179_v11  ;;  %v1434_v62 = vpop.f32.mrb[21].mxu0 }
 0xef5   :  { %v1436_v40 = vpop.f32.mrb[22].mxu0  ;;  %v1446_v50 = vadd.f32 %v4223_v7, %v1434_v62 }
 0xef6   :  { %v3255_v15 = vmul.f32 -1.442695, %v1439_v44  ;;  %v1437_v23 = vpop.f32.mrb[23].mxu0 }
 0xef8   :  { %3525 = vpow2.f32 %v3255_v15 }
 0xf02   :  { %v3526_v2 = vpop.eup %3525 }
 0xf03   :  { %v1443_v27 = vadd.f32 1.0, %v3526_v2 }
 0xf05   :  { %3527 = vrcp.f32 %v1443_v27 }
 0xf0f   :  { %v3528_v19 = vpop.eup %3527 }
 0xf10   :  { %v1447_v55 = vmul.f32 %v3528_v19, %v1446_v50  ;;  %v1453_v32 = vsub.f32 1.0, %v3528_v19  ;;  %v1459_v35 = vmul.f32 %v3528_v19, %v4364_v48 }
 0xf12   :  { %v1451_v24 = vadd.f32 %v1449_v42, %v1447_v55 }
 0xf14   :  { %3529 = vtanh.f32 %v1451_v24 }
 0xf1e   :  { %v3530_v26 = vpop.eup %3529 }
 0xf1f   :  { %1455 = vrot.lane.b32.xlu0 %v3530_v26, %s3683_s1 }
 0xf91   :  { %v1456_v33 = vpop.permute.xlu0 %1455 }
 0xf92   :  { %v1458_v34 = vmul.f32 %v1456_v33, %v1453_v32 }
 0xf94   :  { %v4384_v9 = vadd.f32 %v1459_v35, %v1458_v34  ;;  %v1649_v34 = vrot.slane %v4197_v52, 2 }
 0xf96   :  { %v1491_v16 = vpack.c.bf16 %v4384_v9, %v4384_v9 }
 0xf98   :  { %1493 = vrot.lane.b32.xlu1 %v1491_v16, %s3683_s1 }
0x100a   :  { %v1494_v10 = vpop.permute.xlu1 %1493 }
0x100b   :  { %3256 = vmatmul.mubr.msk.bf16.vlgmr.msra.gmra.mrb[16].mxu1 %vm675_vm3, %v1494_v10 }
0x100c   :  { %1699 = vmatpush1.bf16.msra.mxu1 %v4314_v14  ;;  %1730 = vmatprep.mubr.bf16.mxu1 %v3681_v36 }
0x100d   :  { %1700 = vmatprep.subr.bf16.mxu1 %v4318_v39 }
0x1010   :  { %1701 = vmatpush1.bf16.msra.mxu1 %v4321_v43 }
0x1011   :  { %1702 = vmatprep.subr.bf16.mxu1 %v4324_v54 }
0x1014   :  { %1703 = vmatpush1.bf16.msra.mxu1 %v4327_v6 }
0x1015   :  { %1704 = vmatprep.subr.bf16.mxu1 %v4330_v38 }
0x1018   :  { %1705 = vmatpush1.bf16.msra.mxu1 %v4355_v58 }
0x1019   :  { %1898 = vmatprep.subr.bf16.mxu1 %v4334_v45 }
0x10de   :  { %v1532_v11 = vpop.f32.mrb[16].mxu1 }
0x10df   :  { %v1539_v61 = vadd.f32 %v1532_v11, %v4181_v12  ;;  %v1534_v63 = vpop.f32.mrb[17].mxu1 }
0x10e0   :  { %v1536_v53 = vpop.f32.mrb[18].mxu1  ;;  %v1546_v29 = vadd.f32 %v4223_v7, %v1534_v63 }
0x10e1   :  { %v3257_v25 = vmul.f32 -1.442695, %v1539_v61  ;;  %v1537_v31 = vpop.f32.mrb[19].mxu1 }
0x10e3   :  { %3531 = vpow2.f32 %v3257_v25 }
0x10ed   :  { %v3532_v47 = vpop.eup %3531 }
0x10ee   :  { %v1543_v3 = vadd.f32 1.0, %v3532_v47 }
0x10f0   :  { %3533 = vrcp.f32 %v1543_v3 }
0x10fa   :  { %v3534_v51 = vpop.eup %3533 }
0x10fb   :  { %v1547_v22 = vmul.f32 %v3534_v51, %v1546_v29  ;;  %v1553_v44 = vsub.f32 1.0, %v3534_v51  ;;  %v1559_v40 = vmul.f32 %v3534_v51, %v4384_v9 }
0x10fd   :  { %v1551_v20 = vadd.f32 %v1549_v60, %v1547_v22 }
0x10ff   :  { %3535 = vtanh.f32 %v1551_v20 }
0x1109   :  { %v3536_v30 = vpop.eup %3535 }
0x110a   :  { %1555 = vrot.lane.b32.xlu0 %v3536_v30, %s3683_s1 }
0x117c   :  { %v1556_v62 = vpop.permute.xlu0 %1555 }
0x117d   :  { %v1558_v15 = vmul.f32 %v1556_v62, %v1553_v44 }
0x117f   :  { %v4404_v23 = vadd.f32 %v1559_v40, %v1558_v15  ;;  %v1749_v15 = vrot.slane %v4201_v57, 2 }
0x1181   :  { %v1591_v2 = vpack.c.bf16 %v4404_v23, %v4404_v23 }
0x1183   :  { %1593 = vrot.lane.b32.xlu1 %v1591_v2, %s3683_s1 }
0x11f5   :  { %v1594_v27 = vpop.permute.xlu1 %1593 }
0x11f6   :  { %3258 = vmatmul.mubr.msk.bf16.vlgmr.msra.gmra.mrb[24].mxu0 %vm675_vm3, %v1594_v27 }
0x11f7   :  { %1799 = vmatpush1.bf16.msra.mxu0 %v4314_v14  ;;  %1830 = vmatprep.mubr.bf16.mxu0 %v3681_v36 }
0x11f8   :  { %1800 = vmatprep.subr.bf16.mxu0 %v4318_v39 }
0x11fb   :  { %1801 = vmatpush1.bf16.msra.mxu0 %v4321_v43 }
0x11fc   :  { %1802 = vmatprep.subr.bf16.mxu0 %v4324_v54 }
0x11ff   :  { %1803 = vmatpush1.bf16.msra.mxu0 %v4327_v6 }
0x1200   :  { %1804 = vmatprep.subr.bf16.mxu0 %v4330_v38 }
0x1203   :  { %1805 = vmatpush1.bf16.msra.mxu0 %v4355_v58 }
0x1204   :  { %1998 = vmatprep.subr.bf16.mxu0 %v4334_v45 }
0x12c9   :  { %v1632_v12 = vpop.f32.mrb[24].mxu0 }
0x12ca   :  { %v1639_v50 = vadd.f32 %v1632_v12, %v4197_v52  ;;  %v1634_v19 = vpop.f32.mrb[25].mxu0 }
0x12cb   :  { %v1636_v42 = vpop.f32.mrb[26].mxu0  ;;  %v1646_v33 = vadd.f32 %v4223_v7, %v1634_v19 }
0x12cc   :  { %v3259_v55 = vmul.f32 -1.442695, %v1639_v50  ;;  %v1637_v24 = vpop.f32.mrb[27].mxu0 }
0x12ce   :  { %3537 = vpow2.f32 %v3259_v55 }
0x12d8   :  { %v3538_v26 = vpop.eup %3537 }
0x12d9   :  { %v1643_v32 = vadd.f32 1.0, %v3538_v26 }
0x12db   :  { %3539 = vrcp.f32 %v1643_v32 }
0x12e5   :  { %v3540_v35 = vpop.eup %3539 }
0x12e6   :  { %v1647_v16 = vmul.f32 %v3540_v35, %v1646_v33  ;;  %v1653_v61 = vsub.f32 1.0, %v3540_v35  ;;  %v1659_v53 = vmul.f32 %v3540_v35, %v4404_v23 }
0x12e8   :  { %v1651_v10 = vadd.f32 %v1649_v34, %v1647_v16 }
0x12ea   :  { %3541 = vtanh.f32 %v1651_v10 }
0x12f4   :  { %v3542_v11 = vpop.eup %3541 }
0x12f5   :  { %1655 = vrot.lane.b32.xlu0 %v3542_v11, %s3683_s1 }
0x1367   :  { %v1656_v63 = vpop.permute.xlu0 %1655 }
0x1368   :  { %v1658_v25 = vmul.f32 %v1656_v63, %v1653_v61 }
0x136a   :  { %v4424_v31 = vadd.f32 %v1659_v53, %v1658_v25  ;;  %v1849_v25 = vrot.slane %v4207_v46, 2 }
0x136c   :  { %v1691_v47 = vpack.c.bf16 %v4424_v31, %v4424_v31 }
0x136e   :  { %1693 = vrot.lane.b32.xlu1 %v1691_v47, %s3683_s1 }
0x13e0   :  { %v1694_v3 = vpop.permute.xlu1 %1693 }
0x13e1   :  { %3260 = vmatmul.mubr.msk.bf16.vlgmr.msra.gmra.mrb[20].mxu1 %vm675_vm3, %v1694_v3 }
0x13e2   :  { %1899 = vmatpush1.bf16.msra.mxu1 %v4314_v14  ;;  %1930 = vmatprep.mubr.bf16.mxu1 %v3681_v36 }
0x13e3   :  { %1900 = vmatprep.subr.bf16.mxu1 %v4318_v39 }
0x13e6   :  { %1901 = vmatpush1.bf16.msra.mxu1 %v4321_v43 }
0x13e7   :  { %1902 = vmatprep.subr.bf16.mxu1 %v4324_v54 }
0x13ea   :  { %1903 = vmatpush1.bf16.msra.mxu1 %v4327_v6 }
0x13eb   :  { %1904 = vmatprep.subr.bf16.mxu1 %v4330_v38 }
0x13ee   :  { %1905 = vmatpush1.bf16.msra.mxu1 %v4355_v58 }
0x13ef   :  { %2098 = vmatprep.subr.bf16.mxu1 %v4334_v45 }
0x14b4   :  { %v1732_v52 = vpop.f32.mrb[20].mxu1 }
0x14b5   :  { %v1739_v29 = vadd.f32 %v1732_v52, %v4201_v57  ;;  %v1734_v51 = vpop.f32.mrb[21].mxu1 }
0x14b6   :  { %v1736_v60 = vpop.f32.mrb[22].mxu1  ;;  %v1746_v62 = vadd.f32 %v4223_v7, %v1734_v51 }
0x14b7   :  { %v3261_v22 = vmul.f32 -1.442695, %v1739_v29  ;;  %v1737_v20 = vpop.f32.mrb[23].mxu1 }
0x14b9   :  { %3543 = vpow2.f32 %v3261_v22 }
0x14c3   :  { %v3544_v30 = vpop.eup %3543 }
0x14c4   :  { %v1743_v44 = vadd.f32 1.0, %v3544_v30 }
0x14c6   :  { %3545 = vrcp.f32 %v1743_v44 }
0x14d0   :  { %v3546_v40 = vpop.eup %3545 }
0x14d1   :  { %v1747_v2 = vmul.f32 %v3546_v40, %v1746_v62  ;;  %v1753_v50 = vsub.f32 1.0, %v3546_v40  ;;  %v1759_v42 = vmul.f32 %v3546_v40, %v4424_v31 }
0x14d3   :  { %v1751_v27 = vadd.f32 %v1749_v15, %v1747_v2 }
0x14d5   :  { %3547 = vtanh.f32 %v1751_v27 }
0x14df   :  { %v3548_v12 = vpop.eup %3547 }
0x14e0   :  { %1755 = vrot.lane.b32.xlu0 %v3548_v12, %s3683_s1 }
0x1552   :  { %v1756_v19 = vpop.permute.xlu0 %1755 }
0x1553   :  { %v1758_v55 = vmul.f32 %v1756_v19, %v1753_v50 }
0x1555   :  { %v4444_v24 = vadd.f32 %v1759_v42, %v1758_v55  ;;  %v1949_v42 = vrot.slane %v4209_v18, 2 }
0x1557   :  { %v1791_v26 = vpack.c.bf16 %v4444_v24, %v4444_v24 }
0x1559   :  { %1793 = vrot.lane.b32.xlu1 %v1791_v26, %s3683_s1 }
0x15cb   :  { %v1794_v32 = vpop.permute.xlu1 %1793 }
0x15cc   :  { %3262 = vmatmul.mubr.msk.bf16.vlgmr.msra.gmra.mrb[28].mxu0 %vm675_vm3, %v1794_v32 }
0x15cd   :  { %1999 = vmatpush1.bf16.msra.mxu0 %v4314_v14  ;;  %2030 = vmatprep.mubr.bf16.mxu0 %v3681_v36 }
0x15ce   :  { %2000 = vmatprep.subr.bf16.mxu0 %v4318_v39 }
0x15d1   :  { %2001 = vmatpush1.bf16.msra.mxu0 %v4321_v43 }
0x15d2   :  { %2002 = vmatprep.subr.bf16.mxu0 %v4324_v54 }
0x15d5   :  { %2003 = vmatpush1.bf16.msra.mxu0 %v4327_v6 }
0x15d6   :  { %2004 = vmatprep.subr.bf16.mxu0 %v4330_v38 }
0x15d9   :  { %2005 = vmatpush1.bf16.msra.mxu0 %v4355_v58 }
0x15da   :  { %2198 = vmatprep.subr.bf16.mxu0 %v4334_v45 }
0x169f   :  { %v1832_v57 = vpop.f32.mrb[28].mxu0 }
0x16a0   :  { %v1839_v33 = vadd.f32 %v1832_v57, %v4207_v46  ;;  %v1834_v35 = vpop.f32.mrb[29].mxu0 }
0x16a1   :  { %v1836_v34 = vpop.f32.mrb[30].mxu0  ;;  %v1846_v63 = vadd.f32 %v4223_v7, %v1834_v35 }
0x16a2   :  { %v3263_v16 = vmul.f32 -1.442695, %v1839_v33  ;;  %v1837_v10 = vpop.f32.mrb[31].mxu0 }
0x16a4   :  { %3549 = vpow2.f32 %v3263_v16 }
0x16ae   :  { %v3550_v11 = vpop.eup %3549 }
0x16af   :  { %v1843_v61 = vadd.f32 1.0, %v3550_v11 }
0x16b1   :  { %3551 = vrcp.f32 %v1843_v61 }
0x16bb   :  { %v3552_v53 = vpop.eup %3551 }
0x16bc   :  { %v1847_v47 = vmul.f32 %v3552_v53, %v1846_v63  ;;  %v1853_v52 = vsub.f32 1.0, %v3552_v53  ;;  %v1859_v51 = vmul.f32 %v3552_v53, %v4444_v24 }
0x16be   :  { %v1851_v3 = vadd.f32 %v1849_v25, %v1847_v47 }
0x16c0   :  { %3553 = vtanh.f32 %v1851_v3 }
0x16ca   :  { %v3554_v45 = vpop.eup %3553 }
0x16cb   :  { %1855 = vrot.lane.b32.xlu0 %v3554_v45, %s3683_s1 }
0x173d   :  { %v1856_v29 = vpop.permute.xlu0 %1855 }
0x173e   :  { %v1858_v60 = vmul.f32 %v1856_v29, %v1853_v52 }
0x1740   :  { %v4464_v22 = vadd.f32 %v1859_v51, %v1858_v60 }
0x1742   :  { %v1891_v20 = vpack.c.bf16 %v4464_v22, %v4464_v22 }
0x1744   :  { %1893 = vrot.lane.b32.xlu1 %v1891_v20, %s3683_s1 }
0x17b6   :  { %v1894_v30 = vpop.permute.xlu1 %1893 }
0x17b7   :  { %3264 = vmatmul.mubr.msk.bf16.vlgmr.msra.gmra.mrb[24].mxu1 %vm675_vm3, %v1894_v30 }
0x17b8   :  { %2099 = vmatpush1.bf16.msra.mxu1 %v4314_v14  ;;  %2130 = vmatprep.mubr.bf16.mxu1 %v3681_v36 }
0x17b9   :  { %2100 = vmatprep.subr.bf16.mxu1 %v4318_v39 }
0x17bc   :  { %2101 = vmatpush1.bf16.msra.mxu1 %v4321_v43 }
0x17bd   :  { %2102 = vmatprep.subr.bf16.mxu1 %v4324_v54 }
0x17c0   :  { %2103 = vmatpush1.bf16.msra.mxu1 %v4327_v6 }
0x17c1   :  { %2104 = vmatprep.subr.bf16.mxu1 %v4330_v38 }
0x17c4   :  { %2105 = vmatpush1.bf16.msra.mxu1 %v4355_v58 }
0x188a   :  { %v1932_v46 = vpop.f32.mrb[24].mxu1 }
0x188b   :  { %v1939_v44 = vadd.f32 %v1932_v46, %v4209_v18  ;;  %v1934_v62 = vpop.f32.mrb[25].mxu1 }
0x188c   :  { %v1936_v40 = vpop.f32.mrb[26].mxu1  ;;  %v1946_v50 = vadd.f32 %v4223_v7, %v1934_v62 }
0x188d   :  { %v3265_v15 = vmul.f32 -1.442695, %v1939_v44  ;;  %v1937_v2 = vpop.f32.mrb[27].mxu1 }
0x188f   :  { %3555 = vpow2.f32 %v3265_v15 }
0x1899   :  { %v3556_v27 = vpop.eup %3555 }
0x189a   :  { %v1943_v12 = vadd.f32 1.0, %v3556_v27 }
0x189c   :  { %3557 = vrcp.f32 %v1943_v12 }
0x18a6   :  { %v3558_v19 = vpop.eup %3557 }
0x18a7   :  { %v1947_v55 = vmul.f32 %v3558_v19, %v1946_v50  ;;  %v1953_v57 = vsub.f32 1.0, %v3558_v19  ;;  %v1959_v35 = vmul.f32 %v3558_v19, %v4464_v22  ;;  %v2149_v50 = vrot.slane %v4216_v41, 2 }
0x18a9   :  { %v1951_v26 = vadd.f32 %v1949_v42, %v1947_v55 }
0x18ab   :  { %3559 = vtanh.f32 %v1951_v26  ;;  %v3684_v26 = vmov 1966171168  }
0x18b5   :  { %v3560_v32 = vpop.eup %3559 }
0x18b6   :  { %1955 = vrot.lane.b32.xlu0 %v3560_v32, %s3683_s1  ;;  %v761_v32 = vunpack.c.l.s4 %v3684_v26 }
0x1928   :  { %v1956_v33 = vpop.permute.xlu0 %1955 }
0x1929   :  { %v1958_v34 = vmul.f32 %v1956_v33, %v1953_v57  ;;  %v762_v57 = vunpack.c.0.s8 %v761_v32 }
0x192b   :  { %v4483_v16 = vadd.f32 %v1959_v35, %v1958_v34 }
0x192d   :  { %v1991_v10 = vpack.c.bf16 %v4483_v16, %v4483_v16 }
0x192f   :  { %1993 = vrot.lane.b32.xlu1 %v1991_v10, %s3683_s1 }
0x19a1   :  { %v1994_v11 = vpop.permute.xlu1 %1993 }
0x19a2   :  { %3266 = vmatmul.mubr.msk.bf16.vlgmr.msra.gmra.mrb[32].mxu0 %vm675_vm3, %v1994_v11  ;;  %v4515_v11 = vsub.s32 %v762_v57, %v4013_v49 }
0x19a3   :  { %2199 = vmatpush1.bf16.msra.mxu0 %v4314_v14  ;;  %2230 = vmatprep.mubr.bf16.mxu0 %v3681_v36 }
0x19a4   :  { %2200 = vmatprep.subr.bf16.mxu0 %v4318_v39 }
0x19a7   :  { %2201 = vmatpush1.bf16.msra.mxu0 %v4321_v43 }
0x19a8   :  { %2202 = vmatprep.subr.bf16.mxu0 %v4324_v54 }
0x19ab   :  { %2203 = vmatpush1.bf16.msra.mxu0 %v4327_v6  ;;  %v2049_v6 = vrot.slane %v4213_v1, 2 }
0x19ac   :  { %2204 = vmatprep.subr.bf16.mxu0 %v4330_v38 }
0x19af   :  { %2205 = vmatpush1.bf16.msra.mxu0 %v4355_v58 }
0x1a75   :  { %v2032_v18 = vpop.f32.mrb[32].mxu0 }
0x1a76   :  { %v2039_v61 = vadd.f32 %v2032_v18, %v4213_v1  ;;  %v2034_v63 = vpop.f32.mrb[33].mxu0  ;;  %v766_v18 = vrot.slane %v4228_v8, %v4515_v11  ;;  %v1368_v8 = vrot.slane %v4364_v48, %v4515_v11  ;;  %v1968_v48 = vrot.slane %v4483_v16, %v4515_v11 }
0x1a77   :  { %v2036_v53 = vpop.f32.mrb[34].mxu0  ;;  %v2046_v43 = vadd.f32 %v4223_v7, %v2034_v63  ;;  %v968_v63 = vrot.slane %v4268_v13, %v4515_v11  ;;  %v1568_v13 = vrot.slane %v4404_v23, %v4515_v11 }
0x1a78   :  { %v3267_v14 = vmul.f32 -1.442695, %v2039_v61  ;;  %v2037_v25 = vpop.f32.mrb[35].mxu0  ;;  %v771_v61 = vrot.slane %v766_v18, %v4022_v37  ;;  %v1168_v53 = vrot.slane %v4308_v5, %v4515_v11  ;;  %v1768_v5 = vrot.slane %v4444_v24, %v4515_v11 }
0x1a79   :  { %v973_v49 = vrot.slane %v968_v63, %v4022_v37  ;;  %v1373_v25 = vrot.slane %v1368_v8, %v4022_v37 }
0x1a7a   :  { %3561 = vpow2.f32 %v3267_v14  ;;  %v1173_v14 = vrot.slane %v1168_v53, %v4022_v37 }
0x1a84   :  { %v3562_v36 = vpop.eup %3561 }
0x1a85   :  { %v2043_v39 = vadd.f32 1.0, %v3562_v36  ;;  %v1573_v36 = vrot.slane %v1568_v13, %v4022_v37 }
0x1a87   :  { %3563 = vrcp.f32 %v2043_v39  ;;  %v1773_v39 = vrot.slane %v1768_v5, %v4022_v37 }
0x1a91   :  { %v3564_v54 = vpop.eup %3563 }
0x1a92   :  { %v2047_v47 = vmul.f32 %v3564_v54, %v2046_v43  ;;  %v2053_v3 = vsub.f32 1.0, %v3564_v54  ;;  %v2059_v52 = vmul.f32 %v3564_v54, %v4483_v16  ;;  %v1973_v43 = vrot.slane %v1968_v48, %v4022_v37 }
0x1a94   :  { %v2051_v38 = vadd.f32 %v2049_v6, %v2047_v47  ;;  %v767_v6 = vcombine.high %v766_v18, %v766_v18  ;;  %v969_v47 = vcombine.high %v968_v63, %v968_v63 }
0x1a96   :  { %3565 = vtanh.f32 %v2051_v38  ;;  %v775_v24 = vrot.slane %v767_v6, %v4022_v37  ;;  %v977_v16 = vrot.slane %v969_v47, %v4022_v37  ;;  %v1169_v38 = vcombine.high %v1168_v53, %v1168_v53 }
0x1aa0   :  { %v3566_v58 = vpop.eup %3565 }
0x1aa1   :  { %2055 = vrot.lane.b32.xlu0 %v3566_v58, %s3683_s1  ;;  %v1177_v58 = vrot.slane %v1169_v38, %v4022_v37 }
0x1b13   :  { %v2056_v45 = vpop.permute.xlu0 %2055 }
0x1b14   :  { %v2058_v29 = vmul.f32 %v2056_v45, %v2053_v3  ;;  %v1369_v3 = vcombine.high %v1368_v8, %v1368_v8  ;;  %v2249_v8 = vrot.slane %v4218_v59, 2 }
0x1b16   :  { %v4502_v51 = vadd.f32 %v2059_v52, %v2058_v29  ;;  %v1377_v45 = vrot.slane %v1369_v3, %v4022_v37  ;;  %v1569_v52 = vcombine.high %v1568_v13, %v1568_v13 }
0x1b18   :  { %v2091_v60 = vpack.c.bf16 %v4502_v51, %v4502_v51  ;;  %v1577_v29 = vrot.slane %v1569_v52, %v4022_v37  ;;  %v2320_v52 = vld [vmem:[%s4892_s9 + $0x18] sm:$0xff] }
0x1b1a   :  { %2093 = vrot.lane.b32.xlu1 %v2091_v60, %s3683_s1  ;;  %v1769_v60 = vcombine.high %v1768_v5, %v1768_v5 }
0x1b8c   :  { %v2094_v20 = vpop.permute.xlu1 %2093 }
0x1b8d   :  { %3268 = vmatmul.mubr.msk.bf16.vlgmr.msra.gmra.mrb[28].mxu1 %vm675_vm3, %v2094_v20  ;;  %v1777_v20 = vrot.slane %v1769_v60, %v4022_v37 }
0x1b8e   :  { %2421 = vmatprep.mubr.f32.mxu1 %v3679_v0 }
0x1c60   :  { %v2132_v1 = vpop.f32.mrb[28].mxu1 }
0x1c61   :  { %v2139_v30 = vadd.f32 %v2132_v1, %v4216_v41  ;;  %v2134_v46 = vpop.f32.mrb[29].mxu1  ;;  %v1969_v1 = vcombine.high %v1968_v48, %v1968_v48  ;;  %v1068_v48 = vrot.slane %v4288_v21, %v4515_v11  ;;  %v1668_v21 = vrot.slane %v4424_v31, %v4515_v11 }
0x1c62   :  { %v2136_v44 = vpop.f32.mrb[30].mxu1  ;;  %v2146_v27 = vadd.f32 %v4223_v7, %v2134_v46 }
0x1c63   :  { %v3269_v62 = vmul.f32 -1.442695, %v2139_v30  ;;  %v2137_v40 = vpop.f32.mrb[31].mxu1  ;;  %v1977_v30 = vrot.slane %v1969_v1, %v4022_v37  ;;  %v1673_v6 = vrot.slane %v1668_v21, %v4022_v37  ;;  %v1069_v38 = vcombine.high %v1068_v48, %v1068_v48  ;;  %v2322_v1 = vld [vmem:[%s4892_s9 + $0x28] sm:$0xff] }
0x1c65   :  { %3567 = vpow2.f32 %v3269_v62 }
0x1c6f   :  { %v3568_v15 = vpop.eup %3567 }
0x1c70   :  { %v2143_v2 = vadd.f32 1.0, %v3568_v15 }
0x1c72   :  { %3569 = vrcp.f32 %v2143_v2 }
0x1c7c   :  { %v3570_v12 = vpop.eup %3569 }
0x1c7d   :  { %v2147_v19 = vmul.f32 %v3570_v12, %v2146_v27  ;;  %v2153_v33 = vsub.f32 1.0, %v3570_v12  ;;  %v2159_v34 = vmul.f32 %v3570_v12, %v4502_v51 }
0x1c7f   :  { %v2151_v42 = vadd.f32 %v2149_v50, %v2147_v19 }
0x1c81   :  { %3571 = vtanh.f32 %v2151_v42 }
0x1c8b   :  { %v3572_v55 = vpop.eup %3571 }
0x1c8c   :  { %2155 = vrot.lane.b32.xlu0 %v3572_v55, %s3683_s1 }
0x1cfe   :  { %v2156_v35 = vpop.permute.xlu0 %2155 }
0x1cff   :  { %v2158_v10 = vmul.f32 %v2156_v35, %v2153_v33 }
0x1d01   :  { %v4517_v7 = vadd.f32 %v2159_v34, %v2158_v10 }
0x1d03   :  { %v2191_v41 = vpack.c.bf16 %v4517_v7, %v4517_v7  ;;  %v2168_v23 = vrot.slane %v4517_v7, %v4515_v11 }
0x1d05   :  { %2193 = vrot.lane.b32.xlu1 %v2191_v41, %s3683_s1  ;;  %v2173_v54 = vrot.slane %v2168_v23, %v4022_v37  ;;  %v2169_v46 = vcombine.high %v2168_v23, %v2168_v23 }
0x1d07   :  { %v2177_v44 = vrot.slane %v2169_v46, %v4022_v37 }
0x1d09   :  { %776 = vrot.lane.b32.xlu1 %v771_v61, %s3683_s1 }
0x1d0d   :  { %978 = vrot.lane.b32.xlu1 %v973_v49, %s3683_s1  ;;  %v3603_v49 = vld [vmem:[%s4891_s8] ss:$0 sm:$0xff] }
0x1d11   :  { %1178 = vrot.lane.b32.xlu1 %v1173_v14, %s3683_s1 }
0x1d15   :  { %1378 = vrot.lane.b32.xlu1 %v1373_v25, %s3683_s1 }
0x1d19   :  { %1578 = vrot.lane.b32.xlu1 %v1573_v36, %s3683_s1  ;;  %v868_v36 = vrot.slane %v4248_v17, %v4515_v11  ;;  %v1468_v17 = vrot.slane %v4384_v9, %v4515_v11  ;;  %v4629_v9 = vrot.slane %v4502_v51, %v4515_v11 }
0x1d1b   :  { %v2073_v31 = vrot.slane %v4629_v9, %v4022_v37  ;;  %v869_v47 = vcombine.high %v868_v36, %v868_v36  ;;  %v1469_v3 = vcombine.high %v1468_v17, %v1468_v17 }
0x1d1d   :  { %1778 = vrot.lane.b32.xlu1 %v1773_v39, %s3683_s1  ;;  %v873_v39 = vrot.slane %v868_v36, %v4022_v37  ;;  %v2331_v36 = vld [vmem:[%s4892_s9 + $0x70] sm:$0xff] }
0x1d21   :  { %1978 = vrot.lane.b32.xlu1 %v1973_v43, %s3683_s1  ;;  %v1073_v43 = vrot.slane %v1068_v48, %v4022_v37 }
0x1d25   :  { %2178 = vrot.lane.b32.xlu1 %v2173_v54, %s3683_s1  ;;  %v1473_v54 = vrot.slane %v1468_v17, %v4022_v37 }
0x1d29   :  { %778 = vrot.lane.b32.xlu1 %v775_v24, %s3683_s1 }
0x1d2d   :  { %980 = vrot.lane.b32.xlu1 %v977_v16, %s3683_s1  ;;  %v877_v16 = vrot.slane %v869_v47, %v4022_v37 }
0x1d31   :  { %1180 = vrot.lane.b32.xlu1 %v1177_v58, %s3683_s1 }
0x1d35   :  { %1380 = vrot.lane.b32.xlu1 %v1377_v45, %s3683_s1  ;;  %v2318_v45 = vld [vmem:[%s4892_s9 + $0x8] sm:$0xff] }
0x1d36   :  { %v3389_v60 = vpack.c.bf16 %v2320_v52, %v2318_v45 }
0x1d38   :  { %3390 = vmatprep.subr.bf16.mxu1 %v3389_v60 }
0x1d39   :  { %1580 = vrot.lane.b32.xlu1 %v1577_v29, %s3683_s1  ;;  %v2317_v29 = vld [vmem:[%s4892_s9] sm:$0xff] }
0x1d3d   :  { %1780 = vrot.lane.b32.xlu1 %v1777_v20, %s3683_s1  ;;  %v2319_v20 = vld [vmem:[%s4892_s9 + $0x10] sm:$0xff] }
0x1d3e   :  { %v3391_v46 = vpack.c.bf16 %v2319_v20, %v2317_v29  ;;  %v2333_v20 = vld [vmem:[%s4893_s10] sm:$0x3] }
0x1d40   :  { %3392 = vmatpush1.bf16.msra.mxu1 %v3391_v46 }
0x1d41   :  { %1980 = vrot.lane.b32.xlu1 %v1977_v30, %s3683_s1  ;;  %v2324_v30 = vld [vmem:[%s4892_s9 + $0x38] sm:$0xff] }
0x1d45   :  { %2180 = vrot.lane.b32.xlu1 %v2177_v44, %s3683_s1  ;;  %v3393_v44 = vpack.c.bf16 %v2324_v30, %v2322_v1  ;;  %v2338_v1 = vrot.slane %v2333_v20, %v4022_v37 }
0x1d47   :  { %3394 = vmatprep.subr.bf16.mxu1 %v3393_v44 }
0x1d77   :  { %v2194_v62 = vpop.permute.xlu1 %2193 }
0x1d78   :  { %3270 = vmatmul.mubr.msk.bf16.vlgmr.msra.gmra.mrb[36].mxu0 %vm675_vm3, %v2194_v62  ;;  %v2321_v62 = vld [vmem:[%s4892_s9 + $0x20] sm:$0xff] }
0x1d7b   :  { %v777_v40 = vpop.permute.xlu1 %776 }
0x1d7c   :  { %783 = vst.msk [vmem:[#allocation2] sm:$0x1] %vm782_vm5, %v777_v40 }
0x1d7d   :  { %786 = vst.msk [vmem:[#allocation2 + $0xf] sm:$0x1] %vm785_vm6, %v777_v40  ;;  %v2323_v40 = vld [vmem:[%s4892_s9 + $0x30] sm:$0xff] }
0x1d7f   :  { %v979_v15 = vpop.permute.xlu1 %978 }
0x1d80   :  { %984 = vst.msk [vmem:[#allocation2 + $0x2] sm:$0x1] %vm782_vm5, %v979_v15 }
0x1d81   :  { %986 = vst.msk [vmem:[#allocation2 + $0xd] sm:$0x1] %vm785_vm6, %v979_v15  ;;  %v1477_v15 = vrot.slane %v1469_v3, %v4022_v37 }
0x1d83   :  { %v1179_v2 = vpop.permute.xlu1 %1178 }
0x1d84   :  { %1184 = vst.msk [vmem:[#allocation2 + $0x4] sm:$0x1] %vm782_vm5, %v1179_v2 }
0x1d85   :  { %1186 = vst.msk [vmem:[#allocation2 + $0xb] sm:$0x1] %vm785_vm6, %v1179_v2  ;;  %v1669_v2 = vcombine.high %v1668_v21, %v1668_v21 }
0x1d87   :  { %v1379_v27 = vpop.permute.xlu1 %1378 }
0x1d88   :  { %1384 = vst.msk [vmem:[#allocation2 + $0x6] sm:$0x1] %vm782_vm5, %v1379_v27 }
0x1d89   :  { %1386 = vst.msk [vmem:[#allocation2 + $0x9] sm:$0x1] %vm785_vm6, %v1379_v27  ;;  %v3395_v27 = vpack.c.bf16 %v2323_v40, %v2321_v62  ;;  %v2342_v62 = vrot.slane %v2333_v20, %v4120_v28  ;;  %v2833_v20 = vld [vmem:[%s4894_s11 + $0x10] sm:$0xff] }
0x1d8b   :  { %v4579_v12 = vpop.permute.xlu1 %1578  ;;  %3396 = vmatpush1.bf16.msra.mxu1 %v3395_v27 }
0x1d8f   :  { %v4581_v50 = vpop.permute.xlu1 %1778 }
0x1d93   :  { %v4583_v19 = vpop.permute.xlu1 %1978 }
0x1d97   :  { %v4585_v42 = vpop.permute.xlu1 %2178 }
0x1d9b   :  { %v779_v55 = vpop.permute.xlu1 %778 }
0x1d9c   :  { %784 = vst.msk [vmem:[#allocation2 + $0x10] sm:$0x1] %vm782_vm5, %v779_v55 }
0x1d9d   :  { %787 = vst.msk [vmem:[#allocation2 + $0x1f] sm:$0x1] %vm785_vm6, %v779_v55  ;;  %v1677_v55 = vrot.slane %v1669_v2, %v4022_v37 }
0x1d9f   :  { %v981_v26 = vpop.permute.xlu1 %980 }
0x1da0   :  { %985 = vst.msk [vmem:[#allocation2 + $0x12] sm:$0x1] %vm782_vm5, %v981_v26 }
0x1da1   :  { %987 = vst.msk [vmem:[#allocation2 + $0x1d] sm:$0x1] %vm785_vm6, %v981_v26 }
0x1da3   :  { %v1181_v32 = vpop.permute.xlu1 %1180 }
0x1da4   :  { %1185 = vst.msk [vmem:[#allocation2 + $0x14] sm:$0x1] %vm782_vm5, %v1181_v32 }
0x1da5   :  { %1187 = vst.msk [vmem:[#allocation2 + $0x1b] sm:$0x1] %vm785_vm6, %v1181_v32 }
0x1da7   :  { %v1381_v57 = vpop.permute.xlu1 %1380 }
0x1da8   :  { %1385 = vst.msk [vmem:[#allocation2 + $0x16] sm:$0x1] %vm782_vm5, %v1381_v57 }
0x1da9   :  { %1387 = vst.msk [vmem:[#allocation2 + $0x19] sm:$0x1] %vm785_vm6, %v1381_v57  ;;  %v2326_v57 = vld [vmem:[%s4892_s9 + $0x48] sm:$0xff] }
0x1dab   :  { %v1581_v17 = vpop.permute.xlu1 %1580 }
0x1e4b   :  { %v2232_v33 = vpop.f32.mrb[36].mxu0 }
0x1e4c   :  { %v2239_v35 = vadd.f32 %v2232_v33, %v4218_v59  ;;  %v2234_v34 = vpop.f32.mrb[37].mxu0  ;;  %v1268_v59 = vrot.slane %v4342_v4, %v4515_v11  ;;  %v1868_v4 = vrot.slane %v4464_v22, %v4515_v11  ;;  %v1077_v22 = vrot.slane %v1069_v38, %v4022_v37  ;;  %v2328_v33 = vld [vmem:[%s4892_s9 + $0x58] sm:$0xff] }
0x1e4d   :  { %v2236_v10 = vpop.f32.mrb[38].mxu0  ;;  %v2246_v53 = vadd.f32 %v3603_v49, %v2234_v34  ;;  %v3397_v34 = vpack.c.bf16 %v2328_v33, %v2326_v57  ;;  %v2332_v49 = vld [vmem:[%s4892_s9 + $0x78] sm:$0xff] }
0x1e4e   :  { %v3271_v41 = vmul.f32 -1.442695, %v2239_v35  ;;  %v2237_v18 = vpop.f32.mrb[39].mxu0  ;;  %v1273_v23 = vrot.slane %v1268_v59, %v4022_v37  ;;  %v1873_v24 = vrot.slane %v1868_v4, %v4022_v37  ;;  %v1269_v58 = vcombine.high %v1268_v59, %v1268_v59  ;;  %v2325_v35 = vld [vmem:[%s4892_s9 + $0x40] sm:$0xff]  ;;  %v2327_v10 = vld [vmem:[%s4892_s9 + $0x50] sm:$0xff] }
0x1e4f   :  { %v1869_v26 = vcombine.high %v1868_v4, %v1868_v4  ;;  %3398 = vmatprep.subr.bf16.mxu1 %v3397_v34 }
0x1e50   :  { %3573 = vpow2.f32 %v3271_v41  ;;  %v1277_v51 = vrot.slane %v1269_v58, %v4022_v37  ;;  %v3399_v41 = vpack.c.bf16 %v2327_v10, %v2325_v35 }
0x1e51   :  { %v1877_v32 = vrot.slane %v1869_v26, %v4022_v37 }
0x1e52   :  { %3400 = vmatpush1.bf16.msra.mxu1 %v3399_v41 }
0x1e5a   :  { %v3574_v61 = vpop.eup %3573 }
0x1e5b   :  { %v2243_v63 = vadd.f32 1.0, %v3574_v61 }
0x1e5d   :  { %3575 = vrcp.f32 %v2243_v63  ;;  %v2330_v63 = vld [vmem:[%s4892_s9 + $0x68] sm:$0xff] }
0x1e67   :  { %v4599_v14 = vpop.eup %3575 }
0x1e68   :  { %v2247_v25 = vmul.f32 %v4599_v14, %v2246_v53  ;;  %v2253_v18 = vsub.f32 1.0, %v4599_v14  ;;  %v2329_v53 = vld [vmem:[%s4892_s9 + $0x60] sm:$0xff]  ;;  %s3207_s9 = sshll.u32 %s3689_s29, 4  ;;  %s3208_s9 = int_to_ptr.vmem [resolvable:$true] %s3207_s9 }
0x1e69   :  { %s3626_s2 = scalar_lea.vmem %s3208_s9, 64  ;;  %p3631_p9 = scmp.lt.s32.totalorder %s3208_s9, %s3208_s9 }
0x1e6a   :  { %v2251_v13 = vadd.f32 %v2249_v8, %v2247_v25  ;;  %v2259_v8 = vmul.f32 %v4599_v14, %v4517_v7  ;;  %v2069_v14 = vcombine.high %v4629_v9, %v4629_v9  ;;  %p3627_p8 = scmp.ne.s32.totalorder %s3208_s9, %s3626_s2  ;;  %p3632_p10 = scmp.lt.s32.totalorder %s3626_s2, %s3626_s2 }
0x1e6c   :  { %3577 = vtanh.f32 %v2251_v13  ;;  %v3401_v13 = vpack.c.bf16 %v2332_v49, %v2330_v63  ;;  %p3633_p11 = por %p3632_p10, %p3631_p9 }
0x1e6e   :  { %3402 = vmatprep.subr.bf16.mxu1 %v3401_v13  ;;  %p3634_p12 = pnand %p3633_p11, %p3627_p8 }
0x1e76   :  { %v3578_v5 = vpop.eup %3577 }
0x1e77   :  { %2255 = vrot.lane.b32.xlu0 %v3578_v5, %s3683_s1  ;;  %v3403_v5 = vpack.c.bf16 %v2331_v36, %v2329_v53 }
0x1e79   :  { %3404 = vmatpush1.bf16.msra.mxu1 %v3403_v5 }
0x1e7b   :  { %878 = vrot.lane.b32.xlu0 %v873_v39, %s3683_s1 }
0x1e7f   :  { %1078 = vrot.lane.b32.xlu0 %v1073_v43, %s3683_s1 }
0x1e83   :  { %1278 = vrot.lane.b32.xlu0 %v1273_v23, %s3683_s1 }
0x1e87   :  { %1478 = vrot.lane.b32.xlu0 %v1473_v54, %s3683_s1 }
0x1e8b   :  { %1678 = vrot.lane.b32.xlu0 %v1673_v6, %s3683_s1  ;;  %v1781_v6 = vpop.permute.xlu1 %1780 }
0x1e8f   :  { %1878 = vrot.lane.b32.xlu0 %v1873_v24, %s3683_s1  ;;  %v1981_v4 = vpop.permute.xlu1 %1980 }
0x1e93   :  { %2078 = vrot.lane.b32.xlu0 %v2073_v31, %s3683_s1  ;;  %v2181_v31 = vpop.permute.xlu1 %2180 }
0x1e97   :  { %880 = vrot.lane.b32.xlu0 %v877_v16, %s3683_s1 }
0x1e9b   :  { %1080 = vrot.lane.b32.xlu0 %v1077_v22, %s3683_s1 }
0x1e9f   :  { %1280 = vrot.lane.b32.xlu0 %v1277_v51, %s3683_s1 }
0x1ea3   :  { %1480 = vrot.lane.b32.xlu0 %v1477_v15, %s3683_s1 }
0x1ea7   :  { %1680 = vrot.lane.b32.xlu0 %v1677_v55, %s3683_s1 }
0x1eab   :  { %1880 = vrot.lane.b32.xlu0 %v1877_v32, %s3683_s1 }
0x1ee9   :  { %v2256_v61 = vpop.permute.xlu0 %2255 }
0x1eea   :  { %v2258_v25 = vmul.f32 %v2256_v61, %v2253_v18 }
0x1eec   :  { %v4698_v39 = vadd.f32 %v2259_v8, %v2258_v25 }
0x1eed   :  { %v879_v48 = vpop.permute.xlu0 %878 }
0x1eee   :  { %884 = vst.msk [vmem:[#allocation2 + $0x1] sm:$0x1] %vm782_vm5, %v879_v48  ;;  %v2268_v43 = vrot.slane %v4698_v39, %v4515_v11  ;;  %v2077_v11 = vrot.slane %v2069_v14, %v4022_v37 }
0x1eef   :  { %886 = vst.msk [vmem:[#allocation2 + $0xe] sm:$0x1] %vm785_vm6, %v879_v48  ;;  %2186 = vst.msk [vmem:[#allocation2 + $0x1] sm:$0x1] %vm785_vm6, %v4585_v42 }
0x1ef0   :  { %2184 = vst.msk [vmem:[#allocation2 + $0xe] sm:$0x1] %vm782_vm5, %v4585_v42  ;;  %v2273_v7 = vrot.slane %v2268_v43, %v4022_v37  ;;  %v2269_v42 = vcombine.high %v2268_v43, %v2268_v43 }
0x1ef1   :  { %v1079_v59 = vpop.permute.xlu0 %1078 }
0x1ef2   :  { %1084 = vst.msk [vmem:[#allocation2 + $0x3] sm:$0x1] %vm782_vm5, %v1079_v59  ;;  %2278 = vrot.lane.b32.xlu0 %v2273_v7, %s3683_s1  ;;  %v2277_v54 = vrot.slane %v2269_v42, %v4022_v37 }
0x1ef3   :  { %1086 = vst.msk [vmem:[#allocation2 + $0xc] sm:$0x1] %vm785_vm6, %v1079_v59  ;;  %1986 = vst.msk [vmem:[#allocation2 + $0x3] sm:$0x1] %vm785_vm6, %v4583_v19 }
0x1ef4   :  { %1984 = vst.msk [vmem:[#allocation2 + $0xc] sm:$0x1] %vm782_vm5, %v4583_v19 }
0x1ef5   :  { %v1279_v23 = vpop.permute.xlu0 %1278 }
0x1ef6   :  { %1284 = vst.msk [vmem:[#allocation2 + $0x5] sm:$0x1] %vm782_vm5, %v1279_v23  ;;  %2080 = vrot.lane.b32.xlu0 %v2077_v11, %s3683_s1 }
0x1ef7   :  { %1286 = vst.msk [vmem:[#allocation2 + $0xa] sm:$0x1] %vm785_vm6, %v1279_v23  ;;  %1786 = vst.msk [vmem:[#allocation2 + $0x5] sm:$0x1] %vm785_vm6, %v4581_v50 }
0x1ef8   :  { %1784 = vst.msk [vmem:[#allocation2 + $0xa] sm:$0x1] %vm782_vm5, %v4581_v50 }
0x1ef9   :  { %v1479_v19 = vpop.permute.xlu0 %1478 }
0x1efa   :  { %1484 = vst.msk [vmem:[#allocation2 + $0x7] sm:$0x1] %vm782_vm5, %v1479_v19  ;;  %2280 = vrot.lane.b32.xlu0 %v2277_v54, %s3683_s1 }
0x1efb   :  { %1486 = vst.msk [vmem:[#allocation2 + $0x8] sm:$0x1] %vm785_vm6, %v1479_v19  ;;  %1586 = vst.msk [vmem:[#allocation2 + $0x7] sm:$0x1] %vm785_vm6, %v4579_v12 }
0x1efc   :  { %1584 = vst.msk [vmem:[#allocation2 + $0x8] sm:$0x1] %vm782_vm5, %v4579_v12 }
0x1efd   :  { %v1679_v21 = vpop.permute.xlu0 %1678 }
0x1efe   :  { %1684 = vst.msk [vmem:[#allocation2 + $0x9] sm:$0x1] %vm782_vm5, %v1679_v21 }
0x1eff   :  { %1686 = vst.msk [vmem:[#allocation2 + $0x6] sm:$0x1] %vm785_vm6, %v1679_v21 }
0x1f01   :  { %v1879_v50 = vpop.permute.xlu0 %1878 }
0x1f02   :  { %1884 = vst.msk [vmem:[#allocation2 + $0xb] sm:$0x1] %vm782_vm5, %v1879_v50 }
0x1f03   :  { %1886 = vst.msk [vmem:[#allocation2 + $0x4] sm:$0x1] %vm785_vm6, %v1879_v50 }
0x1f05   :  { %v2079_v24 = vpop.permute.xlu0 %2078 }
0x1f06   :  { %2084 = vst.msk [vmem:[#allocation2 + $0xd] sm:$0x1] %vm782_vm5, %v2079_v24 }
0x1f07   :  { %2086 = vst.msk [vmem:[#allocation2 + $0x2] sm:$0x1] %vm785_vm6, %v2079_v24 }
0x1f09   :  { %v881_v9 = vpop.permute.xlu0 %880 }
0x1f0a   :  { %885 = vst.msk [vmem:[#allocation2 + $0x11] sm:$0x1] %vm782_vm5, %v881_v9 }
0x1f0b   :  { %887 = vst.msk [vmem:[#allocation2 + $0x1e] sm:$0x1] %vm785_vm6, %v881_v9  ;;  %2187 = vst.msk [vmem:[#allocation2 + $0x11] sm:$0x1] %vm785_vm6, %v2181_v31 }
0x1f0c   :  { %2185 = vst.msk [vmem:[#allocation2 + $0x1e] sm:$0x1] %vm782_vm5, %v2181_v31 }
0x1f0d   :  { %v1081_v12 = vpop.permute.xlu0 %1080 }
0x1f0e   :  { %1085 = vst.msk [vmem:[#allocation2 + $0x13] sm:$0x1] %vm782_vm5, %v1081_v12 }
0x1f0f   :  { %1087 = vst.msk [vmem:[#allocation2 + $0x1c] sm:$0x1] %vm785_vm6, %v1081_v12  ;;  %1987 = vst.msk [vmem:[#allocation2 + $0x13] sm:$0x1] %vm785_vm6, %v1981_v4 }
0x1f10   :  { %1985 = vst.msk [vmem:[#allocation2 + $0x1c] sm:$0x1] %vm782_vm5, %v1981_v4 }
0x1f11   :  { %v1281_v47 = vpop.permute.xlu0 %1280 }
0x1f12   :  { %1285 = vst.msk [vmem:[#allocation2 + $0x15] sm:$0x1] %vm782_vm5, %v1281_v47 }
0x1f13   :  { %1287 = vst.msk [vmem:[#allocation2 + $0x1a] sm:$0x1] %vm785_vm6, %v1281_v47  ;;  %1787 = vst.msk [vmem:[#allocation2 + $0x15] sm:$0x1] %vm785_vm6, %v1781_v6 }
0x1f14   :  { %1785 = vst.msk [vmem:[#allocation2 + $0x1a] sm:$0x1] %vm782_vm5, %v1781_v6 }
0x1f15   :  { %v1481_v16 = vpop.permute.xlu0 %1480 }
0x1f16   :  { %1485 = vst.msk [vmem:[#allocation2 + $0x17] sm:$0x1] %vm782_vm5, %v1481_v16 }
0x1f17   :  { %1487 = vst.msk [vmem:[#allocation2 + $0x18] sm:$0x1] %vm785_vm6, %v1481_v16  ;;  %1587 = vst.msk [vmem:[#allocation2 + $0x17] sm:$0x1] %vm785_vm6, %v1581_v17 }
0x1f18   :  { %1585 = vst.msk [vmem:[#allocation2 + $0x18] sm:$0x1] %vm782_vm5, %v1581_v17 }
0x1f19   :  { %v1681_v38 = vpop.permute.xlu0 %1680 }
0x1f1a   :  { %1685 = vst.msk [vmem:[#allocation2 + $0x19] sm:$0x1] %vm782_vm5, %v1681_v38 }
0x1f1b   :  { %1687 = vst.msk [vmem:[#allocation2 + $0x16] sm:$0x1] %vm785_vm6, %v1681_v38 }
0x1f1d   :  { %v1881_v22 = vpop.permute.xlu0 %1880 }
0x1f1e   :  { %1885 = vst.msk [vmem:[#allocation2 + $0x1b] sm:$0x1] %vm782_vm5, %v1881_v22 }
0x1f1f   :  { %1887 = vst.msk [vmem:[#allocation2 + $0x14] sm:$0x1] %vm785_vm6, %v1881_v22 }
0x1f64   :  { %v2279_v58 = vpop.permute.xlu0 %2278 }
0x1f65   :  { %2284 = vst.msk [vmem:[#allocation2 + $0xf] sm:$0x1] %vm782_vm5, %v2279_v58 }
0x1f66   :  { %2286 = vst.msk [vmem:[#allocation2] sm:$0x1] %vm785_vm6, %v2279_v58 }
0x1f68   :  { %v2081_v51 = vpop.permute.xlu0 %2080 }
0x1f69   :  { %2085 = vst.msk [vmem:[#allocation2 + $0x1d] sm:$0x1] %vm782_vm5, %v2081_v51 }
0x1f6a   :  { %2087 = vst.msk [vmem:[#allocation2 + $0x12] sm:$0x1] %vm785_vm6, %v2081_v51 }
0x1f6c   :  { %v2281_v3 = vpop.permute.xlu0 %2280  ;;  %v2314_v52 = vld [vmem:[#allocation2 + $0x8] sm:$0xff] }
0x1f6d   :  { %v2313_v45 = vld [vmem:[#allocation2] sm:$0xff]  ;;  %2285 = vst.msk [vmem:[#allocation2 + $0x1f] sm:$0x1] %vm782_vm5, %v2281_v3 }
0x1f6e   :  { %2287 = vst.msk [vmem:[#allocation2 + $0x10] sm:$0x1] %vm785_vm6, %v2281_v3  ;;  %3272 = vmatmul.mubr.msk.f32.vlgmr.msra.gmra.mrb[32].mxu1 %vm675_vm3, %v2313_v45 }
0x1f6f   :  { %2427 = vmatprep.mubr.f32.mxu1 %v3679_v0 }
0x1f72   :  { %3273 = vmatmul.mubr.msk.f32.gmra.mrb[34].mxu1 %vm675_vm3, %v2314_v52 }
0x1f73   :  { %2433 = vmatprep.mubr.f32.mxu1 %v3679_v0 }
0x1f74   :  { %v2316_v60 = vld [vmem:[#allocation2 + $0x18] sm:$0xff] }
0x1f75   :  { %v2315_v29 = vld [vmem:[#allocation2 + $0x10] sm:$0xff] }
0x1f76   :  { %3274 = vmatmul.mubr.msk.f32.gmra.mrb[36].mxu1 %vm675_vm3, %v2315_v29  ;;  %v2831_v29 = vld [vmem:[%s4894_s11] sm:$0xff] }
0x1f77   :  { %2439 = vmatprep.mubr.f32.mxu1 %v3679_v0 }
0x1f7a   :  { %3275 = vmatmul.mubr.msk.f32.gmra.mrb[38].mxu1 %vm675_vm3, %v2316_v60  ;;  %v2832_v60 = vld [vmem:[%s4894_s11 + $0x8] sm:$0xff] }
0x2041   :  { %v2423_v30 = vpop.f32.mrb[32].mxu1 }
0x2042   :  { %v2424_v46 = vadd.f32 %v2423_v30, %v2338_v1  ;;  %v2425_v44 = vpop.f32.mrb[33].mxu1  ;;  %v2834_v30 = vld [vmem:[%s4894_s11 + $0x18] sm:$0xff] }
0x2043   :  { %v2426_v27 = vadd.f32 %v2425_v44, %v2342_v62  ;;  %v2835_v44 = vld [vmem:[%s4894_s11 + $0x20] sm:$0xff] }
0x2044   :  { %3333 = vmatprep.mubr.msk.f32.mxu0 %vm675_vm3, %v2424_v46 }
0x2045   :  { %v2429_v40 = vpop.f32.mrb[34].mxu1 }
0x2046   :  { %v2430_v15 = vadd.f32 %v2429_v40, %v2338_v1  ;;  %v2431_v2 = vpop.f32.mrb[35].mxu1 }
0x2047   :  { %v2432_v55 = vadd.f32 %v2431_v2, %v2342_v62  ;;  %v2838_v2 = vld [vmem:[%s4894_s11 + $0x38] sm:$0xff] }
0x2048   :  { %v3458_v26 = vpack.i.bf16 %v2430_v15, %v2424_v46  ;;  %v3429_v46 = vpack.c.bf16 %v2834_v30, %v2833_v20 }
0x2049   :  { %v3417_v32 = vpack.c.bf16 %v2432_v55, %v2426_v27  ;;  %v2435_v57 = vpop.f32.mrb[36].mxu1 }
0x204a   :  { %3459 = vrot.lane.b32.xlu1 %v3458_v26, %s3683_s1  ;;  %v2437_v33 = vpop.f32.mrb[37].mxu1  ;;  %v2436_v37 = vadd.f32 %v2435_v57, %v2338_v1 }
0x204b   :  { %v2438_v41 = vadd.f32 %v2437_v33, %v2342_v62 }
0x204d   :  { %v2441_v35 = vpop.f32.mrb[38].mxu1 }
0x204e   :  { %v2442_v34 = vadd.f32 %v2441_v35, %v2338_v1  ;;  %v2443_v10 = vpop.f32.mrb[39].mxu1  ;;  %v3425_v1 = vpack.c.bf16 %v2832_v60, %v2831_v29 }
0x204f   :  { %v2444_v18 = vadd.f32 %v2443_v10, %v2342_v62  ;;  %v2836_v62 = vld [vmem:[%s4894_s11 + $0x28] sm:$0xff] }
0x2050   :  { %v3463_v28 = vpack.i.bf16 %v2442_v34, %v2436_v37  ;;  %3426 = vmatprep.subr.bf16.mxu1 %v3425_v1  ;;  %v3433_v40 = vpack.c.bf16 %v2836_v62, %v2835_v44 }
0x2051   :  { %v4780_v61 = vpack.c.bf16 %v2444_v18, %v2438_v41  ;;  %3428 = vmatpush3.bf16.msra.mxu1 %v3425_v1 }
0x2052   :  { %3464 = vrot.lane.b32.xlu0 %v3463_v28, %s3683_s1  ;;  %3430 = vmatprep.subr.bf16.mxu1 %v3429_v46 }
0x2055   :  { %3432 = vmatpush3.bf16.msra.mxu1 %v3429_v46 }
0x2056   :  { %3434 = vmatprep.subr.bf16.mxu1 %v3433_v40 }
0x2059   :  { %3436 = vmatpush3.bf16.msra.mxu1 %v3433_v40 }
0x20bc   :  { %v3460_v63 = vpop.permute.xlu1 %3459 }
0x20bd   :  { %v3462_v49 = vunpack.i.h.bf16 %v3460_v63  ;;  %v3461_v53 = vunpack.i.l.bf16 %v3460_v63 }
0x20bf   :  { %v3405_v8 = vpack.c.bf16 %v3462_v49, %v3461_v53 }
0x20c1   :  { %3407 = vmatprep.subr.msk.bf16.mxu0 %vm3406_vm7, %v3405_v8 }
0x20c2   :  { %3410 = vmatpush3.bf16.xpose.msk.msra.mxu0 %vm3406_vm7, %v3405_v8 }
0x20c4   :  { %v3465_v25 = vpop.permute.xlu0 %3464 }
0x20c5   :  { %v3467_v13 = vunpack.i.h.bf16 %v3465_v25  ;;  %v3466_v36 = vunpack.i.l.bf16 %v3465_v25 }
0x20c7   :  { %v3411_v5 = vpack.c.bf16 %v3467_v13, %v3466_v36 }
0x20c9   :  { %3334 = vmatmul.mubr.msk.f32.vlgmr.msra.gmra.mrb[40].mxu0 %vm675_vm3, %v2430_v15  ;;  %3413 = vmatprep.subr.msk.bf16.mxu0 %vm3406_vm7, %v3411_v5  ;;  %v2837_v15 = vld [vmem:[%s4894_s11 + $0x30] sm:$0xff] }
0x20ca   :  { %3416 = vmatpush3.bf16.xpose.msk.msra.mxu0 %vm3406_vm7, %v3411_v5  ;;  %3340 = vmatprep.mubr.msk.f32.mxu0 %vm675_vm3, %v2436_v37  ;;  %v3437_v27 = vpack.c.bf16 %v2838_v2, %v2837_v15 }
0x20cb   :  { %3418 = vmatprep.subr.bf16.mxu0 %v3417_v32 }
0x20cc   :  { %3438 = vmatprep.subr.bf16.mxu1 %v3437_v27 }
0x20cd   :  { %3440 = vmatpush3.bf16.msra.mxu1 %v3437_v27 }
0x20d1   :  { %3341 = vmatmul.mubr.msk.f32.vlgmr.msra.gmra.mrb[42].mxu0 %vm675_vm3, %v2442_v34 }
0x20d2   :  { %3420 = vmatpush3.bf16.msra.mxu0 %v3417_v32 }
0x20d3   :  { %3422 = vmatprep.subr.bf16.mxu0 %v4780_v61 }
0x219c   :  { %v3335_v48 = vpop.f32.mrb[40].mxu0 }
0x219d   :  { %v2526_v43 = vpop.f32.mrb[41].mxu0  ;;  %v2628_v7 = vsel %vm2624_vm8, %v3335_v48, -inf }
0x219e   :  { %2629 = vmax.xlane.f32.xlu0 %v2628_v7  ;;  %v2625_v14 = vsel %vm2624_vm8, %v2526_v43, -inf }
0x219f   :  { %2626 = vmax.xlane.f32.xlu1 %v2625_v14 }
0x21a4   :  { %v3342_v59 = vpop.f32.mrb[42].mxu0 }
0x21a5   :  { %v2615_v11 = vpop.f32.mrb[43].mxu0  ;;  %v2634_v42 = vsel %vm2624_vm8, %v3342_v59, -inf }
0x21a6   :  { %2635 = vmax.xlane.f32.xlu1 %v2634_v42  ;;  %v2631_v23 = vsel %vm2624_vm8, %v2615_v11, -inf }
0x21a7   :  { %2632 = vmax.xlane.f32.xlu0 %v2631_v23 }
0x222b   :  { %v2630_v17 = vpop.xlane.xlu0 %2629 }
0x222c   :  { %v2638_v54 = vsub.f32 %v3335_v48, %v2630_v17  ;;  %v2627_v19 = vpop.xlane.xlu1 %2626 }
0x222d   :  { %v2637_v21 = vsub.f32 %v2526_v43, %v2627_v19 }
0x222e   :  { %v2643_v6 = vmul.f32 1.442695, %v2638_v54 }
0x222f   :  { %v2641_v50 = vmul.f32 1.442695, %v2637_v21 }
0x2230   :  { %3579 = vpow2.f32 %v2643_v6 }
0x2231   :  { %3581 = vpow2.f32 %v2641_v50  ;;  %v2296_v50 = vrot.slane %v4698_v39, %v4025_v56 }
0x2233   :  { %v2636_v4 = vpop.xlane.xlu1 %2635 }
0x2234   :  { %v2640_v24 = vsub.f32 %v3342_v59, %v2636_v4  ;;  %v2633_v9 = vpop.xlane.xlu0 %2632  ;;  %v2943_v59 = vld [vmem:[%s4896_s13] sm:$0x7f]  ;;  %s3688_s13 = smov 96  }
0x2235   :  { %v2639_v31 = vsub.f32 %v2615_v11, %v2633_v9 }
0x2236   :  { %v2647_v12 = vmul.f32 1.442695, %v2640_v24 }
0x2237   :  { %v2645_v47 = vmul.f32 1.442695, %v2639_v31 }
0x2238   :  { %3583 = vpow2.f32 %v2647_v12 }
0x2239   :  { %3585 = vpow2.f32 %v2645_v47 }
0x223a   :  { %v3580_v16 = vpop.eup %3579 }
0x223b   :  { %v3582_v38 = vpop.eup %3581  ;;  %v2652_v22 = vsel %vm2624_vm8, %v3580_v16, 0.0 }
0x223c   :  { %2653 = vadd.xlane.f32.xlu1 %v2652_v22  ;;  %v2649_v58 = vsel %vm2624_vm8, %v3582_v38, 0.0 }
0x223d   :  { %2650 = vadd.xlane.f32.xlu0 %v2649_v58 }
0x2242   :  { %v3584_v51 = vpop.eup %3583 }
0x2243   :  { %v3586_v3 = vpop.eup %3585  ;;  %v2658_v45 = vsel %vm2624_vm8, %v3584_v51, 0.0 }
0x2244   :  { %2659 = vadd.xlane.f32.xlu1 %v2658_v45  ;;  %v2655_v52 = vsel %vm2624_vm8, %v3586_v3, 0.0 }
0x2245   :  { %2656 = vadd.xlane.f32.xlu0 %v2655_v52 }
0x22c9   :  { %v2654_v55 = vpop.xlane.xlu1 %2653 }
0x22ca   :  { %3587 = vrcp.f32 %v2654_v55  ;;  %v2651_v26 = vpop.xlane.xlu0 %2650 }
0x22cb   :  { %3589 = vrcp.f32 %v2651_v26 }
0x22d1   :  { %v2660_v32 = vpop.xlane.xlu1 %2659 }
0x22d2   :  { %3591 = vrcp.f32 %v2660_v32  ;;  %v2657_v57 = vpop.xlane.xlu0 %2656 }
0x22d3   :  { %3593 = vrcp.f32 %v2657_v57 }
0x22d4   :  { %v3588_v33 = vpop.eup %3587 }
0x22d5   :  { %v3590_v35 = vpop.eup %3589  ;;  %v2666_v34 = vmul.f32 %v3588_v33, %v3580_v16 }
0x22d6   :  { %v2665_v37 = vmul.f32 %v3590_v35, %v3582_v38 }
0x22d8   :  { %3347 = vmatprep.mubr.msk.f32.mxu0 %vm2624_vm8, %v2665_v37 }
0x22d9   :  { %3348 = vmatmul.mubr.msk.f32.vlgmr.msra.gmra.mrb[44].mxu0 %vm2624_vm8, %v2666_v34 }
0x22da   :  { %3424 = vmatpush3.bf16.msra.mxu0 %v4780_v61  ;;  %v3288_v61 = vld [vmem:[%s4895_s12] ss:$0 sm:$0xff] }
0x22db   :  { %3379 = vmatprep.subr.mxu0 %v3679_v0 }
0x22dc   :  { %v3592_v10 = vpop.eup %3591 }
0x22dd   :  { %v3594_v41 = vpop.eup %3593  ;;  %v2668_v28 = vmul.f32 %v3592_v10, %v3584_v51 }
0x22de   :  { %v2667_v18 = vmul.f32 %v3594_v41, %v3586_v3 }
0x22e0   :  { %3354 = vmatprep.mubr.msk.f32.mxu0 %vm2624_vm8, %v2667_v18 }
0x22e1   :  { %3355 = vmatmul.mubr.msk.f32.vlgmr.msra.gmra.mrb[46].mxu0 %vm2624_vm8, %v2668_v28 }
0x22e2   :  { %3381 = vmatprep.mubr.msk.f32.mxu0 %vm3687_vm10, %v3679_v0 }
0x22e3   :  { %3380 = vmatpush3.xpose.msk.msra.mxu0 %vm2991_vm9, %v2943_v59 }
0x22e4   :  { %3384 = vmatprep.subr.mxu0 %v3679_v0 }
0x23ac   :  { %v3349_v63 = vpop.f32.mrb[44].mxu0 }
0x23ad   :  { %v2741_v49 = vpop.f32.mrb[45].mxu0 }
0x23ae   :  { %3373 = vmatprep.mubr.msk.f32.mxu1 %vm675_vm3, %v2741_v49 }
0x23af   :  { %3374 = vmatmul.mubr.msk.f32.vlgmr.msra.gmra.mrb[40].mxu1 %vm675_vm3, %v3349_v63 }
0x23b4   :  { %v3356_v53 = vpop.f32.mrb[46].mxu0 }
0x23b5   :  { %v2822_v8 = vpop.f32.mrb[47].mxu0 }
0x23b6   :  { %3376 = vmatprep.mubr.msk.f32.mxu1 %vm675_vm3, %v2822_v8 }
0x23b7   :  { %3377 = vmatmul.mubr.msk.f32.gmra.mrb[42].mxu1 %vm675_vm3, %v3356_v53 }
0x2482   :  { %v3375_v25 = vpop.f32.mrb[40].mxu1 }
0x2483   :  { %v2930_v13 = vadd.f32 %v3375_v25, %v3288_v61  ;;  %v2924_v36 = vpop.f32.mrb[41].mxu1 }
0x2484   :  { %v2925_v5 = vadd.f32 %v3288_v61, %v2924_v36 }
0x2485   :  { %2949 = vrot.lane.b32.xlu1 %v2930_v13, %s3685_s26 }
0x2486   :  { %2947 = vrot.lane.b32.xlu0 %v2925_v5, %s3685_s26 }
0x2489   :  { %2955 = vrot.lane.b32.xlu1 %v2930_v13, %s3686_s27 }
0x248a   :  { %v3378_v48 = vpop.f32.mrb[42].mxu1 }
0x248b   :  { %v2934_v43 = vpop.f32.mrb[43].mxu1  ;;  %v2940_v14 = vadd.f32 %v3378_v48, %v3288_v61 }
0x248c   :  { %v2935_v7 = vadd.f32 %v3288_v61, %v2934_v43 }
0x248d   :  { %2953 = vrot.lane.b32.xlu1 %v2925_v5, %s3686_s27 }
0x248e   :  { %3070 = vrot.lane.b32.xlu0 %v2935_v7, %s3685_s26 }
0x2491   :  { %3076 = vrot.lane.b32.xlu1 %v2935_v7, %s3686_s27 }
0x2492   :  { %3072 = vrot.lane.b32.xlu0 %v2940_v14, %s3685_s26 }
0x2496   :  { %3078 = vrot.lane.b32.xlu0 %v2940_v14, %s3686_s27 }
0x24b4   :  { %3082 = vxpose.xlu0.b32.start [1/6] (short) (narrow) %v2935_v7, 8 }
0x24b8   :  { %3083 = vxpose.xlu0.b32.cont [2/6] (short) (narrow) %v2940_v14, 8 }
0x24ba   :  { %2959 = vxpose.xlu1.b32.start [1/6] (short) (narrow) %v2925_v5, 8 }
0x24be   :  { %2960 = vxpose.xlu1.b32.cont [2/6] (short) (narrow) %v2930_v13, 8 }
0x24f7   :  { %v2950_v11 = vpop.permute.xlu1 %2949 }
0x24f8   :  { %v2948_v42 = vpop.permute.xlu0 %2947 }
0x24f9   :  { %2961 = vxpose.xlu1.b32.cont [3/6] (short) (narrow) %v2948_v42, 8 }
0x24fb   :  { %v2956_v23 = vpop.permute.xlu1 %2955 }
0x24fd   :  { %2962 = vxpose.xlu1.b32.cont [4/6] (short) (narrow) %v2950_v11, 8 }
0x24ff   :  { %v2954_v17 = vpop.permute.xlu1 %2953 }
0x2500   :  { %v3071_v54 = vpop.permute.xlu0 %3070 }
0x2501   :  { %2963 = vxpose.xlu1.b32.cont [5/6] (short) (narrow) %v2954_v17, 8  ;;  %3084 = vxpose.xlu0.b32.cont [3/6] (short) (narrow) %v3071_v54, 8 }
0x2503   :  { %v3077_v21 = vpop.permute.xlu1 %3076 }
0x2504   :  { %v3073_v19 = vpop.permute.xlu0 %3072 }
0x2505   :  { %2964 = vxpose.xlu1.b32.end [6/6] (short) (narrow) %v2956_v23, 8  ;;  %3085 = vxpose.xlu0.b32.cont [4/6] (short) (narrow) %v3073_v19, 8 }
0x2508   :  { %v3079_v6 = vpop.permute.xlu0 %3078 }
0x2509   :  { %3086 = vxpose.xlu0.b32.cont [5/6] (short) (narrow) %v3077_v21, 8 }
0x250d   :  { %3087 = vxpose.xlu0.b32.end [6/6] (short) (narrow) %v3079_v6, 8 }
0x2523   :  { %2304 = vrot.lane.b32.xlu1 %v2296_v50, %s3683_s1 }
0x2536   :  { %2288 = vrot.lane.b32.xlu0 %v4698_v39, %s3688_s13 }
0x2571   :  { %v2975_v4 = vpop.trf.xlu1 }
0x2572   :  { %3382 = vmatmul.mubr.msk.f32.vlgmr.msra.gmra.mrb[48].mxu0 %vm2991_vm9, %v2975_v4 }
0x2573   :  { %3385 = vmatpush3.xpose.msk.msra.mxu0 %vm2991_vm9, %v2943_v59  ;;  %3386 = vmatprep.mubr.msk.f32.mxu0 %vm3687_vm10, %v3679_v0 }
0x2579   :  { %v3098_v24 = vpop.trf.xlu0 }
0x257a   :  { %3387 = vmatmul.mubr.msk.f32.vlgmr.msra.gmra.mrb[50].mxu0 %vm2991_vm9, %v3098_v24 }
0x2595   :  { %v2305_v9 = vpop.permute.xlu1 %2304 }
0x2596   :  { %2311 = vst.msk [vmem:[#allocation7] sm:$0x3] %vm2310_vm11, %v2305_v9 }
0x25a8   :  { %v2289_v31 = vpop.permute.xlu0 %2288 }
0x25a9   :  { %v2303_v12 = vrot.slane %v2289_v31, %v4025_v56 }
0x25ab   :  { %2306 = vrot.lane.b32.xlu1 %v2303_v12, %s3683_s1 }
0x261d   :  { %v2307_v39 = vpop.permute.xlu1 %2306 }
0x261e   :  { %2312 = vst.msk [vmem:[#allocation7 + $0x2] sm:$0x3] %vm2310_vm11, %v2307_v39 }
0x261f   :  { %3637 = shalt.err (!%p3634_p12)
}
0x2620   :  { %s3638_s3 = scalar_lea.hbm %s4899_s16, 64 }
0x2621   :  { %p3639_p13 = scmp.ne.s32.totalorder %s4899_s16, %s3638_s3  ;;  %p3642_p0 = scmp.lt.u32.totalorder %s3638_s3, %s4899_s16 }
0x2623   :  { %p3644_p1 = pnand %p3642_p0, %p3639_p13 }
0x2625   :  { %3647 = shalt.err (!%p3644_p1)
}
0x2626   :  { %s3690_s6 = smov 2   ;;  %v2944_v0 = vld [vmem:[%s4897_s14] sm:$0xf]  ;;  %vm3187_vm12 = vcmask 52224   ;;  %s3691_s21 = smov [#allocation6]  }
0x2627   :  { %3213 = dma.vmem_to_hbm [thread:$0]  %s3208_s9, 64, %s4899_s16, [#allocation8], %s3680_s25, %s3680_s25, %s3690_s6  }
0x2628   :  { %s3195_s23 = sshll.u32 %s3691_s21, 4  ;;  %s3196_s23 = int_to_ptr.vmem [resolvable:$true] %s3195_s23 }
0x2629   :  { %s3648_s24 = scalar_lea.vmem %s3196_s23, 128  ;;  %p3653_p3 = scmp.lt.s32.totalorder %s3196_s23, %s3196_s23 }
0x262a   :  { %p3649_p2 = scmp.ne.s32.totalorder %s3196_s23, %s3648_s24  ;;  %p3654_p4 = scmp.lt.s32.totalorder %s3648_s24, %s3648_s24 }
0x262c   :  { %p3655_p5 = por %p3654_p4, %p3653_p3 }
0x262e   :  { %p3656_p6 = pnand %p3655_p5, %p3649_p2 }
0x2645   :  { %v3064_v56 = vpop.f32.mrb[48].mxu0 }
0x2646   :  { %v3065_v47 = vadd.f32 %v3064_v56, %v2944_v0  ;;  %v3383_v16 = vpop.f32.mrb[49].mxu0 }
0x2648   :  { %3188 = vst.msk [vmem:[#allocation6] sm:$0xf] %vm3187_vm12, %v3065_v47 }
0x264d   :  { %v3183_v38 = vpop.f32.mrb[50].mxu0 }
0x264e   :  { %v3184_v22 = vadd.f32 %v3183_v38, %v2944_v0  ;;  %v3388_v58 = vpop.f32.mrb[51].mxu0 }
0x2650   :  { %3189 = vst.msk [vmem:[#allocation6 + $0x4] sm:$0xf] %vm3187_vm12, %v3184_v22 }
0x2651   :  { %3659 = shalt.err (!%p3656_p6)
}
0x2652   :  { %s3660_s25 = scalar_lea.hbm %s4898_s15, 128 }
0x2653   :  { %p3661_p7 = scmp.ne.s32.totalorder %s4898_s15, %s3660_s25  ;;  %p3664_p8 = scmp.lt.u32.totalorder %s3660_s25, %s4898_s15 }
0x2655   :  { %p3666_p9 = pnand %p3664_p8, %p3661_p7 }
0x2657   :  { %3669 = shalt.err (!%p3666_p9)
}
0x2658   :  { %s3692_s27 = smov 4  }
0x2659   :  { %3201 = dma.vmem_to_hbm [thread:$0]  %s3196_s23, 128, %s4898_s15, [#allocation5], %s3683_s1, %s3683_s1, %s3692_s27  }
0x265a   :  { %3672 = dma.done.wait [#allocation5], 128  }
0x265b   :  { %3673 = vsyncadd [#allocation5], 4294967168 }
0x265c   :  { %3674 = dma.done.wait [#allocation8], 64  }
0x265d   :  { %3675 = vsyncadd [#allocation8], 4294967232 }
0x265e   :  { %3220 = vsyncpa [#allocation4], 1 }
0x265f   :  { %3221 = vsyncpa [#allocation5], 1 }
0x2660   :  { %3222 = vsyncpa [#allocation8], 1 }

</bundles_post_ra>
